<compile_context>
chip_gen: v7x
topology: tpu7x:2x2x1
jax: 0.10.0
libtpu: 0.0.40
codegen_flags: <defaults>
</compile_context>

<pallas_src>
import functools

import jax
import jax.numpy as jnp
from jax.experimental import pallas as pl
from jax.experimental.pallas import tpu as pltpu


# ---------------------------------------------------------------------------
# Fused Pallas kernel
# ---------------------------------------------------------------------------
def _regional_attn_kernel(x_ref, txt_ref, spm_ref, rgm_ref,
                          w1_ref, b1_ref, w2_ref, b2_ref,
                          wq_ref, wk_ref, wv_ref, wo_ref, bo_ref,
                          out_ref, tf_sc, acc_sc, *, dot_dtype):
    n = pl.program_id(1)                      # object index within the batch row
    num_txt = txt_ref.shape[1]                # number of objects / text tokens
    n_heads, _, d_head = wq_ref.shape
    scale = 1.0 / (d_head ** 0.5)

    x = x_ref[0]                              # (L, D) visual tokens
    xd = x.astype(dot_dtype)

    # ---- prologue (once per batch row): text MLP + residual init -----------
    @pl.when(n == 0)
    def _():
        t = txt_ref[0].astype(dot_dtype)                                   # (N, ctx)
        h = jnp.dot(t, w1_ref[...], preferred_element_type=jnp.float32) + b1_ref[...]
        h = h * jax.nn.sigmoid(h)                                          # SiLU (f32)
        tf = jnp.dot(h.astype(dot_dtype), w2_ref[...],
                     preferred_element_type=jnp.float32) + b2_ref[...]
        tf_sc[...] = tf                                                    # (N, D) f32
        acc_sc[...] = x.astype(jnp.float32)                                # residual init

    td = tf_sc[...].astype(dot_dtype)                                      # (N, D)

    # Additive key masks (broadcast over the L query rows and over heads).
    mask_vis = spm_ref[0, 0]                                               # (1, L)
    col = jax.lax.broadcasted_iota(jnp.int32, (1, num_txt), 1)
    mask_txt = jnp.where(col == n, 0.0, -1000.0)                           # (1, N)

    # ---- per-head masked attention over [visual | text] keys ---------------
    attn = None
    for h in range(n_heads):
        wq_h = wq_ref[h]                                                   # (D, dh)
        wk_h = wk_ref[h]
        wv_h = wv_ref[h]
        wo_h = wo_ref[h]                                                   # (dh, D)

        q = jnp.dot(xd, wq_h, preferred_element_type=jnp.float32)          # (L, dh)
        k_vis = jnp.dot(xd, wk_h, preferred_element_type=jnp.float32)      # (L, dh)
        v_vis = jnp.dot(xd, wv_h, preferred_element_type=jnp.float32)      # (L, dh)
        k_txt = jnp.dot(td, wk_h, preferred_element_type=jnp.float32)      # (N, dh)
        v_txt = jnp.dot(td, wv_h, preferred_element_type=jnp.float32)      # (N, dh)

        qd = (q * scale).astype(dot_dtype)
        s_vis = jax.lax.dot_general(qd, k_vis.astype(dot_dtype),
                                    (((1,), (1,)), ((), ())),
                                    preferred_element_type=jnp.float32) + mask_vis  # (L, L)
        s_txt = jax.lax.dot_general(qd, k_txt.astype(dot_dtype),
                                    (((1,), (1,)), ((), ())),
                                    preferred_element_type=jnp.float32) + mask_txt  # (L, N)

        m = jnp.maximum(jnp.max(s_vis, axis=-1, keepdims=True),
                        jnp.max(s_txt, axis=-1, keepdims=True))            # (L, 1)
        p_vis = jnp.exp(s_vis - m)
        p_txt = jnp.exp(s_txt - m)
        l = (jnp.sum(p_vis, axis=-1, keepdims=True)
             + jnp.sum(p_txt, axis=-1, keepdims=True))                     # (L, 1)

        pv = (jnp.dot(p_vis.astype(dot_dtype), v_vis.astype(dot_dtype),
                      preferred_element_type=jnp.float32)
              + jnp.dot(p_txt.astype(dot_dtype), v_txt.astype(dot_dtype),
                        preferred_element_type=jnp.float32))               # (L, dh)
        pv = pv * pl.reciprocal(l, approx=True)

        contrib = jnp.dot(pv.astype(dot_dtype), wo_h,
                          preferred_element_type=jnp.float32)              # (L, D)
        attn = contrib if attn is None else attn + contrib

    attn = attn + bo_ref[...].astype(jnp.float32)                          # to_out bias
    # NOTE: to_out dropout is identity at inference.

    # ---- fused region-masked combine (residual already in the accumulator) -
    rm = rgm_ref[0, 0].astype(jnp.float32)                                 # (L, 1)
    acc_sc[...] += rm * attn

    @pl.when(n == num_txt - 1)
    def _():
        out_ref[0] = acc_sc[...].astype(out_ref.dtype)


def regional_attention_pallas(x, text_feat, sp_mask, region_masks, params,
                              *, n_heads, d_head, dot_dtype=jnp.bfloat16):
    B, L, D = x.shape
    _, N, ctx = text_feat.shape

    # Per-head weight layout (built at trace time): each head's q/k/v/o is
    # produced already separated, avoiding sub-lane activation slicing/concat.
    wq3 = params["wq"].reshape(D, n_heads, d_head).transpose(1, 0, 2).astype(dot_dtype)
    wk3 = params["wk"].reshape(D, n_heads, d_head).transpose(1, 0, 2).astype(dot_dtype)
    wv3 = params["wv"].reshape(D, n_heads, d_head).transpose(1, 0, 2).astype(dot_dtype)
    wo3 = params["wo"].reshape(n_heads, d_head, D).astype(dot_dtype)
    w1 = params["w1"].astype(dot_dtype)
    w2 = params["w2"].astype(dot_dtype)
    b1 = params["b1"].astype(jnp.float32)
    b2 = params["b2"].astype(jnp.float32)
    bo = params["bo"].astype(jnp.float32)

    fixed2 = lambda b, n: (0, 0)
    fixed3 = lambda b, n: (0, 0, 0)

    grid_spec = pltpu.PrefetchScalarGridSpec(
        num_scalar_prefetch=0,
        grid=(B, N),
        in_specs=[
            pl.BlockSpec((1, L, D), lambda b, n: (b, 0, 0)),        # x (resident per b)
            pl.BlockSpec((1, N, ctx), lambda b, n: (b, 0, 0)),      # raw text features
            pl.BlockSpec((1, 1, 1, L), lambda b, n: (b, n, 0, 0)),  # spatial key mask
            pl.BlockSpec((1, 1, L, 1), lambda b, n: (b, n, 0, 0)),  # region mask
            pl.BlockSpec((ctx, D), fixed2),                         # w1
            pl.BlockSpec((1, D), fixed2),                           # b1
            pl.BlockSpec((D, D), fixed2),                           # w2
            pl.BlockSpec((1, D), fixed2),                           # b2
            pl.BlockSpec((n_heads, D, d_head), fixed3),             # wq (per head)
            pl.BlockSpec((n_heads, D, d_head), fixed3),             # wk
            pl.BlockSpec((n_heads, D, d_head), fixed3),             # wv
            pl.BlockSpec((n_heads, d_head, D), fixed3),             # wo
            pl.BlockSpec((1, D), fixed2),                           # bo
        ],
        out_specs=pl.BlockSpec((1, L, D), lambda b, n: (b, 0, 0)),
        scratch_shapes=[
            pltpu.VMEM((N, D), jnp.float32),   # text features after the MLP
            pltpu.VMEM((L, D), jnp.float32),   # combine accumulator (residual-init)
        ],
    )
    kern = functools.partial(_regional_attn_kernel, dot_dtype=dot_dtype)
    return pl.pallas_call(
        kern,
        out_shape=jax.ShapeDtypeStruct((B, L, D), x.dtype),
        grid_spec=grid_spec,
        compiler_params=pltpu.CompilerParams(
            dimension_semantics=("parallel", "arbitrary")),
    )(x, text_feat, sp_mask, region_masks,
      w1, b1, w2, b2, wq3, wk3, wv3, wo3, bo)


# ---------------------------------------------------------------------------
# Glue (tiny, stays in XLA): nearest-neighbor mask resize and mask prep.
# ---------------------------------------------------------------------------
def _nearest_resize(m, H, W):
    # F.interpolate(..., size=(H, W), mode='nearest'): out[i] = in[floor(i*h0/H)]
    h0, w0 = m.shape[-2], m.shape[-1]
    ih = (jnp.arange(H) * h0 // H).astype(jnp.int32)
    iw = (jnp.arange(W) * w0 // W).astype(jnp.int32)
    return m[..., ih, :][..., :, iw]


def inst_diff_self_attention_forward(x, objs, params, *, n_heads, d_head,
                                     dot_dtype=jnp.bfloat16):
    B, L, D = x.shape
    H = W = int(round(L ** 0.5))
    assert H * W == L, f"Input is not square, Got L={L}"
    N = objs["reorg_masks"].shape[1]
    ctx = objs["text_feat"].shape[-1]

    inter = _nearest_resize(objs["reorg_masks"].astype(jnp.float32), H, W)
    union = _nearest_resize(objs["reorg_union_masks"].astype(jnp.float32), H, W)

    region_masks = jnp.where(inter > 0.5, 1.0, 0.0).reshape(B, N, L, 1).astype(jnp.float32)
    sp_mask = ((1.0 - union.reshape(B, N, 1, L)) * -1000.0).astype(jnp.float32)
    text_feat = objs["text_feat"].reshape(B, N, ctx).astype(x.dtype)

    return regional_attention_pallas(x, text_feat, sp_mask, region_masks, params,
                                     n_heads=n_heads, d_head=d_head,
                                     dot_dtype=dot_dtype)


# ---------------------------------------------------------------------------
# Pure-JAX reference (mirrors the PyTorch forward, with the same bf16 dot casts)
# ---------------------------------------------------------------------------
def _ref_forward(x, objs, params, *, n_heads, d_head, dot_dtype=jnp.bfloat16):
    B, L, D = x.shape
    H = W = int(round(L ** 0.5))
    N = objs["reorg_masks"].shape[1]
    ctx = objs["text_feat"].shape[-1]
    S = L + N
    inner = n_heads * d_head
    cast = lambda a: a.astype(dot_dtype)

    inter = _nearest_resize(objs["reorg_masks"].astype(jnp.float32), H, W)
    union = _nearest_resize(objs["reorg_union_masks"].astype(jnp.float32), H, W)
    region = jnp.where(inter > 0.5, 1.0, 0.0).reshape(B, N, L, 1)

    t = objs["text_feat"].reshape(B * N, ctx).astype(x.dtype)
    h = jnp.dot(cast(t), cast(params["w1"]), preferred_element_type=jnp.float32) + params["b1"]
    h = h * jax.nn.sigmoid(h)
    tf = jnp.dot(cast(h), cast(params["w2"]), preferred_element_type=jnp.float32) + params["b2"]
    tf = tf.reshape(B, N, D)

    joint = jnp.concatenate([x.astype(jnp.float32), tf], axis=1)           # (B, S, D)
    joint = jnp.broadcast_to(joint[:, None], (B, N, S, D)).reshape(B * N, S, D)

    eye = jnp.eye(N, dtype=jnp.float32)
    vt_mask = jnp.tile(1.0 - eye, (B, 1)) * -1000.0                        # (B*N, N)
    sp_mask = (1.0 - union.reshape(B * N, L)) * -1000.0
    mask = jnp.concatenate([sp_mask, vt_mask], axis=1)                     # (B*N, S)

    q = jnp.dot(cast(joint[:, :L]), cast(params["wq"]), preferred_element_type=jnp.float32)
    k = jnp.dot(cast(joint), cast(params["wk"]), preferred_element_type=jnp.float32)
    v = jnp.dot(cast(joint), cast(params["wv"]), preferred_element_type=jnp.float32)
    qh = q.reshape(B * N, L, n_heads, d_head).transpose(0, 2, 1, 3)
    kh = k.reshape(B * N, S, n_heads, d_head).transpose(0, 2, 1, 3)
    vh = v.reshape(B * N, S, n_heads, d_head).transpose(0, 2, 1, 3)

    scale = d_head ** -0.5
    s = jnp.einsum("bhqd,bhkd->bhqk", cast(qh * scale), cast(kh),
                   preferred_element_type=jnp.float32)
    s = s + mask[:, None, None, :]
    m = jnp.max(s, axis=-1, keepdims=True)
    p = jnp.exp(s - m)
    l = jnp.sum(p, axis=-1, keepdims=True)
    pv = jnp.einsum("bhqk,bhkd->bhqd", cast(p), cast(vh),
                    preferred_element_type=jnp.float32) / l
    o = pv.transpose(0, 2, 1, 3).reshape(B * N, L, inner)
    out = jnp.dot(cast(o), cast(params["wo"]), preferred_element_type=jnp.float32) + params["bo"]
    out = out.reshape(B, N, L, D)
    return ((out * region).sum(axis=1) + x.astype(jnp.float32)).astype(x.dtype)


# ---------------------------------------------------------------------------
# Deterministic parameter init (shapes follow the module's __init__)
# ---------------------------------------------------------------------------
def init_params(key, query_dim, context_dim, n_heads, d_head, zero_to_out=True):
    inner = n_heads * d_head
    ks = jax.random.split(key, 9)

    def lin(k, fan_in, shape):
        bound = 1.0 / (fan_in ** 0.5)
        return jax.random.uniform(k, shape, jnp.float32, -bound, bound)

    params = dict(
        null_text_feat=jnp.zeros((context_dim,), jnp.float32),  # registered but unused in fwd
        # text_linear: Linear(ctx, D) -> SiLU -> Linear(D, D)  (stored transposed: x @ W)
        w1=lin(ks[0], context_dim, (context_dim, query_dim)),
        b1=lin(ks[1], context_dim, (1, query_dim)),
        w2=lin(ks[2], query_dim, (query_dim, query_dim)),
        b2=lin(ks[3], query_dim, (1, query_dim)),
        # Attention: to_q/to_k/to_v (bias=False), to_out[0] Linear(inner, D) with bias
        wq=lin(ks[4], query_dim, (query_dim, inner)),
        wk=lin(ks[5], query_dim, (query_dim, inner)),
        wv=lin(ks[6], query_dim, (query_dim, inner)),
    )
    if zero_to_out:
        # zero_module(self.self_attn.to_out[0]) — faithful to the reference __init__
        params["wo"] = jnp.zeros((inner, query_dim), jnp.float32)
        params["bo"] = jnp.zeros((1, query_dim), jnp.float32)
    else:
        params["wo"] = lin(ks[7], inner, (inner, query_dim))
        params["bo"] = lin(ks[8], inner, (1, query_dim))
    return params


# ---------------------------------------------------------------------------
if __name__ == "__main__":
    B, query_dim, context_dim = 2, 32, 16
    n_heads, d_head = 4, 8          # inner_dim = 32
    H = W = 8
    L = H * W                       # 64 visual tokens
    num_objs = 4
    mh = mw = 16                    # original mask resolution (resized down to 8x8)

    key = jax.random.PRNGKey(0)
    kx, km, ku, kt, kp0, kp1 = jax.random.split(key, 6)
    x = jax.random.normal(kx, (B, L, query_dim), jnp.float32)
    reorg_masks = (jax.random.uniform(km, (B, num_objs, mh, mw)) > 0.5).astype(jnp.float32)
    reorg_union_masks = (jax.random.uniform(ku, (B, num_objs, mh, mw)) > 0.3).astype(jnp.float32)
    text_feat = jax.random.normal(kt, (B, num_objs, 1, context_dim), jnp.float32)
    objs = {"reorg_masks": reorg_masks,
            "reorg_union_masks": reorg_union_masks,
            "text_feat": text_feat}

    fwd = jax.jit(functools.partial(inst_diff_self_attention_forward,
                                    n_heads=n_heads, d_head=d_head))

    # 1) Faithful init: to_out is zero_module'd, so the module returns the residual.
    params0 = init_params(kp0, query_dim, context_dim, n_heads, d_head, zero_to_out=True)
    out0 = jax.block_until_ready(fwd(x, objs, params0))
    assert out0.shape == x.shape and out0.dtype == x.dtype
    assert jnp.allclose(out0, x, atol=1e-5), "zero-initialized to_out must reduce to residual"

    # 2) Non-zero to_out: exercise the full attention path vs a pure-JAX reference that
    #    applies the same bf16 MXU casts.  Tolerance covers bf16 rounding and the EUP
    #    approximate reciprocal used for the softmax normalization.
    params1 = init_params(kp1, query_dim, context_dim, n_heads, d_head, zero_to_out=False)
    out1 = jax.block_until_ready(fwd(x, objs, params1))
    ref1 = _ref_forward(x, objs, params1, n_heads=n_heads, d_head=d_head,
                        dot_dtype=jnp.bfloat16)
    max_err = float(jnp.max(jnp.abs(out1 - ref1)))
    assert jnp.allclose(out1, ref1, rtol=1e-2, atol=1e-2), f"mismatch vs reference, max_err={max_err}"

    print("KERNEL_OK")
</pallas_src>

<mosaic_0001>
module attributes {stable_mosaic.version = 11 : i64} {
  func.func @_regional_attn_kernel(%arg0: i32, %arg1: i32, %arg2: memref<1x64x32xf32, #tpu.memory_space<vmem>>, %arg3: memref<1x4x16xf32, #tpu.memory_space<vmem>>, %arg4: memref<1x1x1x64xf32, #tpu.memory_space<vmem>>, %arg5: memref<1x1x64x1xf32, #tpu.memory_space<vmem>>, %arg6: memref<16x32xbf16, #tpu.memory_space<vmem>>, %arg7: memref<1x32xf32, #tpu.memory_space<vmem>>, %arg8: memref<32x32xbf16, #tpu.memory_space<vmem>>, %arg9: memref<1x32xf32, #tpu.memory_space<vmem>>, %arg10: memref<4x32x8xbf16, #tpu.memory_space<vmem>>, %arg11: memref<4x32x8xbf16, #tpu.memory_space<vmem>>, %arg12: memref<4x32x8xbf16, #tpu.memory_space<vmem>>, %arg13: memref<4x8x32xbf16, #tpu.memory_space<vmem>>, %arg14: memref<1x32xf32, #tpu.memory_space<vmem>>, %arg15: memref<1x64x32xf32, #tpu.memory_space<vmem>>, %arg16: memref<4x32xf32, #tpu.memory_space<vmem>>, %arg17: memref<64x32xf32, #tpu.memory_space<vmem>>) attributes {dimension_semantics = [#tpu.dimension_semantics<parallel>, #tpu.dimension_semantics<arbitrary>], iteration_bounds = array<i64: 2, 4>, scalar_prefetch = 0 : i64, scratch_operands = 2 : i64, tpu.core_type = #tpu.core_type<tc>, window_params = [{transform_indices = @transform_0, window_bounds = array<i64: 1, 64, 32>}, {transform_indices = @transform_1, window_bounds = array<i64: 1, 4, 16>}, {transform_indices = @transform_2, window_bounds = array<i64: 1, 1, 1, 64>}, {transform_indices = @transform_3, window_bounds = array<i64: 1, 1, 64, 1>}, {pipeline_mode = #tpu.pipeline_mode<synchronous>, transform_indices = @transform_4, window_bounds = array<i64: 16, 32>}, {pipeline_mode = #tpu.pipeline_mode<synchronous>, transform_indices = @transform_5, window_bounds = array<i64: 1, 32>}, {pipeline_mode = #tpu.pipeline_mode<synchronous>, transform_indices = @transform_6, window_bounds = array<i64: 32, 32>}, {pipeline_mode = #tpu.pipeline_mode<synchronous>, transform_indices = @transform_7, window_bounds = array<i64: 1, 32>}, {pipeline_mode = #tpu.pipeline_mode<synchronous>, transform_indices = @transform_8, window_bounds = array<i64: 4, 32, 8>}, {pipeline_mode = #tpu.pipeline_mode<synchronous>, transform_indices = @transform_9, window_bounds = array<i64: 4, 32, 8>}, {pipeline_mode = #tpu.pipeline_mode<synchronous>, transform_indices = @transform_10, window_bounds = array<i64: 4, 32, 8>}, {pipeline_mode = #tpu.pipeline_mode<synchronous>, transform_indices = @transform_11, window_bounds = array<i64: 4, 8, 32>}, {pipeline_mode = #tpu.pipeline_mode<synchronous>, transform_indices = @transform_12, window_bounds = array<i64: 1, 32>}, {transform_indices = @transform_13, window_bounds = array<i64: 1, 64, 32>}]} {
    %c0 = arith.constant 0 : index
    %c0_0 = arith.constant 0 : index
    %c0_1 = arith.constant 0 : index
    %0 = vector.load %arg2[%c0, %c0_0, %c0_1] : memref<1x64x32xf32, #tpu.memory_space<vmem>>, vector<1x64x32xf32>
    %1 = vector.shape_cast %0 : vector<1x64x32xf32> to vector<64x32xf32>
    %2 = arith.truncf %1 : vector<64x32xf32> to vector<64x32xbf16>
    %c0_i32 = arith.constant 0 : i32
    %3 = arith.cmpi eq, %arg1, %c0_i32 : i32
    %4 = arith.extui %3 : i1 to i32
    %c0_i32_2 = arith.constant 0 : i32
    %5 = arith.cmpi ne, %4, %c0_i32_2 : i32
    scf.if %5 {
      %c0_126 = arith.constant 0 : index
      %c0_127 = arith.constant 0 : index
      %c0_128 = arith.constant 0 : index
      %240 = vector.load %arg3[%c0_126, %c0_127, %c0_128] : memref<1x4x16xf32, #tpu.memory_space<vmem>>, vector<1x4x16xf32>
      %241 = vector.shape_cast %240 : vector<1x4x16xf32> to vector<4x16xf32>
      %242 = arith.truncf %241 : vector<4x16xf32> to vector<4x16xbf16>
      %c0_129 = arith.constant 0 : index
      %c0_130 = arith.constant 0 : index
      %243 = vector.load %arg6[%c0_129, %c0_130] : memref<16x32xbf16, #tpu.memory_space<vmem>>, vector<16x32xbf16>
      %cst_131 = arith.constant dense<0.000000e+00> : vector<4x32xf32>
      %244 = tpu.matmul %242, %243, %cst_131 {dimension_numbers = #tpu.dot_dimension_numbers<[1], [0], [0], [1], [0, 0, 1, 1], [], []>} : vector<4x16xbf16>, vector<16x32xbf16>, vector<4x32xf32> -> vector<4x32xf32>
      %c0_132 = arith.constant 0 : index
      %c0_133 = arith.constant 0 : index
      %245 = vector.load %arg7[%c0_132, %c0_133] : memref<1x32xf32, #tpu.memory_space<vmem>>, vector<1x32xf32>
      %246 = vector.broadcast %245 : vector<1x32xf32> to vector<4x32xf32>
      %247 = arith.addf %244, %246 : vector<4x32xf32>
      %248 = arith.negf %247 : vector<4x32xf32>
      %249 = math.exp %248 : vector<4x32xf32>
      %cst_134 = arith.constant 1.000000e+00 : f32
      %250 = vector.broadcast %cst_134 : f32 to vector<4x32xf32>
      %251 = arith.addf %250, %249 : vector<4x32xf32>
      %252 = arith.divf %250, %251 : vector<4x32xf32>
      %253 = arith.mulf %247, %252 : vector<4x32xf32>
      %254 = arith.truncf %253 : vector<4x32xf32> to vector<4x32xbf16>
      %c0_135 = arith.constant 0 : index
      %c0_136 = arith.constant 0 : index
      %255 = vector.load %arg8[%c0_135, %c0_136] : memref<32x32xbf16, #tpu.memory_space<vmem>>, vector<32x32xbf16>
      %cst_137 = arith.constant dense<0.000000e+00> : vector<4x32xf32>
      %256 = tpu.matmul %254, %255, %cst_137 {dimension_numbers = #tpu.dot_dimension_numbers<[1], [0], [0], [1], [0, 0, 1, 1], [], []>} : vector<4x32xbf16>, vector<32x32xbf16>, vector<4x32xf32> -> vector<4x32xf32>
      %c0_138 = arith.constant 0 : index
      %c0_139 = arith.constant 0 : index
      %257 = vector.load %arg9[%c0_138, %c0_139] : memref<1x32xf32, #tpu.memory_space<vmem>>, vector<1x32xf32>
      %258 = vector.broadcast %257 : vector<1x32xf32> to vector<4x32xf32>
      %259 = arith.addf %256, %258 : vector<4x32xf32>
      %c0_140 = arith.constant 0 : index
      %c0_141 = arith.constant 0 : index
      %260 = vector.load %arg16[%c0_140, %c0_141] : memref<4x32xf32, #tpu.memory_space<vmem>>, vector<4x32xf32>
      tpu.vector_store %arg16[%c0_140, %c0_141], %259 {strides = array<i32>} : memref<4x32xf32, #tpu.memory_space<vmem>>, vector<4x32xf32>,
      %c0_142 = arith.constant 0 : index
      %c0_143 = arith.constant 0 : index
      %261 = vector.load %arg17[%c0_142, %c0_143] : memref<64x32xf32, #tpu.memory_space<vmem>>, vector<64x32xf32>
      tpu.vector_store %arg17[%c0_142, %c0_143], %1 {strides = array<i32>} : memref<64x32xf32, #tpu.memory_space<vmem>>, vector<64x32xf32>,
    } else {
    }
    %c0_3 = arith.constant 0 : index
    %c0_4 = arith.constant 0 : index
    %6 = vector.load %arg16[%c0_3, %c0_4] : memref<4x32xf32, #tpu.memory_space<vmem>>, vector<4x32xf32>
    %7 = arith.truncf %6 : vector<4x32xf32> to vector<4x32xbf16>
    %c0_5 = arith.constant 0 : index
    %c0_6 = arith.constant 0 : index
    %c0_7 = arith.constant 0 : index
    %c0_8 = arith.constant 0 : index
    %8 = vector.load %arg4[%c0_5, %c0_6, %c0_7, %c0_8] : memref<1x1x1x64xf32, #tpu.memory_space<vmem>>, vector<1x1x1x64xf32>
    %9 = vector.shape_cast %8 : vector<1x1x1x64xf32> to vector<1x64xf32>
    %10 = tpu.iota {dimensions = array<i32: 1>} : vector<1x4xi32>
    %11 = vector.broadcast %arg1 : i32 to vector<1x4xi32>
    %12 = arith.cmpi eq, %10, %11 : vector<1x4xi32>
    %cst = arith.constant 0.000000e+00 : f32
    %cst_9 = arith.constant -1.000000e+03 : f32
    %13 = vector.broadcast %cst : f32 to vector<1x4xf32>
    %14 = vector.broadcast %cst_9 : f32 to vector<1x4xf32>
    %15 = arith.select %12, %13, %14 : vector<1x4xi1>, vector<1x4xf32>
    %c0_10 = arith.constant 0 : index
    %c0_11 = arith.constant 0 : index
    %c0_12 = arith.constant 0 : index
    %16 = vector.load %arg10[%c0_10, %c0_11, %c0_12] : memref<4x32x8xbf16, #tpu.memory_space<vmem>>, vector<1x32x8xbf16>
    %17 = vector.shape_cast %16 : vector<1x32x8xbf16> to vector<32x8xbf16>
    %c0_13 = arith.constant 0 : index
    %c0_14 = arith.constant 0 : index
    %c0_15 = arith.constant 0 : index
    %18 = vector.load %arg11[%c0_13, %c0_14, %c0_15] : memref<4x32x8xbf16, #tpu.memory_space<vmem>>, vector<1x32x8xbf16>
    %19 = vector.shape_cast %18 : vector<1x32x8xbf16> to vector<32x8xbf16>
    %c0_16 = arith.constant 0 : index
    %c0_17 = arith.constant 0 : index
    %c0_18 = arith.constant 0 : index
    %20 = vector.load %arg12[%c0_16, %c0_17, %c0_18] : memref<4x32x8xbf16, #tpu.memory_space<vmem>>, vector<1x32x8xbf16>
    %21 = vector.shape_cast %20 : vector<1x32x8xbf16> to vector<32x8xbf16>
    %c0_19 = arith.constant 0 : index
    %c0_20 = arith.constant 0 : index
    %c0_21 = arith.constant 0 : index
    %22 = vector.load %arg13[%c0_19, %c0_20, %c0_21] : memref<4x8x32xbf16, #tpu.memory_space<vmem>>, vector<1x8x32xbf16>
    %23 = vector.shape_cast %22 : vector<1x8x32xbf16> to vector<8x32xbf16>
    %cst_22 = arith.constant dense<0.000000e+00> : vector<64x8xf32>
    %24 = tpu.matmul %2, %17, %cst_22 {dimension_numbers = #tpu.dot_dimension_numbers<[1], [0], [0], [1], [0, 0, 1, 1], [], []>} : vector<64x32xbf16>, vector<32x8xbf16>, vector<64x8xf32> -> vector<64x8xf32>
    %cst_23 = arith.constant dense<0.000000e+00> : vector<64x8xf32>
    %25 = tpu.matmul %2, %19, %cst_23 {dimension_numbers = #tpu.dot_dimension_numbers<[1], [0], [0], [1], [0, 0, 1, 1], [], []>} : vector<64x32xbf16>, vector<32x8xbf16>, vector<64x8xf32> -> vector<64x8xf32>
    %cst_24 = arith.constant dense<0.000000e+00> : vector<64x8xf32>
    %26 = tpu.matmul %2, %21, %cst_24 {dimension_numbers = #tpu.dot_dimension_numbers<[1], [0], [0], [1], [0, 0, 1, 1], [], []>} : vector<64x32xbf16>, vector<32x8xbf16>, vector<64x8xf32> -> vector<64x8xf32>
    %cst_25 = arith.constant dense<0.000000e+00> : vector<4x8xf32>
    %27 = tpu.matmul %7, %19, %cst_25 {dimension_numbers = #tpu.dot_dimension_numbers<[1], [0], [0], [1], [0, 0, 1, 1], [], []>} : vector<4x32xbf16>, vector<32x8xbf16>, vector<4x8xf32> -> vector<4x8xf32>
    %cst_26 = arith.constant dense<0.000000e+00> : vector<4x8xf32>
    %28 = tpu.matmul %7, %21, %cst_26 {dimension_numbers = #tpu.dot_dimension_numbers<[1], [0], [0], [1], [0, 0, 1, 1], [], []>} : vector<4x32xbf16>, vector<32x8xbf16>, vector<4x8xf32> -> vector<4x8xf32>
    %cst_27 = arith.constant 0.353553385 : f32
    %29 = vector.broadcast %cst_27 : f32 to vector<64x8xf32>
    %30 = arith.mulf %24, %29 : vector<64x8xf32>
    %31 = arith.truncf %30 : vector<64x8xf32> to vector<64x8xbf16>
    %32 = arith.truncf %25 : vector<64x8xf32> to vector<64x8xbf16>
    %cst_28 = arith.constant dense<0.000000e+00> : vector<64x64xf32>
    %33 = tpu.matmul %31, %32, %cst_28 {dimension_numbers = #tpu.dot_dimension_numbers<[1], [1], [0], [0], [0, 0, 1, 0], [], []>} : vector<64x8xbf16>, vector<64x8xbf16>, vector<64x64xf32> -> vector<64x64xf32>
    %34 = vector.broadcast %9 : vector<1x64xf32> to vector<64x64xf32>
    %35 = arith.addf %33, %34 : vector<64x64xf32>
    %36 = arith.truncf %27 : vector<4x8xf32> to vector<4x8xbf16>
    %cst_29 = arith.constant dense<0.000000e+00> : vector<64x4xf32>
    %37 = tpu.matmul %31, %36, %cst_29 {dimension_numbers = #tpu.dot_dimension_numbers<[1], [1], [0], [0], [0, 0, 1, 0], [], []>} : vector<64x8xbf16>, vector<4x8xbf16>, vector<64x4xf32> -> vector<64x4xf32>
    %38 = vector.broadcast %15 : vector<1x4xf32> to vector<64x4xf32>
    %39 = arith.addf %37, %38 : vector<64x4xf32>
    %cst_30 = arith.constant dense<0xFF800000> : vector<64xf32>
    %40 = vector.multi_reduction <maximumf>, %35, %cst_30 [1] : vector<64x64xf32> to vector<64xf32>
    %41 = vector.shape_cast %40 : vector<64xf32> to vector<64x1xf32>
    %cst_31 = arith.constant dense<0xFF800000> : vector<64xf32>
    %42 = vector.multi_reduction <maximumf>, %39, %cst_31 [1] : vector<64x4xf32> to vector<64xf32>
    %43 = vector.shape_cast %42 : vector<64xf32> to vector<64x1xf32>
    %44 = arith.maximumf %41, %43 : vector<64x1xf32>
    %45 = vector.broadcast %44 : vector<64x1xf32> to vector<64x64xf32>
    %46 = arith.subf %35, %45 : vector<64x64xf32>
    %47 = math.exp %46 : vector<64x64xf32>
    %48 = vector.broadcast %44 : vector<64x1xf32> to vector<64x4xf32>
    %49 = arith.subf %39, %48 : vector<64x4xf32>
    %50 = math.exp %49 : vector<64x4xf32>
    %cst_32 = arith.constant dense<0.000000e+00> : vector<64xf32>
    %51 = vector.multi_reduction <add>, %47, %cst_32 [1] : vector<64x64xf32> to vector<64xf32>
    %52 = vector.shape_cast %51 : vector<64xf32> to vector<64x1xf32>
    %cst_33 = arith.constant dense<0.000000e+00> : vector<64xf32>
    %53 = vector.multi_reduction <add>, %50, %cst_33 [1] : vector<64x4xf32> to vector<64xf32>
    %54 = vector.shape_cast %53 : vector<64xf32> to vector<64x1xf32>
    %55 = arith.addf %52, %54 : vector<64x1xf32>
    %56 = arith.truncf %47 : vector<64x64xf32> to vector<64x64xbf16>
    %57 = arith.truncf %26 : vector<64x8xf32> to vector<64x8xbf16>
    %cst_34 = arith.constant dense<0.000000e+00> : vector<64x8xf32>
    %58 = tpu.matmul %56, %57, %cst_34 {dimension_numbers = #tpu.dot_dimension_numbers<[1], [0], [0], [1], [0, 0, 1, 1], [], []>} : vector<64x64xbf16>, vector<64x8xbf16>, vector<64x8xf32> -> vector<64x8xf32>
    %59 = arith.truncf %50 : vector<64x4xf32> to vector<64x4xbf16>
    %60 = arith.truncf %28 : vector<4x8xf32> to vector<4x8xbf16>
    %cst_35 = arith.constant dense<0.000000e+00> : vector<64x8xf32>
    %61 = tpu.matmul %59, %60, %cst_35 {dimension_numbers = #tpu.dot_dimension_numbers<[1], [0], [0], [1], [0, 0, 1, 1], [], []>} : vector<64x4xbf16>, vector<4x8xbf16>, vector<64x8xf32> -> vector<64x8xf32>
    %62 = arith.addf %58, %61 : vector<64x8xf32>
    %63 = tpu.reciprocal %55 {approx = true} : vector<64x1xf32> -> vector<64x1xf32>
    %64 = vector.broadcast %63 : vector<64x1xf32> to vector<64x8xf32>
    %65 = arith.mulf %62, %64 : vector<64x8xf32>
    %66 = arith.truncf %65 : vector<64x8xf32> to vector<64x8xbf16>
    %cst_36 = arith.constant dense<0.000000e+00> : vector<64x32xf32>
    %67 = tpu.matmul %66, %23, %cst_36 {dimension_numbers = #tpu.dot_dimension_numbers<[1], [0], [0], [1], [0, 0, 1, 1], [], []>} : vector<64x8xbf16>, vector<8x32xbf16>, vector<64x32xf32> -> vector<64x32xf32>
    %c1 = arith.constant 1 : index
    %c0_37 = arith.constant 0 : index
    %c0_38 = arith.constant 0 : index
    %68 = vector.load %arg10[%c1, %c0_37, %c0_38] : memref<4x32x8xbf16, #tpu.memory_space<vmem>>, vector<1x32x8xbf16>
    %69 = vector.shape_cast %68 : vector<1x32x8xbf16> to vector<32x8xbf16>
    %c1_39 = arith.constant 1 : index
    %c0_40 = arith.constant 0 : index
    %c0_41 = arith.constant 0 : index
    %70 = vector.load %arg11[%c1_39, %c0_40, %c0_41] : memref<4x32x8xbf16, #tpu.memory_space<vmem>>, vector<1x32x8xbf16>
    %71 = vector.shape_cast %70 : vector<1x32x8xbf16> to vector<32x8xbf16>
    %c1_42 = arith.constant 1 : index
    %c0_43 = arith.constant 0 : index
    %c0_44 = arith.constant 0 : index
    %72 = vector.load %arg12[%c1_42, %c0_43, %c0_44] : memref<4x32x8xbf16, #tpu.memory_space<vmem>>, vector<1x32x8xbf16>
    %73 = vector.shape_cast %72 : vector<1x32x8xbf16> to vector<32x8xbf16>
    %c1_45 = arith.constant 1 : index
    %c0_46 = arith.constant 0 : index
    %c0_47 = arith.constant 0 : index
    %74 = vector.load %arg13[%c1_45, %c0_46, %c0_47] : memref<4x8x32xbf16, #tpu.memory_space<vmem>>, vector<1x8x32xbf16>
    %75 = vector.shape_cast %74 : vector<1x8x32xbf16> to vector<8x32xbf16>
    %cst_48 = arith.constant dense<0.000000e+00> : vector<64x8xf32>
    %76 = tpu.matmul %2, %69, %cst_48 {dimension_numbers = #tpu.dot_dimension_numbers<[1], [0], [0], [1], [0, 0, 1, 1], [], []>} : vector<64x32xbf16>, vector<32x8xbf16>, vector<64x8xf32> -> vector<64x8xf32>
    %cst_49 = arith.constant dense<0.000000e+00> : vector<64x8xf32>
    %77 = tpu.matmul %2, %71, %cst_49 {dimension_numbers = #tpu.dot_dimension_numbers<[1], [0], [0], [1], [0, 0, 1, 1], [], []>} : vector<64x32xbf16>, vector<32x8xbf16>, vector<64x8xf32> -> vector<64x8xf32>
    %cst_50 = arith.constant dense<0.000000e+00> : vector<64x8xf32>
    %78 = tpu.matmul %2, %73, %cst_50 {dimension_numbers = #tpu.dot_dimension_numbers<[1], [0], [0], [1], [0, 0, 1, 1], [], []>} : vector<64x32xbf16>, vector<32x8xbf16>, vector<64x8xf32> -> vector<64x8xf32>
    %cst_51 = arith.constant dense<0.000000e+00> : vector<4x8xf32>
    %79 = tpu.matmul %7, %71, %cst_51 {dimension_numbers = #tpu.dot_dimension_numbers<[1], [0], [0], [1], [0, 0, 1, 1], [], []>} : vector<4x32xbf16>, vector<32x8xbf16>, vector<4x8xf32> -> vector<4x8xf32>
    %cst_52 = arith.constant dense<0.000000e+00> : vector<4x8xf32>
    %80 = tpu.matmul %7, %73, %cst_52 {dimension_numbers = #tpu.dot_dimension_numbers<[1], [0], [0], [1], [0, 0, 1, 1], [], []>} : vector<4x32xbf16>, vector<32x8xbf16>, vector<4x8xf32> -> vector<4x8xf32>
    %cst_53 = arith.constant 0.353553385 : f32
    %81 = vector.broadcast %cst_53 : f32 to vector<64x8xf32>
    %82 = arith.mulf %76, %81 : vector<64x8xf32>
    %83 = arith.truncf %82 : vector<64x8xf32> to vector<64x8xbf16>
    %84 = arith.truncf %77 : vector<64x8xf32> to vector<64x8xbf16>
    %cst_54 = arith.constant dense<0.000000e+00> : vector<64x64xf32>
    %85 = tpu.matmul %83, %84, %cst_54 {dimension_numbers = #tpu.dot_dimension_numbers<[1], [1], [0], [0], [0, 0, 1, 0], [], []>} : vector<64x8xbf16>, vector<64x8xbf16>, vector<64x64xf32> -> vector<64x64xf32>
    %86 = vector.broadcast %9 : vector<1x64xf32> to vector<64x64xf32>
    %87 = arith.addf %85, %86 : vector<64x64xf32>
    %88 = arith.truncf %79 : vector<4x8xf32> to vector<4x8xbf16>
    %cst_55 = arith.constant dense<0.000000e+00> : vector<64x4xf32>
    %89 = tpu.matmul %83, %88, %cst_55 {dimension_numbers = #tpu.dot_dimension_numbers<[1], [1], [0], [0], [0, 0, 1, 0], [], []>} : vector<64x8xbf16>, vector<4x8xbf16>, vector<64x4xf32> -> vector<64x4xf32>
    %90 = vector.broadcast %15 : vector<1x4xf32> to vector<64x4xf32>
    %91 = arith.addf %89, %90 : vector<64x4xf32>
    %cst_56 = arith.constant dense<0xFF800000> : vector<64xf32>
    %92 = vector.multi_reduction <maximumf>, %87, %cst_56 [1] : vector<64x64xf32> to vector<64xf32>
    %93 = vector.shape_cast %92 : vector<64xf32> to vector<64x1xf32>
    %cst_57 = arith.constant dense<0xFF800000> : vector<64xf32>
    %94 = vector.multi_reduction <maximumf>, %91, %cst_57 [1] : vector<64x4xf32> to vector<64xf32>
    %95 = vector.shape_cast %94 : vector<64xf32> to vector<64x1xf32>
    %96 = arith.maximumf %93, %95 : vector<64x1xf32>
    %97 = vector.broadcast %96 : vector<64x1xf32> to vector<64x64xf32>
    %98 = arith.subf %87, %97 : vector<64x64xf32>
    %99 = math.exp %98 : vector<64x64xf32>
    %100 = vector.broadcast %96 : vector<64x1xf32> to vector<64x4xf32>
    %101 = arith.subf %91, %100 : vector<64x4xf32>
    %102 = math.exp %101 : vector<64x4xf32>
    %cst_58 = arith.constant dense<0.000000e+00> : vector<64xf32>
    %103 = vector.multi_reduction <add>, %99, %cst_58 [1] : vector<64x64xf32> to vector<64xf32>
    %104 = vector.shape_cast %103 : vector<64xf32> to vector<64x1xf32>
    %cst_59 = arith.constant dense<0.000000e+00> : vector<64xf32>
    %105 = vector.multi_reduction <add>, %102, %cst_59 [1] : vector<64x4xf32> to vector<64xf32>
    %106 = vector.shape_cast %105 : vector<64xf32> to vector<64x1xf32>
    %107 = arith.addf %104, %106 : vector<64x1xf32>
    %108 = arith.truncf %99 : vector<64x64xf32> to vector<64x64xbf16>
    %109 = arith.truncf %78 : vector<64x8xf32> to vector<64x8xbf16>
    %cst_60 = arith.constant dense<0.000000e+00> : vector<64x8xf32>
    %110 = tpu.matmul %108, %109, %cst_60 {dimension_numbers = #tpu.dot_dimension_numbers<[1], [0], [0], [1], [0, 0, 1, 1], [], []>} : vector<64x64xbf16>, vector<64x8xbf16>, vector<64x8xf32> -> vector<64x8xf32>
    %111 = arith.truncf %102 : vector<64x4xf32> to vector<64x4xbf16>
    %112 = arith.truncf %80 : vector<4x8xf32> to vector<4x8xbf16>
    %cst_61 = arith.constant dense<0.000000e+00> : vector<64x8xf32>
    %113 = tpu.matmul %111, %112, %cst_61 {dimension_numbers = #tpu.dot_dimension_numbers<[1], [0], [0], [1], [0, 0, 1, 1], [], []>} : vector<64x4xbf16>, vector<4x8xbf16>, vector<64x8xf32> -> vector<64x8xf32>
    %114 = arith.addf %110, %113 : vector<64x8xf32>
    %115 = tpu.reciprocal %107 {approx = true} : vector<64x1xf32> -> vector<64x1xf32>
    %116 = vector.broadcast %115 : vector<64x1xf32> to vector<64x8xf32>
    %117 = arith.mulf %114, %116 : vector<64x8xf32>
    %118 = arith.truncf %117 : vector<64x8xf32> to vector<64x8xbf16>
    %cst_62 = arith.constant dense<0.000000e+00> : vector<64x32xf32>
    %119 = tpu.matmul %118, %75, %cst_62 {dimension_numbers = #tpu.dot_dimension_numbers<[1], [0], [0], [1], [0, 0, 1, 1], [], []>} : vector<64x8xbf16>, vector<8x32xbf16>, vector<64x32xf32> -> vector<64x32xf32>
    %120 = arith.addf %67, %119 : vector<64x32xf32>
    %c2 = arith.constant 2 : index
    %c0_63 = arith.constant 0 : index
    %c0_64 = arith.constant 0 : index
    %121 = vector.load %arg10[%c2, %c0_63, %c0_64] : memref<4x32x8xbf16, #tpu.memory_space<vmem>>, vector<1x32x8xbf16>
    %122 = vector.shape_cast %121 : vector<1x32x8xbf16> to vector<32x8xbf16>
    %c2_65 = arith.constant 2 : index
    %c0_66 = arith.constant 0 : index
    %c0_67 = arith.constant 0 : index
    %123 = vector.load %arg11[%c2_65, %c0_66, %c0_67] : memref<4x32x8xbf16, #tpu.memory_space<vmem>>, vector<1x32x8xbf16>
    %124 = vector.shape_cast %123 : vector<1x32x8xbf16> to vector<32x8xbf16>
    %c2_68 = arith.constant 2 : index
    %c0_69 = arith.constant 0 : index
    %c0_70 = arith.constant 0 : index
    %125 = vector.load %arg12[%c2_68, %c0_69, %c0_70] : memref<4x32x8xbf16, #tpu.memory_space<vmem>>, vector<1x32x8xbf16>
    %126 = vector.shape_cast %125 : vector<1x32x8xbf16> to vector<32x8xbf16>
    %c2_71 = arith.constant 2 : index
    %c0_72 = arith.constant 0 : index
    %c0_73 = arith.constant 0 : index
    %127 = vector.load %arg13[%c2_71, %c0_72, %c0_73] : memref<4x8x32xbf16, #tpu.memory_space<vmem>>, vector<1x8x32xbf16>
    %128 = vector.shape_cast %127 : vector<1x8x32xbf16> to vector<8x32xbf16>
    %cst_74 = arith.constant dense<0.000000e+00> : vector<64x8xf32>
    %129 = tpu.matmul %2, %122, %cst_74 {dimension_numbers = #tpu.dot_dimension_numbers<[1], [0], [0], [1], [0, 0, 1, 1], [], []>} : vector<64x32xbf16>, vector<32x8xbf16>, vector<64x8xf32> -> vector<64x8xf32>
    %cst_75 = arith.constant dense<0.000000e+00> : vector<64x8xf32>
    %130 = tpu.matmul %2, %124, %cst_75 {dimension_numbers = #tpu.dot_dimension_numbers<[1], [0], [0], [1], [0, 0, 1, 1], [], []>} : vector<64x32xbf16>, vector<32x8xbf16>, vector<64x8xf32> -> vector<64x8xf32>
    %cst_76 = arith.constant dense<0.000000e+00> : vector<64x8xf32>
    %131 = tpu.matmul %2, %126, %cst_76 {dimension_numbers = #tpu.dot_dimension_numbers<[1], [0], [0], [1], [0, 0, 1, 1], [], []>} : vector<64x32xbf16>, vector<32x8xbf16>, vector<64x8xf32> -> vector<64x8xf32>
    %cst_77 = arith.constant dense<0.000000e+00> : vector<4x8xf32>
    %132 = tpu.matmul %7, %124, %cst_77 {dimension_numbers = #tpu.dot_dimension_numbers<[1], [0], [0], [1], [0, 0, 1, 1], [], []>} : vector<4x32xbf16>, vector<32x8xbf16>, vector<4x8xf32> -> vector<4x8xf32>
    %cst_78 = arith.constant dense<0.000000e+00> : vector<4x8xf32>
    %133 = tpu.matmul %7, %126, %cst_78 {dimension_numbers = #tpu.dot_dimension_numbers<[1], [0], [0], [1], [0, 0, 1, 1], [], []>} : vector<4x32xbf16>, vector<32x8xbf16>, vector<4x8xf32> -> vector<4x8xf32>
    %cst_79 = arith.constant 0.353553385 : f32
    %134 = vector.broadcast %cst_79 : f32 to vector<64x8xf32>
    %135 = arith.mulf %129, %134 : vector<64x8xf32>
    %136 = arith.truncf %135 : vector<64x8xf32> to vector<64x8xbf16>
    %137 = arith.truncf %130 : vector<64x8xf32> to vector<64x8xbf16>
    %cst_80 = arith.constant dense<0.000000e+00> : vector<64x64xf32>
    %138 = tpu.matmul %136, %137, %cst_80 {dimension_numbers = #tpu.dot_dimension_numbers<[1], [1], [0], [0], [0, 0, 1, 0], [], []>} : vector<64x8xbf16>, vector<64x8xbf16>, vector<64x64xf32> -> vector<64x64xf32>
    %139 = vector.broadcast %9 : vector<1x64xf32> to vector<64x64xf32>
    %140 = arith.addf %138, %139 : vector<64x64xf32>
    %141 = arith.truncf %132 : vector<4x8xf32> to vector<4x8xbf16>
    %cst_81 = arith.constant dense<0.000000e+00> : vector<64x4xf32>
    %142 = tpu.matmul %136, %141, %cst_81 {dimension_numbers = #tpu.dot_dimension_numbers<[1], [1], [0], [0], [0, 0, 1, 0], [], []>} : vector<64x8xbf16>, vector<4x8xbf16>, vector<64x4xf32> -> vector<64x4xf32>
    %143 = vector.broadcast %15 : vector<1x4xf32> to vector<64x4xf32>
    %144 = arith.addf %142, %143 : vector<64x4xf32>
    %cst_82 = arith.constant dense<0xFF800000> : vector<64xf32>
    %145 = vector.multi_reduction <maximumf>, %140, %cst_82 [1] : vector<64x64xf32> to vector<64xf32>
    %146 = vector.shape_cast %145 : vector<64xf32> to vector<64x1xf32>
    %cst_83 = arith.constant dense<0xFF800000> : vector<64xf32>
    %147 = vector.multi_reduction <maximumf>, %144, %cst_83 [1] : vector<64x4xf32> to vector<64xf32>
    %148 = vector.shape_cast %147 : vector<64xf32> to vector<64x1xf32>
    %149 = arith.maximumf %146, %148 : vector<64x1xf32>
    %150 = vector.broadcast %149 : vector<64x1xf32> to vector<64x64xf32>
    %151 = arith.subf %140, %150 : vector<64x64xf32>
    %152 = math.exp %151 : vector<64x64xf32>
    %153 = vector.broadcast %149 : vector<64x1xf32> to vector<64x4xf32>
    %154 = arith.subf %144, %153 : vector<64x4xf32>
    %155 = math.exp %154 : vector<64x4xf32>
    %cst_84 = arith.constant dense<0.000000e+00> : vector<64xf32>
    %156 = vector.multi_reduction <add>, %152, %cst_84 [1] : vector<64x64xf32> to vector<64xf32>
    %157 = vector.shape_cast %156 : vector<64xf32> to vector<64x1xf32>
    %cst_85 = arith.constant dense<0.000000e+00> : vector<64xf32>
    %158 = vector.multi_reduction <add>, %155, %cst_85 [1] : vector<64x4xf32> to vector<64xf32>
    %159 = vector.shape_cast %158 : vector<64xf32> to vector<64x1xf32>
    %160 = arith.addf %157, %159 : vector<64x1xf32>
    %161 = arith.truncf %152 : vector<64x64xf32> to vector<64x64xbf16>
    %162 = arith.truncf %131 : vector<64x8xf32> to vector<64x8xbf16>
    %cst_86 = arith.constant dense<0.000000e+00> : vector<64x8xf32>
    %163 = tpu.matmul %161, %162, %cst_86 {dimension_numbers = #tpu.dot_dimension_numbers<[1], [0], [0], [1], [0, 0, 1, 1], [], []>} : vector<64x64xbf16>, vector<64x8xbf16>, vector<64x8xf32> -> vector<64x8xf32>
    %164 = arith.truncf %155 : vector<64x4xf32> to vector<64x4xbf16>
    %165 = arith.truncf %133 : vector<4x8xf32> to vector<4x8xbf16>
    %cst_87 = arith.constant dense<0.000000e+00> : vector<64x8xf32>
    %166 = tpu.matmul %164, %165, %cst_87 {dimension_numbers = #tpu.dot_dimension_numbers<[1], [0], [0], [1], [0, 0, 1, 1], [], []>} : vector<64x4xbf16>, vector<4x8xbf16>, vector<64x8xf32> -> vector<64x8xf32>
    %167 = arith.addf %163, %166 : vector<64x8xf32>
    %168 = tpu.reciprocal %160 {approx = true} : vector<64x1xf32> -> vector<64x1xf32>
    %169 = vector.broadcast %168 : vector<64x1xf32> to vector<64x8xf32>
    %170 = arith.mulf %167, %169 : vector<64x8xf32>
    %171 = arith.truncf %170 : vector<64x8xf32> to vector<64x8xbf16>
    %cst_88 = arith.constant dense<0.000000e+00> : vector<64x32xf32>
    %172 = tpu.matmul %171, %128, %cst_88 {dimension_numbers = #tpu.dot_dimension_numbers<[1], [0], [0], [1], [0, 0, 1, 1], [], []>} : vector<64x8xbf16>, vector<8x32xbf16>, vector<64x32xf32> -> vector<64x32xf32>
    %173 = arith.addf %120, %172 : vector<64x32xf32>
    %c3 = arith.constant 3 : index
    %c0_89 = arith.constant 0 : index
    %c0_90 = arith.constant 0 : index
    %174 = vector.load %arg10[%c3, %c0_89, %c0_90] : memref<4x32x8xbf16, #tpu.memory_space<vmem>>, vector<1x32x8xbf16>
    %175 = vector.shape_cast %174 : vector<1x32x8xbf16> to vector<32x8xbf16>
    %c3_91 = arith.constant 3 : index
    %c0_92 = arith.constant 0 : index
    %c0_93 = arith.constant 0 : index
    %176 = vector.load %arg11[%c3_91, %c0_92, %c0_93] : memref<4x32x8xbf16, #tpu.memory_space<vmem>>, vector<1x32x8xbf16>
    %177 = vector.shape_cast %176 : vector<1x32x8xbf16> to vector<32x8xbf16>
    %c3_94 = arith.constant 3 : index
    %c0_95 = arith.constant 0 : index
    %c0_96 = arith.constant 0 : index
    %178 = vector.load %arg12[%c3_94, %c0_95, %c0_96] : memref<4x32x8xbf16, #tpu.memory_space<vmem>>, vector<1x32x8xbf16>
    %179 = vector.shape_cast %178 : vector<1x32x8xbf16> to vector<32x8xbf16>
    %c3_97 = arith.constant 3 : index
    %c0_98 = arith.constant 0 : index
    %c0_99 = arith.constant 0 : index
    %180 = vector.load %arg13[%c3_97, %c0_98, %c0_99] : memref<4x8x32xbf16, #tpu.memory_space<vmem>>, vector<1x8x32xbf16>
    %181 = vector.shape_cast %180 : vector<1x8x32xbf16> to vector<8x32xbf16>
    %cst_100 = arith.constant dense<0.000000e+00> : vector<64x8xf32>
    %182 = tpu.matmul %2, %175, %cst_100 {dimension_numbers = #tpu.dot_dimension_numbers<[1], [0], [0], [1], [0, 0, 1, 1], [], []>} : vector<64x32xbf16>, vector<32x8xbf16>, vector<64x8xf32> -> vector<64x8xf32>
    %cst_101 = arith.constant dense<0.000000e+00> : vector<64x8xf32>
    %183 = tpu.matmul %2, %177, %cst_101 {dimension_numbers = #tpu.dot_dimension_numbers<[1], [0], [0], [1], [0, 0, 1, 1], [], []>} : vector<64x32xbf16>, vector<32x8xbf16>, vector<64x8xf32> -> vector<64x8xf32>
    %cst_102 = arith.constant dense<0.000000e+00> : vector<64x8xf32>
    %184 = tpu.matmul %2, %179, %cst_102 {dimension_numbers = #tpu.dot_dimension_numbers<[1], [0], [0], [1], [0, 0, 1, 1], [], []>} : vector<64x32xbf16>, vector<32x8xbf16>, vector<64x8xf32> -> vector<64x8xf32>
    %cst_103 = arith.constant dense<0.000000e+00> : vector<4x8xf32>
    %185 = tpu.matmul %7, %177, %cst_103 {dimension_numbers = #tpu.dot_dimension_numbers<[1], [0], [0], [1], [0, 0, 1, 1], [], []>} : vector<4x32xbf16>, vector<32x8xbf16>, vector<4x8xf32> -> vector<4x8xf32>
    %cst_104 = arith.constant dense<0.000000e+00> : vector<4x8xf32>
    %186 = tpu.matmul %7, %179, %cst_104 {dimension_numbers = #tpu.dot_dimension_numbers<[1], [0], [0], [1], [0, 0, 1, 1], [], []>} : vector<4x32xbf16>, vector<32x8xbf16>, vector<4x8xf32> -> vector<4x8xf32>
    %cst_105 = arith.constant 0.353553385 : f32
    %187 = vector.broadcast %cst_105 : f32 to vector<64x8xf32>
    %188 = arith.mulf %182, %187 : vector<64x8xf32>
    %189 = arith.truncf %188 : vector<64x8xf32> to vector<64x8xbf16>
    %190 = arith.truncf %183 : vector<64x8xf32> to vector<64x8xbf16>
    %cst_106 = arith.constant dense<0.000000e+00> : vector<64x64xf32>
    %191 = tpu.matmul %189, %190, %cst_106 {dimension_numbers = #tpu.dot_dimension_numbers<[1], [1], [0], [0], [0, 0, 1, 0], [], []>} : vector<64x8xbf16>, vector<64x8xbf16>, vector<64x64xf32> -> vector<64x64xf32>
    %192 = vector.broadcast %9 : vector<1x64xf32> to vector<64x64xf32>
    %193 = arith.addf %191, %192 : vector<64x64xf32>
    %194 = arith.truncf %185 : vector<4x8xf32> to vector<4x8xbf16>
    %cst_107 = arith.constant dense<0.000000e+00> : vector<64x4xf32>
    %195 = tpu.matmul %189, %194, %cst_107 {dimension_numbers = #tpu.dot_dimension_numbers<[1], [1], [0], [0], [0, 0, 1, 0], [], []>} : vector<64x8xbf16>, vector<4x8xbf16>, vector<64x4xf32> -> vector<64x4xf32>
    %196 = vector.broadcast %15 : vector<1x4xf32> to vector<64x4xf32>
    %197 = arith.addf %195, %196 : vector<64x4xf32>
    %cst_108 = arith.constant dense<0xFF800000> : vector<64xf32>
    %198 = vector.multi_reduction <maximumf>, %193, %cst_108 [1] : vector<64x64xf32> to vector<64xf32>
    %199 = vector.shape_cast %198 : vector<64xf32> to vector<64x1xf32>
    %cst_109 = arith.constant dense<0xFF800000> : vector<64xf32>
    %200 = vector.multi_reduction <maximumf>, %197, %cst_109 [1] : vector<64x4xf32> to vector<64xf32>
    %201 = vector.shape_cast %200 : vector<64xf32> to vector<64x1xf32>
    %202 = arith.maximumf %199, %201 : vector<64x1xf32>
    %203 = vector.broadcast %202 : vector<64x1xf32> to vector<64x64xf32>
    %204 = arith.subf %193, %203 : vector<64x64xf32>
    %205 = math.exp %204 : vector<64x64xf32>
    %206 = vector.broadcast %202 : vector<64x1xf32> to vector<64x4xf32>
    %207 = arith.subf %197, %206 : vector<64x4xf32>
    %208 = math.exp %207 : vector<64x4xf32>
    %cst_110 = arith.constant dense<0.000000e+00> : vector<64xf32>
    %209 = vector.multi_reduction <add>, %205, %cst_110 [1] : vector<64x64xf32> to vector<64xf32>
    %210 = vector.shape_cast %209 : vector<64xf32> to vector<64x1xf32>
    %cst_111 = arith.constant dense<0.000000e+00> : vector<64xf32>
    %211 = vector.multi_reduction <add>, %208, %cst_111 [1] : vector<64x4xf32> to vector<64xf32>
    %212 = vector.shape_cast %211 : vector<64xf32> to vector<64x1xf32>
    %213 = arith.addf %210, %212 : vector<64x1xf32>
    %214 = arith.truncf %205 : vector<64x64xf32> to vector<64x64xbf16>
    %215 = arith.truncf %184 : vector<64x8xf32> to vector<64x8xbf16>
    %cst_112 = arith.constant dense<0.000000e+00> : vector<64x8xf32>
    %216 = tpu.matmul %214, %215, %cst_112 {dimension_numbers = #tpu.dot_dimension_numbers<[1], [0], [0], [1], [0, 0, 1, 1], [], []>} : vector<64x64xbf16>, vector<64x8xbf16>, vector<64x8xf32> -> vector<64x8xf32>
    %217 = arith.truncf %208 : vector<64x4xf32> to vector<64x4xbf16>
    %218 = arith.truncf %186 : vector<4x8xf32> to vector<4x8xbf16>
    %cst_113 = arith.constant dense<0.000000e+00> : vector<64x8xf32>
    %219 = tpu.matmul %217, %218, %cst_113 {dimension_numbers = #tpu.dot_dimension_numbers<[1], [0], [0], [1], [0, 0, 1, 1], [], []>} : vector<64x4xbf16>, vector<4x8xbf16>, vector<64x8xf32> -> vector<64x8xf32>
    %220 = arith.addf %216, %219 : vector<64x8xf32>
    %221 = tpu.reciprocal %213 {approx = true} : vector<64x1xf32> -> vector<64x1xf32>
    %222 = vector.broadcast %221 : vector<64x1xf32> to vector<64x8xf32>
    %223 = arith.mulf %220, %222 : vector<64x8xf32>
    %224 = arith.truncf %223 : vector<64x8xf32> to vector<64x8xbf16>
    %cst_114 = arith.constant dense<0.000000e+00> : vector<64x32xf32>
    %225 = tpu.matmul %224, %181, %cst_114 {dimension_numbers = #tpu.dot_dimension_numbers<[1], [0], [0], [1], [0, 0, 1, 1], [], []>} : vector<64x8xbf16>, vector<8x32xbf16>, vector<64x32xf32> -> vector<64x32xf32>
    %226 = arith.addf %173, %225 : vector<64x32xf32>
    %c0_115 = arith.constant 0 : index
    %c0_116 = arith.constant 0 : index
    %227 = vector.load %arg14[%c0_115, %c0_116] : memref<1x32xf32, #tpu.memory_space<vmem>>, vector<1x32xf32>
    %228 = vector.broadcast %227 : vector<1x32xf32> to vector<64x32xf32>
    %229 = arith.addf %226, %228 : vector<64x32xf32>
    %c0_117 = arith.constant 0 : index
    %c0_118 = arith.constant 0 : index
    %c0_119 = arith.constant 0 : index
    %c0_120 = arith.constant 0 : index
    %230 = vector.load %arg5[%c0_117, %c0_118, %c0_119, %c0_120] : memref<1x1x64x1xf32, #tpu.memory_space<vmem>>, vector<1x1x64x1xf32>
    %231 = vector.shape_cast %230 : vector<1x1x64x1xf32> to vector<64x1xf32>
    %c0_121 = arith.constant 0 : index
    %c0_122 = arith.constant 0 : index
    %232 = vector.load %arg17[%c0_121, %c0_122] : memref<64x32xf32, #tpu.memory_space<vmem>>, vector<64x32xf32>
    %233 = vector.broadcast %231 : vector<64x1xf32> to vector<64x32xf32>
    %234 = arith.mulf %233, %229 : vector<64x32xf32>
    %235 = arith.addf %232, %234 : vector<64x32xf32>
    %c0_123 = arith.constant 0 : index
    %c0_124 = arith.constant 0 : index
    %236 = vector.load %arg17[%c0_123, %c0_124] : memref<64x32xf32, #tpu.memory_space<vmem>>, vector<64x32xf32>
    tpu.vector_store %arg17[%c0_123, %c0_124], %235 {strides = array<i32>} : memref<64x32xf32, #tpu.memory_space<vmem>>, vector<64x32xf32>,
    %c3_i32 = arith.constant 3 : i32
    %237 = arith.cmpi eq, %arg1, %c3_i32 : i32
    %238 = arith.extui %237 : i1 to i32
    %c0_i32_125 = arith.constant 0 : i32
    %239 = arith.cmpi ne, %238, %c0_i32_125 : i32
    scf.if %239 {
      %c0_126 = arith.constant 0 : index
      %c0_127 = arith.constant 0 : index
      %240 = vector.load %arg17[%c0_126, %c0_127] : memref<64x32xf32, #tpu.memory_space<vmem>>, vector<64x32xf32>
      %c0_128 = arith.constant 0 : index
      %c0_129 = arith.constant 0 : index
      %c0_130 = arith.constant 0 : index
      %241 = vector.load %arg15[%c0_128, %c0_129, %c0_130] : memref<1x64x32xf32, #tpu.memory_space<vmem>>, vector<1x64x32xf32>
      %242 = vector.shape_cast %241 : vector<1x64x32xf32> to vector<64x32xf32>
      %243 = vector.shape_cast %240 : vector<64x32xf32> to vector<1x64x32xf32>
      tpu.vector_store %arg15[%c0_128, %c0_129, %c0_130], %243 {strides = array<i32>} : memref<1x64x32xf32, #tpu.memory_space<vmem>>, vector<1x64x32xf32>,
    } else {
    }
    return
  }
  func.func @transform_0(%arg0: i32, %arg1: i32) -> (i32, i32, i32) {
    %c0_i32 = arith.constant 0 : i32
    %c0_i32_0 = arith.constant 0 : i32
    %c0_i32_1 = arith.constant 0 : i32
    return %arg0, %c0_i32, %c0_i32_0 : i32, i32, i32
  }
  func.func @transform_1(%arg0: i32, %arg1: i32) -> (i32, i32, i32) {
    %c0_i32 = arith.constant 0 : i32
    %c0_i32_0 = arith.constant 0 : i32
    %c0_i32_1 = arith.constant 0 : i32
    return %arg0, %c0_i32, %c0_i32_0 : i32, i32, i32
  }
  func.func @transform_2(%arg0: i32, %arg1: i32) -> (i32, i32, i32, i32) {
    %c0_i32 = arith.constant 0 : i32
    %c0_i32_0 = arith.constant 0 : i32
    %c0_i32_1 = arith.constant 0 : i32
    return %arg0, %arg1, %c0_i32, %c0_i32_0 : i32, i32, i32, i32
  }
  func.func @transform_3(%arg0: i32, %arg1: i32) -> (i32, i32, i32, i32) {
    %c0_i32 = arith.constant 0 : i32
    %c0_i32_0 = arith.constant 0 : i32
    %c0_i32_1 = arith.constant 0 : i32
    return %arg0, %arg1, %c0_i32, %c0_i32_0 : i32, i32, i32, i32
  }
  func.func @transform_4(%arg0: i32, %arg1: i32) -> (i32, i32) {
    %c0_i32 = arith.constant 0 : i32
    %c0_i32_0 = arith.constant 0 : i32
    %c0_i32_1 = arith.constant 0 : i32
    return %c0_i32, %c0_i32_0 : i32, i32
  }
  func.func @transform_5(%arg0: i32, %arg1: i32) -> (i32, i32) {
    %c0_i32 = arith.constant 0 : i32
    %c0_i32_0 = arith.constant 0 : i32
    %c0_i32_1 = arith.constant 0 : i32
    return %c0_i32, %c0_i32_0 : i32, i32
  }
  func.func @transform_6(%arg0: i32, %arg1: i32) -> (i32, i32) {
    %c0_i32 = arith.constant 0 : i32
    %c0_i32_0 = arith.constant 0 : i32
    %c0_i32_1 = arith.constant 0 : i32
    return %c0_i32, %c0_i32_0 : i32, i32
  }
  func.func @transform_7(%arg0: i32, %arg1: i32) -> (i32, i32) {
    %c0_i32 = arith.constant 0 : i32
    %c0_i32_0 = arith.constant 0 : i32
    %c0_i32_1 = arith.constant 0 : i32
    return %c0_i32, %c0_i32_0 : i32, i32
  }
  func.func @transform_8(%arg0: i32, %arg1: i32) -> (i32, i32, i32) {
    %c0_i32 = arith.constant 0 : i32
    %c0_i32_0 = arith.constant 0 : i32
    %c0_i32_1 = arith.constant 0 : i32
    %c0_i32_2 = arith.constant 0 : i32
    return %c0_i32, %c0_i32_0, %c0_i32_1 : i32, i32, i32
  }
  func.func @transform_9(%arg0: i32, %arg1: i32) -> (i32, i32, i32) {
    %c0_i32 = arith.constant 0 : i32
    %c0_i32_0 = arith.constant 0 : i32
    %c0_i32_1 = arith.constant 0 : i32
    %c0_i32_2 = arith.constant 0 : i32
    return %c0_i32, %c0_i32_0, %c0_i32_1 : i32, i32, i32
  }
  func.func @transform_10(%arg0: i32, %arg1: i32) -> (i32, i32, i32) {
    %c0_i32 = arith.constant 0 : i32
    %c0_i32_0 = arith.constant 0 : i32
    %c0_i32_1 = arith.constant 0 : i32
    %c0_i32_2 = arith.constant 0 : i32
    return %c0_i32, %c0_i32_0, %c0_i32_1 : i32, i32, i32
  }
  func.func @transform_11(%arg0: i32, %arg1: i32) -> (i32, i32, i32) {
    %c0_i32 = arith.constant 0 : i32
    %c0_i32_0 = arith.constant 0 : i32
    %c0_i32_1 = arith.constant 0 : i32
    %c0_i32_2 = arith.constant 0 : i32
    return %c0_i32, %c0_i32_0, %c0_i32_1 : i32, i32, i32
  }
  func.func @transform_12(%arg0: i32, %arg1: i32) -> (i32, i32) {
    %c0_i32 = arith.constant 0 : i32
    %c0_i32_0 = arith.constant 0 : i32
    %c0_i32_1 = arith.constant 0 : i32
    return %c0_i32, %c0_i32_0 : i32, i32
  }
  func.func @transform_13(%arg0: i32, %arg1: i32) -> (i32, i32, i32) {
    %c0_i32 = arith.constant 0 : i32
    %c0_i32_0 = arith.constant 0 : i32
    %c0_i32_1 = arith.constant 0 : i32
    return %arg0, %c0_i32, %c0_i32_0 : i32, i32, i32
  }
}

</mosaic_0001>

<bundles_post_ra>
// kernel: inst_diff_self_attention_forward.1
= control target key start
LH: loop header
LB: loop body
LE: loop exit
PB: predicated region body
PF: predicated region fallthrough
CT: control target
= control target key end

     0   :  { %s6095_s25 = smov 0   ;;  %s6097_s26 = smov 0   ;;  %s7344_s0 = inlined_call_operand.vmem [shape: f32[2,64,32], index: 0, kind: input, shape index: {}]   ;;  %s7345_s1 = inlined_call_operand.vmem [shape: f32[2,4,16], index: 1, kind: input, shape index: {}]   ;;  %s7346_s2 = inlined_call_operand.vmem [shape: f32[2,4,1,64], index: 2, kind: input, shape index: {}]   ;;  %s7347_s3 = inlined_call_operand.vmem [shape: f32[2,4,64,1], index: 3, kind: input, shape index: {}]   ;;  %s7348_s4 = inlined_call_operand.vmem [shape: bf16[16,32], index: 4, kind: input, shape index: {}]   ;;  %s7349_s5 = inlined_call_operand.vmem [shape: f32[1,32], index: 5, kind: input, shape index: {}]   ;;  %s7350_s6 = inlined_call_operand.vmem [shape: bf16[32,32], index: 6, kind: input, shape index: {}]   ;;  %s7351_s7 = inlined_call_operand.vmem [shape: f32[1,32], index: 7, kind: input, shape index: {}]   ;;  %s7352_s8 = inlined_call_operand.vmem [shape: bf16[4,32,8], index: 8, kind: input, shape index: {}]   ;;  %s7353_s9 = inlined_call_operand.vmem [shape: bf16[4,32,8], index: 9, kind: input, shape index: {}]   ;;  %s7354_s10 = inlined_call_operand.vmem [shape: bf16[4,32,8], index: 10, kind: input, shape index: {}]   ;;  %s7355_s11 = inlined_call_operand.vmem [shape: bf16[4,8,32], index: 11, kind: input, shape index: {}]   ;;  %s7356_s12 = inlined_call_operand.vmem [shape: f32[1,32], index: 12, kind: input, shape index: {}]   ;;  %s7357_s13 = inlined_call_operand.vmem [shape: f32[2,64,32], index: 13, kind: output, shape index: {}]  }
   0x1   :  { %s6099_s27 = smov 0   ;;  %s6101_s28 = smov 0  }
   0x2   :  { %s6103_s29 = smov 0  }
   0x3 LB: > { %7365 = sst [smem:[#allocation4_spill]] %s6009_s27  ;;  %s32_s30 = sadd.s32 1, %s6009_s27  ;;  %s6017_s29 = sphi %s6103_s29, %s23_s29   ;;  %s6013_s28 = sphi %s6101_s28, %s7379_s28   ;;  %s6009_s27 = sphi %s6099_s27, %s7378_s27   ;;  %s6005_s26 = sphi %s6097_s26, %s7377_s26   ;;  %s6001_s25 = sphi %s6095_s25, %s7376_s25  }
   0x4   : > { %7366 = sst [smem:[#allocation5_spill]] %s6013_s28  ;;  %s35_s14 = sadd.s32 1, %s6013_s28 }
   0x5   : > { %7367 = sst [smem:[#allocation6_spill]] %s6017_s29  ;;  %p33_p0 = scmp.ge.s32.totalorder %s32_s30, 4 }
   0x6   : > { %p4703_p1 = scmp.ge.s32.totalorder %s6017_s29, 1  ;;  %p438_p2 = scmp.lt.s32.totalorder %s6017_s29, 9 }
   0x7   : > { %s7381_s30 = smov (%p33_p0, %s32_s30), 0  ;;  %s7383_s14 = smov (!%p33_p0, %s35_s14), %s6013_s28 }
   0x8   : > { %7368 = sst [smem:[#allocation7_spill]] %s7381_s30  ;;  %p439_p3 = pnand %p4703_p1, %p438_p2 }
   0x9   : > { %p37_p4 = scmp.ge.s32.totalorder %s7383_s14, 2 }
   0xa   : > { %442 = sbr.rel (%p439_p3) target bundleno = 3415 (0xd57), region = 72 }
   0xb   : > { %s7385_s14 = smov (%p37_p4, %s7383_s14), 0 }
   0xc   : > { %7369 = sst [smem:[#allocation8_spill]] %s7385_s14 }
  0x11   : > { %p502_p5 = scmp.lt.s32.totalorder %s6005_s26, 1  ;;  %p513_p6 = scmp.lt.s32.totalorder %s6001_s25, 3 }
  0x12   : > { %p4713_p7 = scmp.ne.s32.totalorder %s6001_s25, 0 }
  0x13   : > { %s7387_s26 = smov (!%p502_p5, %s6005_s26), 1  ;;  %v5753_v12 = vld [vmem:[%s7348_s4] sm:$0xff] (!%p4713_p7)   ;;  %v6019_v13 = vmov (!%p4713_p7), 0.0   ;;  %vm566_vm0 = vcmask (!%p4713_p7), 130048   ;;  %vm6020_vm1 = vmmov (!%p4713_p7), 0   ;;  %v5755_v17 = vld [vmem:[%s7350_s6 + $0x8] sm:$0xff] (!%p4713_p7)  }
  0x14   : > { %s514_s15 = scalar_select %p513_p6, %s6001_s25, 3 }
  0x15   : > { %s4926_s16 = sshll.u32 %s7387_s26, 6  ;;  %s4706_s17 = sshll.u32 %s7387_s26, 2  ;;  %5153 = vmatprep.subr.bf16.mxu0 (!%p4713_p7), %v6019_v13  ;;  %5159 = vmatprep.subr.bf16.mxu1 (!%p4713_p7), %v6019_v13  ;;  %v5754_v16 = vld [vmem:[%s7350_s6] sm:$0xff] (!%p4713_p7)   ;;  %vm641_vm2 = vcmask (!%p4713_p7), 261120   ;;  %vm685_vm3 = vcmask (!%p4713_p7), 257024  }
  0x16   : > { %s506_s20 = scalar_lea.vmem %s7344_s0, %s4926_s16  ;;  %s510_s23 = scalar_lea.vmem %s7345_s1, %s4706_s17  ;;  %5154 = vmatpush3.bf16.msra.mxu0 (!%p4713_p7), %v5753_v12  ;;  %5155 = vmatprep.mubr.msk.bf16.mxu0 (!%p4713_p7), %vm6020_vm1, %v6019_v13  ;;  %v4714_v18 = vld [vmem:[%s7349_s5] ss:$0 sm:$0xff] (!%p4713_p7) }
  0x17   : > { %s516_s24 = sadd.s32 %s4706_s17, %s514_s15  ;;  %s4708_s30 = sshll.u32 %s514_s15, 3  ;;  %v533_v0 = vld [vmem:[%s506_s20] sm:$0xff]  ;;  %v534_v1 = vld [vmem:[%s506_s20 + $0x8] sm:$0xff]  ;;  %v535_v2 = vld [vmem:[%s506_s20 + $0x10] sm:$0xff]  ;;  %5163 = vmatprep.mubr.msk.bf16.mxu1 (!%p4713_p7), %vm6020_vm1, %v6019_v13  ;;  %5160 = vmatpush3.bf16.msra.mxu1 (!%p4713_p7), %v5754_v16 }
  0x18   : > { %s6138_s27 = scalar_lea.vmem %s7346_s2, %s516_s24  ;;  %s4709_s29 = sshll.u32 %s7387_s26, 5  ;;  %v536_v3 = vld [vmem:[%s506_s20 + $0x18] sm:$0xff]  ;;  %v537_v4 = vld [vmem:[%s506_s20 + $0x20] sm:$0xff]  ;;  %v538_v5 = vld [vmem:[%s506_s20 + $0x28] sm:$0xff]  ;;  %v6140_v6 = vpack.c.bf16 %v534_v1, %v533_v0  ;;  %5161 = vmatprep.subr.bf16.mxu1 (!%p4713_p7), %v6019_v13  ;;  %687 = vst.msk [vmem:[#allocation3] sm:$0xff] (!%p4713_p7), %vm641_vm2, %v533_v0 }
  0x19   : > { %s524_s18 = sadd.s32 %s4709_s29, %s4708_s30  ;;  %s6145_s17 = scalar_lea.vmem %s7357_s13, %s4926_s16  ;;  %v539_v7 = vld [vmem:[%s506_s20 + $0x30] sm:$0xff]  ;;  %v540_v8 = vld [vmem:[%s506_s20 + $0x38] sm:$0xff]  ;;  %v6147_v9 = vpack.c.bf16 %v536_v3, %v535_v2  ;;  %v6149_v10 = vpack.c.bf16 %v538_v5, %v537_v4  ;;  %v549_v14 = vld [vmem:[%s510_s23] sm:$0xf] (!%p4713_p7)  ;;  %688 = vst.msk [vmem:[#allocation3 + $0x8] sm:$0xff] (!%p4713_p7), %vm641_vm2, %v534_v1 }
  0x1a   : > { %s4710_s28 = sshll.u32 %s524_s18, 3  ;;  %v6151_v11 = vpack.c.bf16 %v540_v8, %v539_v7  ;;  %548 = sbr.rel (%p4713_p7) target bundleno = 487 (0x1e7), region = 76  ;;  %v550_v15 = vpack.c.bf16 (!%p4713_p7), %v549_v14, %v549_v14  ;;  %689 = vst.msk [vmem:[#allocation3 + $0x10] sm:$0xff] (!%p4713_p7), %vm641_vm2, %v535_v2  ;;  %690 = vst.msk [vmem:[#allocation3 + $0x18] sm:$0xff] (!%p4713_p7), %vm641_vm2, %v536_v3  ;;  %v4718_v30 = vld [vmem:[%s7351_s7] ss:$0 sm:$0xff] (!%p4713_p7) }
  0x1b   : > { %s6156_s15 = scalar_lea.vmem %s7347_s3, %s4710_s28  ;;  %5162 = vmatpush3.bf16.msra.mxu1 (!%p4713_p7), %v5755_v17  ;;  %691 = vst.msk [vmem:[#allocation3 + $0x20] sm:$0xff] (!%p4713_p7), %vm641_vm2, %v537_v4  ;;  %692 = vst.msk [vmem:[#allocation3 + $0x28] sm:$0xff] (!%p4713_p7), %vm641_vm2, %v538_v5 }
  0x1c   : > { %5156 = vmatmul.mubr.msk.bf16.vlgmr.msra.gmra.mrb[0].mxu0 (!%p4713_p7), %vm566_vm0, %v550_v15  ;;  %693 = vst.msk [vmem:[#allocation3 + $0x30] sm:$0xff] (!%p4713_p7), %vm641_vm2, %v539_v7  ;;  %694 = vst.msk [vmem:[#allocation3 + $0x38] sm:$0xff] (!%p4713_p7), %vm641_vm2, %v540_v8 }
  0xef   : > { %v604_v19 = vpop.f32.mrb[0].mxu0 }
  0xf0   : > { %v605_v20 = vadd.f32 %v4714_v18, %v604_v19  ;;  %v5157_v21 = vpop.f32.mrb[1].mxu0 }
  0xf1   : > { %v607_v22 = vpop.f32.mrb[2].mxu0 }
  0xf2   : > { %v4717_v23 = vmul.f32 -1.442695, %v605_v20  ;;  %v5158_v24 = vpop.f32.mrb[3].mxu0 }
  0xf4   : > { %5756 = vpow2.f32 %v4717_v23 }
  0xfe   : > { %v5757_v25 = vpop.eup %5756 }
  0xff   : > { %v613_v26 = vadd.f32 1.0, %v5757_v25 }
 0x101   : > { %5758 = vrcp.f32 %v613_v26 }
 0x10b   : > { %v5759_v27 = vpop.eup %5758 }
 0x10c   : > { %v616_v28 = vmul.f32 %v5759_v27, %v605_v20 }
 0x10e   : > { %v617_v29 = vpack.c.bf16 %v616_v28, %v616_v28 }
 0x110   : > { %5164 = vmatmul.mubr.msk.bf16.vlgmr.msra.gmra.mrb[0].mxu1 %vm641_vm2, %v617_v29 }
 0x1e3   : > { %v679_v31 = vpop.f32.mrb[0].mxu1 }
 0x1e4   : > { %v680_v32 = vadd.f32 %v4718_v30, %v679_v31  ;;  %v5165_v33 = vpop.f32.mrb[1].mxu1 }
 0x1e5   : > { %v682_v34 = vpop.f32.mrb[2].mxu1 }
 0x1e6   : > { %686 = vst.msk [vmem:[#allocation2] sm:$0xf] %vm685_vm3, %v680_v32  ;;  %v5166_v35 = vpop.f32.mrb[3].mxu1 }
 0x1e7 PF: > { %v5762_v36 = vld [vmem:[%s7353_s9] sm:$0xff]   ;;  %vm728_vm4 = vcmask 261120   ;;  %v5763_v37 = vld [vmem:[%s7353_s9 + $0x8] sm:$0xff]   ;;  %v7361_v41 = vmov 0.0   ;;  %vm6022_vm5 = vmmov 0   ;;  %vm1065_vm6 = vcmask 64512  }
 0x1e8   : > { %5183 = vmatprep.mubr.msk.bf16.mxu1 %vm728_vm4, %v6140_v6  ;;  %5171 = vmatprep.mubr.msk.bf16.mxu0 %vm728_vm4, %v6140_v6  ;;  %v5764_v38 = vld [vmem:[%s7352_s8] sm:$0xff]   ;;  %v5765_v39 = vld [vmem:[%s7352_s8 + $0x8] sm:$0xff]   ;;  %vm1411_vm7 = vcmask 1041408   ;;  %vm1249_vm9 = vcmask 31744   ;;  %vm1224_vm10 = vcmask 523264   ;;  %vm2441_vm11 = vcmask 1043456  }
 0x1e9   : > { %5179 = vmatprep.subr.bf16.mxu1 %v5762_v36  ;;  %5167 = vmatprep.subr.bf16.mxu0 %v5764_v38  ;;  %v5766_v40 = vld [vmem:[%s7354_s10] sm:$0xff]   ;;  %v5767_v42 = vld [vmem:[%s7354_s10 + $0x8] sm:$0xff]   ;;  %p4923_p8 = scmp.ne.s32.totalorder %s6001_s25, 3 }
 0x1ea   : > { %5180 = vmatpush3.bf16.msra.mxu1 %v5762_v36  ;;  %5168 = vmatpush3.bf16.msra.mxu0 %v5764_v38  ;;  %v5768_v38 = vld [vmem:[%s7352_s8 + $0x10] sm:$0xff]  }
 0x1eb   : > { %5181 = vmatprep.subr.bf16.mxu1 %v5763_v37  ;;  %5169 = vmatprep.subr.bf16.mxu0 %v5765_v39 }
 0x1ed   : > { %v695_v43 = vld [vmem:[#allocation2] sm:$0xf] }
 0x1ee   : > { %5182 = vmatpush3.bf16.msra.mxu1 %v5763_v37  ;;  %5170 = vmatpush3.bf16.msra.mxu0 %v5765_v39  ;;  %v6224_v44 = vpack.c.bf16 %v695_v43, %v695_v43  ;;  %v5771_v43 = vld [vmem:[%s7353_s9 + $0x18] sm:$0xff]  }
 0x1ef   : > { %5203 = vmatprep.subr.bf16.mxu1 %v7361_v41  ;;  %5191 = vmatprep.subr.bf16.mxu0 %v5766_v40 }
 0x1f1   : > { %5184 = vmatmul.mubr.msk.bf16.vlgmr.msra.gmra.mrb[0].mxu1 %vm728_vm4, %v6147_v9  ;;  %5172 = vmatmul.mubr.msk.bf16.vlgmr.msra.gmra.mrb[0].mxu0 %vm728_vm4, %v6147_v9 }
 0x1f2   : > { %5204 = vmatpush3.bf16.msra.mxu1 %v5762_v36  ;;  %5187 = vmatprep.mubr.msk.bf16.mxu1 %vm728_vm4, %v6149_v10 }
 0x1f3   : > { %5205 = vmatprep.subr.bf16.mxu1 %v7361_v41  ;;  %5175 = vmatprep.mubr.msk.bf16.mxu0 %vm728_vm4, %v6149_v10 }
 0x1f4   : > { %5192 = vmatpush3.bf16.msra.mxu0 %v5766_v40 }
 0x1f5   : > { %5193 = vmatprep.subr.bf16.mxu0 %v5767_v42 }
 0x1f6   : > { %5206 = vmatpush3.bf16.msra.mxu1 %v5763_v37 }
 0x1f7   : > { %5211 = vmatprep.subr.bf16.mxu1 %v7361_v41 }
 0x1f8   : > { %5194 = vmatpush3.bf16.msra.mxu0 %v5767_v42 }
 0x1f9   : > { %5188 = vmatmul.mubr.msk.bf16.gmra.mrb[4].mxu1 %vm728_vm4, %v6151_v11  ;;  %5176 = vmatmul.mubr.msk.bf16.gmra.mrb[4].mxu0 %vm728_vm4, %v6151_v11 }
 0x1fa   : > { %5207 = vmatprep.mubr.msk.bf16.mxu1 %vm6022_vm5, %v7361_v41  ;;  %5195 = vmatprep.mubr.msk.bf16.mxu0 %vm728_vm4, %v6140_v6 }
 0x201   : > { %5208 = vmatmul.mubr.msk.bf16.vlgmr.msra.gmra.mrb[8].mxu1 %vm728_vm4, %v6224_v44  ;;  %5196 = vmatmul.mubr.msk.bf16.vlgmr.msra.gmra.mrb[8].mxu0 %vm728_vm4, %v6147_v9 }
 0x202   : > { %5212 = vmatpush3.bf16.msra.mxu1 %v5766_v40  ;;  %5215 = vmatprep.mubr.msk.bf16.mxu1 %vm6022_vm5, %v7361_v41  ;;  %v5769_v40 = vld [vmem:[%s7352_s8 + $0x18] sm:$0xff]  }
 0x203   : > { %5213 = vmatprep.subr.bf16.mxu1 %v7361_v41  ;;  %5199 = vmatprep.mubr.msk.bf16.mxu0 %vm728_vm4, %v6149_v10 }
 0x206   : > { %5214 = vmatpush3.bf16.msra.mxu1 %v5767_v42  ;;  %v5770_v42 = vld [vmem:[%s7353_s9 + $0x10] sm:$0xff]  }
 0x209   : > { %5216 = vmatmul.mubr.msk.bf16.vlgmr.msra.gmra.mrb[12].mxu1 %vm728_vm4, %v6224_v44  ;;  %5200 = vmatmul.mubr.msk.bf16.gmra.mrb[12].mxu0 %vm728_vm4, %v6151_v11 }
 0x2c4   : > { %v5185_v45 = vpop.f32.mrb[0].mxu1  ;;  %v5173_v48 = vpop.f32.mrb[0].mxu0 }
 0x2c5   : > { %v852_v46 = vpop.f32.mrb[1].mxu1  ;;  %v1045_v51 = vmul.f32 0.35355338, %v5173_v48  ;;  %v775_v52 = vpop.f32.mrb[1].mxu0 }
 0x2c6   : > { %v5186_v47 = vpop.f32.mrb[2].mxu1  ;;  %v1043_v54 = vmul.f32 0.35355338, %v775_v52  ;;  %v5174_v55 = vpop.f32.mrb[2].mxu0 }
 0x2c7   : > { %v1056_v49 = vpack.c.bf16 %v5186_v47, %v5185_v45  ;;  %v855_v50 = vpop.f32.mrb[3].mxu1  ;;  %v1046_v56 = vmul.f32 0.35355338, %v5174_v55  ;;  %v778_v57 = vpop.f32.mrb[3].mxu0 }
 0x2c8   : > { %v1055_v53 = vpack.c.bf16 %v855_v50, %v852_v46  ;;  %v1044_v59 = vmul.f32 0.35355338, %v778_v57 }
 0x2c9   : > { %v1052_v60 = vpack.c.bf16 %v1046_v56, %v1045_v51  ;;  %v1082_v15 = vsel %vm1065_vm6, %v1056_v49, 0  ;;  %v698_v51 = vlaneseq }
 0x2ca   : > { %v1079_v58 = vsel %vm1065_vm6, %v1055_v53, 0  ;;  %5679 = vmatprep.subr.msk.bf16.mxu0 %vm1065_vm6, %v1055_v53  ;;  %v1051_v62 = vpack.c.bf16 %v1044_v59, %v1043_v54  ;;  %v700_v53 = vstv %s6001_s25  ;;  %v6023_v54 = vmov -1000.0  }
 0x2cb   : > { %5220 = vmatpush3.bf16.xpose.msra.mxu0 %v1079_v58  ;;  %v699_v52 = vand.u32 127, %v698_v51 }
 0x2cc   : > { %v5189_v61 = vpop.f32.mrb[4].mxu1  ;;  %5680 = vmatprep.subr.msk.bf16.mxu0 %vm1065_vm6, %v1056_v49  ;;  %v5177_v1 = vpop.f32.mrb[4].mxu0  ;;  %5227 = vmatprep.mubr.msk.bf16.mxu0 %vm1065_vm6, %v1051_v62 }
 0x2cd   : > { %v868_v63 = vpop.f32.mrb[5].mxu1  ;;  %5237 = vmatprep.mubr.msk.bf16.mxu1 %vm1065_vm6, %v1051_v62  ;;  %v1049_v4 = vmul.f32 0.35355338, %v5177_v1  ;;  %v791_v5 = vpop.f32.mrb[5].mxu0  ;;  %vm701_vm8 = vcmp.eq.s32.totalorder %v699_v52, %v700_v53 }
 0x2ce   : > { %v5190_v0 = vpop.f32.mrb[6].mxu1  ;;  %v1047_v8 = vmul.f32 0.35355338, %v791_v5  ;;  %v5178_v12 = vpop.f32.mrb[6].mxu0  ;;  %v6303_v55 = vsel %vm701_vm8, 0.0, %v6023_v54 }
 0x2cf   : > { %v1058_v2 = vpack.c.bf16 %v5190_v0, %v5189_v61  ;;  %v871_v3 = vpop.f32.mrb[7].mxu1  ;;  %v1050_v13 = vmul.f32 0.35355338, %v5178_v12  ;;  %v794_v14 = vpop.f32.mrb[7].mxu0  ;;  %7370 = vst [vmem:[#allocation9_spill] sm:$0xff] %v6303_v55 }
 0x2d0   : > { %v1057_v7 = vpack.c.bf16 %v871_v3, %v868_v63  ;;  %v1048_v16 = vmul.f32 0.35355338, %v794_v14  ;;  %v6324_v5 = vld [vmem:[%s6138_s27] ss:$0 sm:$0xff] }
 0x2d1   : > { %v1054_v17 = vpack.c.bf16 %v1050_v13, %v1049_v4  ;;  %v1088_v39 = vsel %vm1065_vm6, %v1058_v2, 0 }
 0x2d2   : > { %v1053_v19 = vpack.c.bf16 %v1048_v16, %v1047_v8  ;;  %v1085_v30 = vsel %vm1065_vm6, %v1057_v7, 0 }
 0x2d3   : > { %5222 = vmatpush3.bf16.xpose.msra.mxu0 %v1082_v15 }
 0x2d4   : > { %v997_v18 = vpop.f32.mrb[8].mxu1  ;;  %5681 = vmatprep.subr.msk.bf16.mxu0 %vm1065_vm6, %v1057_v7  ;;  %v5197_v23 = vpop.f32.mrb[8].mxu0 }
 0x2d5   : > { %v1155_v20 = vpack.c.bf16 %v997_v18, %v997_v18  ;;  %v5209_v21 = vpop.f32.mrb[9].mxu1  ;;  %v929_v26 = vpop.f32.mrb[9].mxu0 }
 0x2d6   : > { %v1000_v22 = vpop.f32.mrb[10].mxu1  ;;  %v5198_v27 = vpop.f32.mrb[10].mxu0 }
 0x2d7   : > { %v1157_v24 = vsel %vm1065_vm6, %v1155_v20, 0  ;;  %v5210_v25 = vpop.f32.mrb[11].mxu1  ;;  %5683 = vmatprep.subr.msk.bf16.mxu1 %vm1065_vm6, %v1155_v20  ;;  %v6248_v28 = vpack.c.bf16 %v5198_v27, %v5197_v23  ;;  %v932_v29 = vpop.f32.mrb[11].mxu0 }
 0x2d8   : > { %5236 = vmatpush3.bf16.xpose.msra.mxu1 %v1157_v24  ;;  %v6251_v31 = vpack.c.bf16 %v932_v29, %v929_v26 }
 0x2db   : > { %5224 = vmatpush3.bf16.xpose.msra.mxu0 %v1085_v30 }
 0x2dc   : > { %5682 = vmatprep.subr.msk.bf16.mxu0 %vm1065_vm6, %v1058_v2  ;;  %v1037_v32 = vpop.f32.mrb[12].mxu1  ;;  %v5201_v45 = vpop.f32.mrb[12].mxu0 }
 0x2dd   : > { %v1398_v33 = vpack.c.bf16 %v1037_v32, %v1037_v32  ;;  %v5217_v34 = vpop.f32.mrb[13].mxu1  ;;  %v945_v46 = vpop.f32.mrb[13].mxu0 }
 0x2de   : > { %v1040_v35 = vpop.f32.mrb[14].mxu1  ;;  %v5202_v47 = vpop.f32.mrb[14].mxu0 }
 0x2df   : > { %5238 = vmatmul.mubr.msk.bf16.vlgmr.msra.gmra.mrb[16].mxu1 %vm1065_vm6, %v1052_v60  ;;  %v1413_v36 = vsel %vm1411_vm7, %v1398_v33, 0  ;;  %5684 = vmatprep.subr.msk.bf16.mxu1 %vm1411_vm7, %v1398_v33  ;;  %v5218_v37 = vpop.f32.mrb[15].mxu1  ;;  %v6298_v48 = vpack.c.bf16 %v5202_v47, %v5201_v45  ;;  %v948_v49 = vpop.f32.mrb[15].mxu0 }
 0x2e0   : > { %5241 = vmatprep.mubr.msk.bf16.mxu1 %vm1065_vm6, %v1053_v19  ;;  %5246 = vmatpush3.bf16.msra.mxu1 %v1413_v36  ;;  %v6300_v50 = vpack.c.bf16 %v948_v49, %v945_v46 }
 0x2e1   : > { %5255 = vmatprep.subr.bf16.mxu1 %v6251_v31 }
 0x2e3   : > { %5226 = vmatpush3.bf16.xpose.msra.mxu0 %v1088_v39 }
 0x2e4   : > { %5271 = vmatprep.subr.bf16.mxu0 %v5768_v38 }
 0x2e7   : > { %5242 = vmatmul.mubr.msk.bf16.gmra.mrb[20].mxu1 %vm1065_vm6, %v1054_v17 }
 0x2ea   : > { %5228 = vmatmul.mubr.msk.bf16.vlgmr.msra.gmra.mrb[16].mxu0 %vm1065_vm6, %v1052_v60 }
 0x2eb   : > { %5231 = vmatprep.mubr.msk.bf16.mxu0 %vm1065_vm6, %v1053_v19  ;;  %5272 = vmatpush3.bf16.msra.mxu0 %v5768_v38 }
 0x2ec   : > { %5273 = vmatprep.subr.bf16.mxu0 %v5769_v40 }
 0x2ef   : > { %5274 = vmatpush3.bf16.msra.mxu0 %v5769_v40 }
 0x2f0   : > { %5283 = vmatprep.subr.bf16.mxu0 %v5770_v42 }
 0x2f2   : > { %5232 = vmatmul.mubr.msk.bf16.gmra.mrb[20].mxu0 %vm1065_vm6, %v1054_v17 }
 0x2f3   : > { %5275 = vmatprep.mubr.msk.bf16.mxu0 %vm728_vm4, %v6140_v6 }
 0x2fa   : > { %5276 = vmatmul.mubr.msk.bf16.vlgmr.msra.gmra.mrb[24].mxu0 %vm728_vm4, %v6147_v9 }
 0x2fb   : > { %5279 = vmatprep.mubr.msk.bf16.mxu0 %vm728_vm4, %v6149_v10  ;;  %5284 = vmatpush3.bf16.msra.mxu0 %v5770_v42 }
 0x2fc   : > { %5285 = vmatprep.subr.bf16.mxu0 %v5771_v43 }
 0x2ff   : > { %5286 = vmatpush3.bf16.msra.mxu0 %v5771_v43 }
 0x300   : > { %5307 = vmatprep.subr.bf16.mxu0 %v7361_v41 }
 0x302   : > { %5280 = vmatmul.mubr.msk.bf16.gmra.mrb[28].mxu0 %vm728_vm4, %v6151_v11 }
 0x303   : > { %5287 = vmatprep.mubr.msk.bf16.mxu0 %vm728_vm4, %v6140_v6 }
 0x30a   : > { %5288 = vmatmul.mubr.msk.bf16.vlgmr.msra.gmra.mrb[32].mxu0 %vm728_vm4, %v6147_v9 }
 0x30b   : > { %5291 = vmatprep.mubr.msk.bf16.mxu0 %vm728_vm4, %v6149_v10  ;;  %5308 = vmatpush3.bf16.msra.mxu0 %v5770_v42 }
 0x30c   : > { %5309 = vmatprep.subr.bf16.mxu0 %v7361_v41 }
 0x30f   : > { %5310 = vmatpush3.bf16.msra.mxu0 %v5771_v43 }
 0x312   : > { %5292 = vmatmul.mubr.msk.bf16.gmra.mrb[36].mxu0 %vm728_vm4, %v6151_v11 }
 0x313   : > { %5311 = vmatprep.mubr.msk.bf16.mxu0 %vm6022_vm5, %v7361_v41 }
 0x31a   : > { %5312 = vmatmul.mubr.msk.bf16.vlgmr.msra.gmra.mrb[40].mxu0 %vm728_vm4, %v6224_v44 }
 0x3b2   : > { %v5239_v56 = vpop.f32.mrb[16].mxu1 }
 0x3b3   : > { %v6306_v57 = vadd.f32 %v5239_v56, %v6303_v55  ;;  %v1193_v58 = vpop.f32.mrb[17].mxu1 }
 0x3b4   : > { %v6309_v59 = vadd.f32 %v1193_v58, %v6303_v55  ;;  %v5240_v60 = vpop.f32.mrb[18].mxu1 }
 0x3b5   : > { %v1196_v61 = vpop.f32.mrb[19].mxu1  ;;  %v1256_v62 = vsel %vm1249_vm9, %v6306_v57, -inf  ;;  %v6314_v63 = vadd.f32 %v5240_v60, %v6303_v55 }
 0x3b6   : > { %1257 = vmax.xlane.f32.xlu0 %v1256_v62  ;;  %v1250_v0 = vsel %vm1249_vm9, %v6309_v59, -inf  ;;  %v6319_v1 = vadd.f32 %v1196_v61, %v6303_v55 }
 0x3b7   : > { %1251 = vmax.xlane.f32.xlu1 %v1250_v0  ;;  %v1259_v3 = vsel %vm1249_vm9, %v6314_v63, -inf }
 0x3b8   : > { %v1253_v18 = vsel %vm1249_vm9, %v6319_v1, -inf }
 0x3ba   : > { %v5243_v2 = vpop.f32.mrb[20].mxu1 }
 0x3bb   : > { %v1209_v4 = vpop.f32.mrb[21].mxu1  ;;  %1260 = vmax.xlane.f32.xlu1 %v1259_v3  ;;  %v6380_v56 = vadd.f32 %v5243_v2, %v6303_v55 }
 0x3bc   : > { %v6327_v7 = vadd.f32 %v1209_v4, %v6303_v55  ;;  %v5244_v8 = vpop.f32.mrb[22].mxu1 }
 0x3bd   : > { %v5229_v12 = vpop.f32.mrb[16].mxu0  ;;  %v1212_v13 = vpop.f32.mrb[23].mxu1  ;;  %v6370_v39 = vadd.f32 %v5244_v8, %v6303_v55  ;;  %v1268_v2 = vsel %vm1249_vm9, %v6380_v56, -inf }
 0x3be   : > { %v6330_v14 = vadd.f32 %v5229_v12, %v6324_v5  ;;  %v6333_v15 = vadd.f32 %v1212_v13, %v6303_v55  ;;  %v1124_v16 = vpop.f32.mrb[17].mxu0  ;;  %v1262_v17 = vsel %vm1249_vm9, %v6327_v7, -inf }
 0x3bf   : > { %v5230_v19 = vpop.f32.mrb[18].mxu0  ;;  %1263 = vmax.xlane.f32.xlu0 %v1262_v17  ;;  %1254 = vmax.xlane.f32.xlu1 %v1253_v18  ;;  %v6340_v21 = vadd.f32 %v6324_v5, %v1124_v16  ;;  %v1271_v60 = vsel %vm1249_vm9, %v6370_v39, -inf }
 0x3c0   : > { %v1127_v20 = vpop.f32.mrb[19].mxu0  ;;  %v6343_v22 = vadd.f32 %v5230_v19, %v6324_v5  ;;  %v1231_v23 = vsel %vm1224_vm10, %v6330_v14, -inf  ;;  %v1265_v24 = vsel %vm1249_vm9, %v6333_v15, -inf }
 0x3c1   : > { %v6350_v26 = vadd.f32 %v6324_v5, %v1127_v20  ;;  %v1225_v29 = vsel %vm1224_vm10, %v6340_v21, -inf }
 0x3c2   : > { %v1234_v30 = vsel %vm1224_vm10, %v6343_v22, -inf }
 0x3c3   : > { %1232 = vmax.xlane.f32.xlu0 %v1231_v23  ;;  %1266 = vmax.xlane.f32.xlu1 %v1265_v24  ;;  %v1228_v37 = vsel %vm1224_vm10, %v6350_v26, -inf }
 0x3c5   : > { %v5233_v25 = vpop.f32.mrb[20].mxu0 }
 0x3c6   : > { %v1140_v27 = vpop.f32.mrb[21].mxu0  ;;  %v6360_v35 = vadd.f32 %v5233_v25, %v6324_v5 }
 0x3c7   : > { %v5234_v32 = vpop.f32.mrb[22].mxu0  ;;  %1226 = vmax.xlane.f32.xlu0 %v1225_v29  ;;  %1235 = vmax.xlane.f32.xlu1 %v1234_v30  ;;  %v6373_v42 = vadd.f32 %v6324_v5, %v1140_v27 }
 0x3c8   : > { %v6357_v33 = vadd.f32 %v5234_v32, %v6324_v5  ;;  %v1143_v34 = vpop.f32.mrb[23].mxu0  ;;  %v1243_v43 = vsel %vm1224_vm10, %v6360_v35, -inf }
 0x3c9   : > { %v6363_v36 = vadd.f32 %v6324_v5, %v1143_v34  ;;  %v1237_v58 = vsel %vm1224_vm10, %v6373_v42, -inf }
 0x3ca   : > { %v1246_v38 = vsel %vm1224_vm10, %v6357_v33, -inf }
 0x3cb   : > { %1229 = vmax.xlane.f32.xlu0 %v1228_v37  ;;  %1247 = vmax.xlane.f32.xlu1 %v1246_v38  ;;  %v1240_v45 = vsel %vm1224_vm10, %v6363_v36, -inf }
 0x3cd   : > { %v5277_v40 = vpop.f32.mrb[24].mxu0 }
 0x3ce   : > { %v1907_v46 = vmul.f32 0.35355338, %v5277_v40  ;;  %v1640_v47 = vpop.f32.mrb[25].mxu0 }
 0x3cf   : > { %1244 = vmax.xlane.f32.xlu0 %v1243_v43  ;;  %1241 = vmax.xlane.f32.xlu1 %v1240_v45  ;;  %v1905_v49 = vmul.f32 0.35355338, %v1640_v47  ;;  %v5278_v51 = vpop.f32.mrb[26].mxu0 }
 0x3d0   : > { %v1908_v52 = vmul.f32 0.35355338, %v5278_v51  ;;  %v1643_v53 = vpop.f32.mrb[27].mxu0 }
 0x3d1   : > { %v1906_v54 = vmul.f32 0.35355338, %v1643_v53 }
 0x3d2   : > { %v6386_v61 = vpack.c.bf16 %v1908_v52, %v1907_v46 }
 0x3d3   : > { %1238 = vmax.xlane.f32.xlu0 %v1237_v58  ;;  %1272 = vmax.xlane.f32.xlu1 %v1271_v60  ;;  %v6388_v62 = vpack.c.bf16 %v1906_v54, %v1905_v49 }
 0x3d5   : > { %v5281_v0 = vpop.f32.mrb[28].mxu0  ;;  %5331 = vmatprep.mubr.msk.bf16.mxu0 %vm1065_vm6, %v6388_v62 }
 0x3d6   : > { %v1911_v3 = vmul.f32 0.35355338, %v5281_v0  ;;  %v1656_v4 = vpop.f32.mrb[29].mxu0 }
 0x3d7   : > { %1269 = vmax.xlane.f32.xlu0 %v1268_v2  ;;  %v1909_v8 = vmul.f32 0.35355338, %v1656_v4  ;;  %v5282_v12 = vpop.f32.mrb[30].mxu0 }
 0x3d8   : > { %v1912_v13 = vmul.f32 0.35355338, %v5282_v12  ;;  %v1659_v16 = vpop.f32.mrb[31].mxu0 }
 0x3d9   : > { %v1910_v17 = vmul.f32 0.35355338, %v1659_v16 }
 0x3da   : > { %v6394_v18 = vpack.c.bf16 %v1912_v13, %v1911_v3 }
 0x3db   : > { %v6396_v19 = vpack.c.bf16 %v1910_v17, %v1909_v8 }
 0x3dd   : > { %v5289_v20 = vpop.f32.mrb[32].mxu0 }
 0x3de   : > { %v1717_v23 = vpop.f32.mrb[33].mxu0 }
 0x3df   : > { %v5290_v24 = vpop.f32.mrb[34].mxu0 }
 0x3e0   : > { %v1918_v25 = vpack.c.bf16 %v5290_v24, %v5289_v20  ;;  %v1720_v27 = vpop.f32.mrb[35].mxu0 }
 0x3e1   : > { %v1917_v29 = vpack.c.bf16 %v1720_v27, %v1717_v23 }
 0x3e2   : > { %v1937_v43 = vsel %vm1065_vm6, %v1918_v25, 0 }
 0x3e3   : > { %v1934_v30 = vsel %vm1065_vm6, %v1917_v29, 0  ;;  %5685 = vmatprep.subr.msk.bf16.mxu0 %vm1065_vm6, %v1917_v29 }
 0x3e4   : > { %5324 = vmatpush3.bf16.xpose.msra.mxu0 %v1934_v30 }
 0x3e5   : > { %5686 = vmatprep.subr.msk.bf16.mxu0 %vm1065_vm6, %v1918_v25  ;;  %v5293_v32 = vpop.f32.mrb[36].mxu0 }
 0x3e6   : > { %v1733_v34 = vpop.f32.mrb[37].mxu0 }
 0x3e7   : > { %v5294_v37 = vpop.f32.mrb[38].mxu0 }
 0x3e8   : > { %v1920_v38 = vpack.c.bf16 %v5294_v37, %v5293_v32  ;;  %v1736_v40 = vpop.f32.mrb[39].mxu0 }
 0x3e9   : > { %v1919_v45 = vpack.c.bf16 %v1736_v40, %v1733_v34 }
 0x3ea   : > { %v1943_v47 = vsel %vm1065_vm6, %v1920_v38, 0 }
 0x3eb   : > { %v1940_v46 = vsel %vm1065_vm6, %v1919_v45, 0 }
 0x3ec   : > { %5326 = vmatpush3.bf16.xpose.msra.mxu0 %v1937_v43 }
 0x3ed   : > { %5687 = vmatprep.subr.msk.bf16.mxu0 %vm1065_vm6, %v1919_v45  ;;  %v6412_v49 = vpop.f32.mrb[40].mxu0 }
 0x3ee   : > { %v5313_v51 = vpop.f32.mrb[41].mxu0 }
 0x3ef   : > { %v1862_v52 = vpop.f32.mrb[42].mxu0 }
 0x3f0   : > { %v5314_v53 = vpop.f32.mrb[43].mxu0 }
 0x3f4   : > { %5328 = vmatpush3.bf16.xpose.msra.mxu0 %v1940_v46 }
 0x3f5   : > { %5688 = vmatprep.subr.msk.bf16.mxu0 %vm1065_vm6, %v1920_v38 }
 0x3fc   : > { %5330 = vmatpush3.bf16.xpose.msra.mxu0 %v1943_v47 }
 0x403   : > { %5332 = vmatmul.mubr.msk.bf16.vlgmr.msra.gmra.mrb[44].mxu0 %vm1065_vm6, %v6386_v61 }
 0x404   : > { %5335 = vmatprep.mubr.msk.bf16.mxu0 %vm1065_vm6, %v6396_v19 }
 0x40b   : > { %5336 = vmatmul.mubr.msk.bf16.gmra.mrb[48].mxu0 %vm1065_vm6, %v6394_v18 }
 0x443   : > { %v1258_v58 = vpop.xlane.xlu0 %1257 }
 0x444   : > { %v1252_v54 = vpop.xlane.xlu1 %1251 }
 0x448   : > { %v1261_v60 = vpop.xlane.xlu1 %1260 }
 0x44c   : > { %v1264_v0 = vpop.xlane.xlu0 %1263  ;;  %v1255_v2 = vpop.xlane.xlu1 %1254 }
 0x450   : > { %v1233_v3 = vpop.xlane.xlu0 %1232  ;;  %v1267_v4 = vpop.xlane.xlu1 %1266 }
 0x451   : > { %v1276_v13 = vmax.f32 %v1233_v3, %v1258_v58 }
 0x453   : > { %v1308_v27 = vsub.f32 %v6306_v57, %v1276_v13 }
 0x454   : > { %v1227_v8 = vpop.xlane.xlu0 %1226  ;;  %v1236_v12 = vpop.xlane.xlu1 %1235 }
 0x455   : > { %v1274_v16 = vmax.f32 %v1227_v8, %v1252_v54  ;;  %v1277_v17 = vmax.f32 %v1236_v12, %v1261_v60  ;;  %v1318_v40 = vmul.f32 1.442695, %v1308_v27 }
 0x457   : > { %v1306_v20 = vsub.f32 %v6309_v59, %v1274_v16  ;;  %v1309_v23 = vsub.f32 %v6314_v63, %v1277_v17  ;;  %v1282_v58 = vsub.f32 %v6340_v21, %v1274_v16 }
 0x458   : > { %v1230_v24 = vpop.xlane.xlu0 %1229  ;;  %v1248_v25 = vpop.xlane.xlu1 %1247 }
 0x459   : > { %v1275_v29 = vmax.f32 %v1230_v24, %v1255_v2  ;;  %v1314_v30 = vmul.f32 1.442695, %v1306_v20  ;;  %v1320_v32 = vmul.f32 1.442695, %v1309_v23  ;;  %v1284_v20 = vsub.f32 %v6330_v14, %v1276_v13 }
 0x45b   : > { %v1307_v34 = vsub.f32 %v6319_v1, %v1275_v29  ;;  %5786 = vpow2.f32 %v1314_v30  ;;  %v1283_v51 = vsub.f32 %v6350_v26, %v1275_v29  ;;  %v1290_v26 = vmul.f32 1.442695, %v1282_v58 }
 0x45c   : > { %v1245_v37 = vpop.xlane.xlu0 %1244  ;;  %v1242_v38 = vpop.xlane.xlu1 %1241  ;;  %5788 = vpow2.f32 %v1320_v32 }
 0x45d   : > { %v1316_v43 = vmul.f32 1.442695, %v1307_v34  ;;  %v1279_v45 = vmax.f32 %v1242_v38, %v1267_v4  ;;  %v1292_v3 = vmul.f32 1.442695, %v1283_v51  ;;  %v5772_v38 = vld [vmem:[%s7354_s10 + $0x10] sm:$0xff]   ;;  %v2010_v51 = vpack.c.bf16 %v6412_v49, %v6412_v49 }
 0x45f   : > { %v1311_v59 = vsub.f32 %v6333_v15, %v1279_v45  ;;  %5790 = vpow2.f32 %v1316_v43  ;;  %v1287_v24 = vsub.f32 %v6363_v36, %v1279_v45 }
 0x460   : > { %v1239_v63 = vpop.xlane.xlu0 %1238  ;;  %v1273_v46 = vpop.xlane.xlu1 %1272  ;;  %5792 = vpow2.f32 %v1318_v40 }
 0x461   : > { %v1278_v47 = vmax.f32 %v1239_v63, %v1264_v0  ;;  %v1281_v57 = vmax.f32 %v1248_v25, %v1273_v46  ;;  %v1324_v52 = vmul.f32 1.442695, %v1311_v59  ;;  %v1300_v14 = vmul.f32 1.442695, %v1287_v24  ;;  %v5773_v63 = vld [vmem:[%s7354_s10 + $0x18] sm:$0xff]  }
 0x463   : > { %v1310_v1 = vsub.f32 %v6327_v7, %v1278_v47  ;;  %v1313_v53 = vsub.f32 %v6370_v39, %v1281_v57  ;;  %5794 = vpow2.f32 %v1324_v52  ;;  %v1285_v39 = vsub.f32 %v6343_v22, %v1277_v17 }
 0x464   : > { %v1270_v54 = vpop.xlane.xlu0 %1269  ;;  %v1286_v16 = vsub.f32 %v6373_v42, %v1278_v47  ;;  %v1294_v42 = vmul.f32 1.442695, %v1284_v20  ;;  %v2012_v52 = vsel %vm1065_vm6, %v2010_v51, 0 }
 0x465   : > { %v1322_v60 = vmul.f32 1.442695, %v1310_v1  ;;  %v1280_v2 = vmax.f32 %v1245_v37, %v1270_v54  ;;  %v1328_v15 = vmul.f32 1.442695, %v1313_v53  ;;  %v6424_v8 = vpop.eup %5786  ;;  %v1296_v22 = vmul.f32 1.442695, %v1285_v39 }
 0x466   : > { %v6426_v0 = vpop.eup %5788  ;;  %v1298_v17 = vmul.f32 1.442695, %v1286_v16 }
 0x467   : > { %v1312_v4 = vsub.f32 %v6380_v56, %v1280_v2  ;;  %5796 = vpow2.f32 %v1322_v60  ;;  %v1288_v27 = vsub.f32 %v6360_v35, %v1280_v2 }
 0x468   : > { %5798 = vpow2.f32 %v1292_v3 }
 0x469   : > { %v1326_v12 = vmul.f32 1.442695, %v1312_v4  ;;  %v6428_v7 = vpop.eup %5790  ;;  %5800 = vpow2.f32 %v1328_v15  ;;  %v1302_v35 = vmul.f32 1.442695, %v1288_v27 }
 0x46a   : > { %v6431_v21 = vpop.eup %5792  ;;  %v1394_v56 = vpack.c.bf16 %v6428_v7, %v6424_v8 }
 0x46b   : > { %v1395_v23 = vpack.c.bf16 %v6426_v0, %v6431_v21  ;;  %5802 = vpow2.f32 %v1326_v12 }
 0x46c   : > { %5804 = vpow2.f32 %v1290_v26  ;;  %5247 = vmatprep.mubr.msk.bf16.mxu1 %vm1249_vm9, %v1394_v56 }
 0x46d   : > { %5248 = vmatmul.mubr.msk.bf16.vlgmr.msra.gmra.mrb[24].mxu1 %vm1249_vm9, %v1395_v23  ;;  %v6444_v25 = vpop.eup %5794  ;;  %5806 = vpow2.f32 %v1296_v22 }
 0x46e   : > { %5256 = vmatpush3.bf16.msra.mxu1 %v6251_v31  ;;  %5808 = vpow2.f32 %v1298_v17  ;;  %v1289_v31 = vsub.f32 %v6357_v33, %v1281_v57 }
 0x46f   : > { %5257 = vmatprep.subr.bf16.mxu1 %v6248_v28  ;;  %5810 = vpow2.f32 %v1294_v42 }
 0x470   : > { %5812 = vpow2.f32 %v1300_v14  ;;  %v1304_v37 = vmul.f32 1.442695, %v1289_v31 }
 0x471   : > { %v6446_v13 = vpop.eup %5796  ;;  %5814 = vpow2.f32 %v1302_v35 }
 0x472   : > { %5258 = vmatpush3.bf16.msra.mxu1 %v6248_v28  ;;  %v1396_v36 = vpack.c.bf16 %v6444_v25, %v6446_v13  ;;  %v6452_v29 = vpop.eup %5798  ;;  %5816 = vpow2.f32 %v1304_v37 }
 0x473   : > { %5259 = vmatprep.subr.bf16.mxu1 %v6300_v50  ;;  %v6456_v30 = vpop.eup %5800 }
 0x474   : > { %5251 = vmatprep.mubr.msk.bf16.mxu1 %vm1249_vm9, %v1396_v36 }
 0x475   : > { %v6459_v32 = vpop.eup %5802 }
 0x476   : > { %v6461_v34 = vpop.eup %5804  ;;  %5260 = vmatpush3.bf16.msra.mxu1 %v6300_v50  ;;  %v1397_v28 = vpack.c.bf16 %v6456_v30, %v6459_v32 }
 0x477   : > { %5261 = vmatprep.subr.bf16.mxu1 %v6298_v48  ;;  %v1386_v33 = vpack.c.bf16 %v6452_v29, %v6461_v34  ;;  %v6475_v50 = vpop.eup %5806 }
 0x478   : > { %5252 = vmatmul.mubr.msk.bf16.gmra.mrb[28].mxu1 %vm1249_vm9, %v1397_v28  ;;  %v6477_v40 = vpop.eup %5808 }
 0x479   : > { %5263 = vmatprep.mubr.msk.bf16.mxu1 %vm1224_vm10, %v1386_v33  ;;  %v6479_v43 = vpop.eup %5810 }
 0x47a   : > { %5262 = vmatpush3.bf16.msra.mxu1 %v6298_v48  ;;  %v6481_v45 = vpop.eup %5812  ;;  %v1387_v59 = vpack.c.bf16 %v6475_v50, %v6479_v43 }
 0x47b   : > { %5295 = vmatprep.subr.bf16.mxu1 %v5772_v38  ;;  %v1388_v48 = vpack.c.bf16 %v6481_v45, %v6477_v40  ;;  %v6492_v46 = vpop.eup %5814 }
 0x47c   : > { %v6494_v47 = vpop.eup %5816 }
 0x47d   : > { %v1389_v57 = vpack.c.bf16 %v6494_v47, %v6492_v46 }
 0x480   : > { %5264 = vmatmul.mubr.msk.bf16.vlgmr.msra.gmra.mrb[24].mxu1 %vm1224_vm10, %v1387_v59 }
 0x481   : > { %5267 = vmatprep.mubr.msk.bf16.mxu1 %vm1224_vm10, %v1388_v48  ;;  %5296 = vmatpush3.bf16.msra.mxu1 %v5772_v38 }
 0x482   : > { %5297 = vmatprep.subr.bf16.mxu1 %v5773_v63 }
 0x485   : > { %5298 = vmatpush3.bf16.msra.mxu1 %v5773_v63 }
 0x486   : > { %5315 = vmatprep.subr.bf16.mxu1 %v7361_v41 }
 0x488   : > { %5268 = vmatmul.mubr.msk.bf16.gmra.mrb[28].mxu1 %vm1224_vm10, %v1389_v57 }
 0x489   : > { %5299 = vmatprep.mubr.msk.bf16.mxu1 %vm728_vm4, %v6140_v6 }
 0x490   : > { %5300 = vmatmul.mubr.msk.bf16.vlgmr.msra.gmra.mrb[32].mxu1 %vm728_vm4, %v6147_v9 }
 0x491   : > { %5316 = vmatpush3.bf16.msra.mxu1 %v5772_v38  ;;  %5303 = vmatprep.mubr.msk.bf16.mxu1 %vm728_vm4, %v6149_v10 }
 0x492   : > { %5317 = vmatprep.subr.bf16.mxu1 %v7361_v41 }
 0x495   : > { %5318 = vmatpush3.bf16.msra.mxu1 %v5773_v63 }
 0x496   : > { %5689 = vmatprep.subr.msk.bf16.mxu1 %vm1065_vm6, %v2010_v51 }
 0x498   : > { %5304 = vmatmul.mubr.msk.bf16.gmra.mrb[36].mxu1 %vm728_vm4, %v6151_v11 }
 0x499   : > { %5319 = vmatprep.mubr.msk.bf16.mxu1 %vm6022_vm5, %v7361_v41 }
 0x4a0   : > { %5320 = vmatmul.mubr.msk.bf16.vlgmr.msra.gmra.mrb[40].mxu1 %vm728_vm4, %v6224_v44 }
 0x4a1   : > { %5340 = vmatpush3.bf16.xpose.msra.mxu1 %v2012_v52  ;;  %5341 = vmatprep.mubr.msk.bf16.mxu1 %vm1065_vm6, %v6388_v62 }
 0x4a8   : > { %5342 = vmatmul.mubr.msk.bf16.vlgmr.msra.gmra.mrb[44].mxu1 %vm1065_vm6, %v6386_v61 }
 0x4a9   : > { %5345 = vmatprep.mubr.msk.bf16.mxu1 %vm1065_vm6, %v6396_v19 }
 0x4b0   : > { %5346 = vmatmul.mubr.msk.bf16.gmra.mrb[48].mxu1 %vm1065_vm6, %v6394_v18 }
 0x4d6   : > { %v5333_v49 = vpop.f32.mrb[44].mxu0 }
 0x4d7   : > { %v6526_v1 = vadd.f32 %v5333_v49, %v6324_v5  ;;  %v1979_v53 = vpop.f32.mrb[45].mxu0 }
 0x4d8   : > { %v6529_v54 = vadd.f32 %v6324_v5, %v1979_v53  ;;  %v5334_v58 = vpop.f32.mrb[46].mxu0 }
 0x4d9   : > { %v6532_v62 = vadd.f32 %v5334_v58, %v6324_v5  ;;  %v1982_v60 = vpop.f32.mrb[47].mxu0  ;;  %v2085_v61 = vsel %vm1224_vm10, %v6526_v1, -inf }
 0x4da   : > { %v6537_v19 = vadd.f32 %v6324_v5, %v1982_v60  ;;  %2086 = vmax.xlane.f32.xlu0 %v2085_v61  ;;  %v2079_v2 = vsel %vm1224_vm10, %v6529_v54, -inf }
 0x4db   : > { %v2088_v18 = vsel %vm1224_vm10, %v6532_v62, -inf }
 0x4dc   : > { %2089 = vmax.xlane.f32.xlu1 %v2088_v18  ;;  %v2082_v3 = vsel %vm1224_vm10, %v6537_v19, -inf }
 0x4de   : > { %2080 = vmax.xlane.f32.xlu0 %v2079_v2  ;;  %v5337_v15 = vpop.f32.mrb[48].mxu0 }
 0x4df   : > { %v1995_v4 = vpop.f32.mrb[49].mxu0 }
 0x4e0   : > { %2083 = vmax.xlane.f32.xlu1 %v2082_v3  ;;  %v6546_v26 = vadd.f32 %v6324_v5, %v1995_v4  ;;  %v5338_v12 = vpop.f32.mrb[50].mxu0 }
 0x4e1   : > { %v1998_v39 = vpop.f32.mrb[51].mxu0 }
 0x4e2   : > { %v6549_v16 = vadd.f32 %v6324_v5, %v1998_v39  ;;  %v2091_v56 = vsel %vm1224_vm10, %v6546_v26, -inf }
 0x4e3   : > { %2092 = vmax.xlane.f32.xlu0 %v2091_v56 }
 0x4e4   : > { %v2094_v20 = vsel %vm1224_vm10, %v6549_v16, -inf }
 0x4e5   : > { %2095 = vmax.xlane.f32.xlu1 %v2094_v20 }
 0x553   : > { %v6555_v23 = vpop.f32.mrb[24].mxu1 }
 0x554   : > { %v6557_v24 = vpop.f32.mrb[25].mxu1 }
 0x555   : > { %v6559_v22 = vpop.f32.mrb[26].mxu1 }
 0x556   : > { %v6561_v17 = vpop.f32.mrb[27].mxu1 }
 0x55b   : > { %v6563_v42 = vpop.f32.mrb[28].mxu1 }
 0x55c   : > { %v6565_v14 = vpop.f32.mrb[29].mxu1 }
 0x55d   : > { %v6567_v27 = vpop.f32.mrb[30].mxu1 }
 0x55e   : > { %7371 = vst [vmem:[#allocation10_spill] sm:$0xff] %v6567_v27  ;;  %v6569_v36 = vpop.f32.mrb[31].mxu1 }
 0x563   : > { %v5301_v31 = vpop.f32.mrb[32].mxu1 }
 0x564   : > { %v1794_v35 = vpop.f32.mrb[33].mxu1 }
 0x565   : > { %v5302_v28 = vpop.f32.mrb[34].mxu1 }
 0x566   : > { %v6571_v37 = vpack.c.bf16 %v5302_v28, %v5301_v31  ;;  %v1797_v33 = vpop.f32.mrb[35].mxu1 }
 0x567   : > { %v6573_v38 = vpack.c.bf16 %v1797_v33, %v1794_v35 }
 0x56b   : > { %v5305_v59 = vpop.f32.mrb[36].mxu1 }
 0x56c   : > { %v1810_v63 = vpop.f32.mrb[37].mxu1 }
 0x56d   : > { %v5306_v48 = vpop.f32.mrb[38].mxu1 }
 0x56e   : > { %v6575_v57 = vpack.c.bf16 %v5306_v48, %v5305_v59  ;;  %v1813_v51 = vpop.f32.mrb[39].mxu1  ;;  %v6599_v59 = vadd.f32 %v5337_v15, %v6324_v5 }
 0x56f   : > { %v6577_v52 = vpack.c.bf16 %v1813_v51, %v1810_v63  ;;  %v6604_v51 = vadd.f32 %v5338_v12, %v6324_v5 }
 0x570   : > { %v2097_v15 = vsel %vm1224_vm10, %v6599_v59, -inf }
 0x571   : > { %v2100_v5 = vsel %vm1224_vm10, %v6604_v51, -inf }
 0x573   : > { %v1899_v49 = vpop.f32.mrb[40].mxu1 }
 0x574   : > { %v2251_v53 = vpack.c.bf16 %v1899_v49, %v1899_v49  ;;  %v5321_v58 = vpop.f32.mrb[41].mxu1 }
 0x575   : > { %v1902_v60 = vpop.f32.mrb[42].mxu1 }
 0x576   : > { %v2265_v61 = vsel %vm1411_vm7, %v2251_v53, 0  ;;  %v5322_v18 = vpop.f32.mrb[43].mxu1  ;;  %5690 = vmatprep.subr.msk.bf16.mxu1 %vm1411_vm7, %v2251_v53 }
 0x577   : > { %5350 = vmatpush3.bf16.msra.mxu1 %v2265_v61 }
 0x578   : > { %5359 = vmatprep.subr.bf16.mxu1 %v6573_v38 }
 0x57b   : > { %v5343_v2 = vpop.f32.mrb[44].mxu1 }
 0x57c   : > { %v6583_v3 = vadd.f32 %v5343_v2, %v6303_v55  ;;  %v2048_v4 = vpop.f32.mrb[45].mxu1 }
 0x57d   : > { %v5344_v39 = vpop.f32.mrb[46].mxu1  ;;  %v6586_v56 = vadd.f32 %v2048_v4, %v6303_v55 }
 0x57e   : > { %v6589_v20 = vadd.f32 %v5344_v39, %v6303_v55  ;;  %v2051_v31 = vpop.f32.mrb[47].mxu1  ;;  %v2109_v35 = vsel %vm1249_vm9, %v6583_v3, -inf }
 0x57f   : > { %2110 = vmax.xlane.f32.xlu0 %v2109_v35  ;;  %v6594_v28 = vadd.f32 %v2051_v31, %v6303_v55  ;;  %v2103_v63 = vsel %vm1249_vm9, %v6586_v56, -inf }
 0x580   : > { %v2112_v33 = vsel %vm1249_vm9, %v6589_v20, -inf }
 0x581   : > { %2113 = vmax.xlane.f32.xlu1 %v2112_v33  ;;  %v2106_v53 = vsel %vm1249_vm9, %v6594_v28, -inf  ;;  %v1330_v33 = vsel %vm1224_vm10, %v6461_v34, 0.0  ;;  %v1339_v34 = vsel %vm1224_vm10, %v6475_v50, 0.0 }
 0x583   : > { %v5347_v48 = vpop.f32.mrb[48].mxu1  ;;  %2104 = vmax.xlane.f32.xlu0 %v2103_v63  ;;  %v1333_v63 = vsel %vm1224_vm10, %v6452_v29, 0.0 }
 0x584   : > { %v2064_v49 = vpop.f32.mrb[49].mxu1  ;;  %v6619_v12 = vadd.f32 %v5347_v48, %v6303_v55  ;;  %v1354_v48 = vsel %vm1249_vm9, %v6424_v8, 0.0 }
 0x585   : > { %v5348_v58 = vpop.f32.mrb[50].mxu1  ;;  %2107 = vmax.xlane.f32.xlu1 %v2106_v53  ;;  %v6609_v60 = vadd.f32 %v2064_v49, %v6303_v55  ;;  %v1357_v49 = vsel %vm1249_vm9, %v6428_v7, 0.0  ;;  %v1336_v53 = vsel %vm1224_vm10, %v6479_v43, 0.0 }
 0x586   : > { %v2067_v61 = vpop.f32.mrb[51].mxu1  ;;  %v6624_v4 = vadd.f32 %v5348_v58, %v6303_v55  ;;  %v2121_v31 = vsel %vm1249_vm9, %v6619_v12, -inf  ;;  %v2087_v58 = vpop.xlane.xlu0 %2086 }
 0x587   : > { %2098 = vmax.xlane.f32.xlu0 %v2097_v15  ;;  %v6614_v18 = vadd.f32 %v2067_v61, %v6303_v55  ;;  %v2115_v2 = vsel %vm1249_vm9, %v6609_v60, -inf  ;;  %v2090_v61 = vpop.xlane.xlu1 %2089 }
 0x588   : > { %v2124_v35 = vsel %vm1249_vm9, %v6624_v4, -inf }
 0x589   : > { %2101 = vmax.xlane.f32.xlu1 %v2100_v5  ;;  %v2118_v39 = vsel %vm1249_vm9, %v6614_v18, -inf }
 0x58a   : > { %v2081_v29 = vpop.xlane.xlu0 %2080 }
 0x58b   : > { %2116 = vmax.xlane.f32.xlu0 %v2115_v2  ;;  %v2084_v15 = vpop.xlane.xlu1 %2083 }
 0x58d   : > { %2119 = vmax.xlane.f32.xlu1 %v2118_v39 }
 0x58e   : > { %v2093_v5 = vpop.xlane.xlu0 %2092 }
 0x58f   : > { %2122 = vmax.xlane.f32.xlu0 %v2121_v31  ;;  %v2096_v2 = vpop.xlane.xlu1 %2095 }
 0x591   : > { %2125 = vmax.xlane.f32.xlu1 %v2124_v35 }
 0x593   : > { %1331 = vadd.xlane.f32.xlu0 %v1330_v33 }
 0x595   : > { %1334 = vadd.xlane.f32.xlu1 %v1333_v63 }
 0x597   : > { %1355 = vadd.xlane.f32.xlu0 %v1354_v48 }
 0x599   : > { %1358 = vadd.xlane.f32.xlu1 %v1357_v49 }
 0x59b   : > { %1337 = vadd.xlane.f32.xlu0 %v1336_v53 }
 0x59d   : > { %1340 = vadd.xlane.f32.xlu1 %v1339_v34 }
 0x60c   : > { %v2111_v8 = vpop.xlane.xlu0 %2110 }
 0x60d   : > { %v2129_v39 = vmax.f32 %v2087_v58, %v2111_v8 }
 0x60e   : > { %v2114_v31 = vpop.xlane.xlu1 %2113 }
 0x60f   : > { %v2137_v7 = vsub.f32 %v6526_v1, %v2129_v39  ;;  %v2161_v35 = vsub.f32 %v6583_v3, %v2129_v39  ;;  %v2130_v33 = vmax.f32 %v2090_v61, %v2114_v31 }
 0x610   : > { %v2105_v43 = vpop.xlane.xlu0 %2104 }
 0x611   : > { %v2147_v63 = vmul.f32 1.442695, %v2137_v7  ;;  %v2138_v48 = vsub.f32 %v6532_v62, %v2130_v33  ;;  %v2162_v50 = vsub.f32 %v6589_v20, %v2130_v33  ;;  %v2171_v49 = vmul.f32 1.442695, %v2161_v35 }
 0x612   : > { %v2127_v53 = vmax.f32 %v2081_v29, %v2105_v43  ;;  %v2108_v34 = vpop.xlane.xlu1 %2107 }
 0x613   : > { %5818 = vpow2.f32 %v2147_v63  ;;  %v2149_v41 = vmul.f32 1.442695, %v2138_v48  ;;  %v2128_v55 = vmax.f32 %v2084_v15, %v2108_v34  ;;  %v2173_v27 = vmul.f32 1.442695, %v2162_v50 }
 0x614   : > { %v2135_v58 = vsub.f32 %v6529_v54, %v2127_v53  ;;  %v2159_v1 = vsub.f32 %v6586_v56, %v2127_v53  ;;  %v2099_v8 = vpop.xlane.xlu0 %2098 }
 0x615   : > { %5820 = vpow2.f32 %v2149_v41  ;;  %v2136_v3 = vsub.f32 %v6537_v19, %v2128_v55  ;;  %v2160_v61 = vsub.f32 %v6594_v28, %v2128_v55 }
 0x616   : > { %5822 = vpow2.f32 %v2171_v49  ;;  %v2143_v62 = vmul.f32 1.442695, %v2135_v58  ;;  %v2167_v20 = vmul.f32 1.442695, %v2159_v1  ;;  %v2102_v39 = vpop.xlane.xlu1 %2101 }
 0x617   : > { %v2169_v29 = vmul.f32 1.442695, %v2160_v61  ;;  %5824 = vpow2.f32 %v2173_v27  ;;  %v2145_v15 = vmul.f32 1.442695, %v2136_v3 }
 0x618   : > { %v2117_v31 = vpop.xlane.xlu0 %2116  ;;  %5826 = vpow2.f32 %v2143_v62 }
 0x619   : > { %v2131_v7 = vmax.f32 %v2093_v5, %v2117_v31  ;;  %5828 = vpow2.f32 %v2167_v20 }
 0x61a   : > { %v2120_v54 = vpop.xlane.xlu1 %2119  ;;  %5830 = vpow2.f32 %v2169_v29 }
 0x61b   : > { %v2163_v56 = vsub.f32 %v6609_v60, %v2131_v7  ;;  %v2132_v41 = vmax.f32 %v2096_v2, %v2120_v54  ;;  %5832 = vpow2.f32 %v2145_v15  ;;  %v2139_v53 = vsub.f32 %v6546_v26, %v2131_v7 }
 0x61c   : > { %v2123_v35 = vpop.xlane.xlu0 %2122 }
 0x61d   : > { %v6653_v19 = vpop.eup %5818  ;;  %v2175_v55 = vmul.f32 1.442695, %v2163_v56  ;;  %v2164_v28 = vsub.f32 %v6614_v18, %v2132_v41  ;;  %v2133_v33 = vmax.f32 %v2099_v8, %v2123_v35  ;;  %v2151_v31 = vmul.f32 1.442695, %v2139_v53 }
 0x61e   : > { %v2126_v43 = vpop.xlane.xlu1 %2125  ;;  %v2189_v27 = vsel %vm1224_vm10, %v6653_v19, 0.0 }
 0x61f   : > { %v6658_v63 = vpop.eup %5820  ;;  %v2177_v5 = vmul.f32 1.442695, %v2164_v28  ;;  %v2134_v48 = vmax.f32 %v2102_v39, %v2126_v43  ;;  %2190 = vadd.xlane.f32.xlu0 %v2189_v27  ;;  %v2141_v60 = vsub.f32 %v6599_v59, %v2133_v33  ;;  %v2165_v2 = vsub.f32 %v6619_v12, %v2133_v33 }
 0x620   : > { %v5823_v50 = vpop.eup %5822  ;;  %v1332_v49 = vpop.xlane.xlu0 %1331  ;;  %5834 = vpow2.f32 %v2175_v55  ;;  %v2192_v3 = vsel %vm1224_vm10, %v6658_v63, 0.0  ;;  %v2140_v39 = vsub.f32 %v6549_v16, %v2132_v41 }
 0x621   : > { %v2142_v18 = vsub.f32 %v6604_v51, %v2134_v48  ;;  %v2166_v34 = vsub.f32 %v6624_v4, %v2134_v48  ;;  %v5825_v58 = vpop.eup %5824  ;;  %5836 = vpow2.f32 %v2177_v5  ;;  %v2155_v1 = vmul.f32 1.442695, %v2141_v60  ;;  %2193 = vadd.xlane.f32.xlu1 %v2192_v3 }
 0x622   : > { %v2179_v8 = vmul.f32 1.442695, %v2165_v2  ;;  %v1335_v61 = vpop.xlane.xlu1 %1334  ;;  %v6667_v62 = vpop.eup %5826  ;;  %v2213_v26 = vsel %vm1249_vm9, %v5823_v50, 0.0  ;;  %v2216_v15 = vsel %vm1249_vm9, %v5825_v58, 0.0  ;;  %v2248_v35 = vpack.c.bf16 %v5825_v58, %v5823_v50 }
 0x623   : > { %v2157_v59 = vmul.f32 1.442695, %v2142_v18  ;;  %v2181_v12 = vmul.f32 1.442695, %v2166_v34  ;;  %v5829_v20 = vpop.eup %5828  ;;  %5838 = vpow2.f32 %v2155_v1  ;;  %2214 = vadd.xlane.f32.xlu0 %v2213_v26  ;;  %v2183_v28 = vsel %vm1224_vm10, %v6667_v62, 0.0 }
 0x624   : > { %v1356_v51 = vpop.xlane.xlu0 %1355  ;;  %v5831_v4 = vpop.eup %5830  ;;  %5840 = vpow2.f32 %v2179_v8  ;;  %v2153_v16 = vmul.f32 1.442695, %v2140_v39  ;;  %v2207_v43 = vsel %vm1249_vm9, %v5829_v20, 0.0  ;;  %v5774_v8 = vld [vmem:[%s7352_s8 + $0x20] sm:$0xff]   ;;  %v1363_v39 = vsel %vm1249_vm9, %v6426_v0, 0.0 }
 0x625   : > { %v1378_v29 = vadd.f32 %v1356_v51, %v1332_v49  ;;  %5842 = vpow2.f32 %v2157_v59  ;;  %v2247_v7 = vpack.c.bf16 %v5831_v4, %v5829_v20  ;;  %v5833_v56 = vpop.eup %5832  ;;  %2217 = vadd.xlane.f32.xlu1 %v2216_v15  ;;  %v2210_v50 = vsel %vm1249_vm9, %v5831_v4, 0.0 }
 0x626   : > { %v1359_v54 = vpop.xlane.xlu1 %1358  ;;  %5844 = vpow2.f32 %v2181_v12  ;;  %v2186_v41 = vsel %vm1224_vm10, %v5833_v56, 0.0  ;;  %v2239_v1 = vpack.c.bf16 %v5833_v56, %v6667_v62  ;;  %v1366_v15 = vsel %vm1249_vm9, %v6446_v13, 0.0 }
 0x627   : > { %v1379_v55 = vadd.f32 %v1359_v54, %v1335_v61  ;;  %5846 = vrcp.f32 %v1378_v29  ;;  %5351 = vmatprep.mubr.msk.bf16.mxu1 %vm1249_vm9, %v2247_v7  ;;  %2184 = vadd.xlane.f32.xlu0 %v2183_v28  ;;  %v1369_v0 = vsel %vm1249_vm9, %v6444_v25, 0.0  ;;  %v1348_v7 = vsel %vm1224_vm10, %v6492_v46, 0.0 }
 0x628   : > { %5352 = vmatmul.mubr.msk.bf16.vlgmr.msra.gmra.mrb[52].mxu1 %vm1249_vm9, %v2248_v35  ;;  %v1351_v13 = vsel %vm1224_vm10, %v6494_v47, 0.0  ;;  %v1372_v25 = vsel %vm1249_vm9, %v6459_v32, 0.0  ;;  %v7372_v46 = vmov 0.0   ;;  %v6773_v47 = vld [vmem:[%s7355_s11] sm:$0xf]  ;;  %v1338_v54 = vpop.xlane.xlu0 %1337 }
 0x629   : > { %5848 = vrcp.f32 %v1379_v55  ;;  %5360 = vmatpush3.bf16.msra.mxu1 %v6573_v38  ;;  %2187 = vadd.xlane.f32.xlu1 %v2186_v41 }
 0x62a   : > { %5850 = vpow2.f32 %v2151_v31  ;;  %v5835_v33 = vpop.eup %5834  ;;  %5361 = vmatprep.subr.bf16.mxu1 %v6571_v37  ;;  %v1342_v31 = vsel %vm1224_vm10, %v6477_v40, 0.0  ;;  %v5777_v40 = vld [vmem:[%s7353_s9 + $0x28] sm:$0xff]   ;;  %v1341_v56 = vpop.xlane.xlu1 %1340 }
 0x62b   : > { %v5837_v27 = vpop.eup %5836  ;;  %2208 = vadd.xlane.f32.xlu0 %v2207_v43  ;;  %5852 = vpow2.f32 %v2153_v16  ;;  %v2219_v20 = vsel %vm1249_vm9, %v5835_v33, 0.0 }
 0x62c   : > { %v2249_v5 = vpack.c.bf16 %v5837_v27, %v5835_v33  ;;  %v2222_v4 = vsel %vm1249_vm9, %v5837_v27, 0.0 }
 0x62d   : > { %v5839_v48 = vpop.eup %5838  ;;  %5362 = vmatpush3.bf16.msra.mxu1 %v6571_v37  ;;  %2211 = vadd.xlane.f32.xlu1 %v2210_v50 }
 0x62e   : > { %v5841_v60 = vpop.eup %5840  ;;  %5363 = vmatprep.subr.bf16.mxu1 %v6577_v52  ;;  %v2201_v38 = vsel %vm1224_vm10, %v5839_v48, 0.0  ;;  %5355 = vmatprep.mubr.msk.bf16.mxu1 %vm1249_vm9, %v2249_v5 }
 0x62f   : > { %v5843_v2 = vpop.eup %5842  ;;  %2202 = vadd.xlane.f32.xlu0 %v2201_v38  ;;  %v2225_v58 = vsel %vm1249_vm9, %v5841_v60, 0.0 }
 0x630   : > { %v5845_v49 = vpop.eup %5844  ;;  %v2204_v53 = vsel %vm1224_vm10, %v5843_v2, 0.0  ;;  %v2242_v29 = vpack.c.bf16 %v5843_v2, %v5839_v48 }
 0x631   : > { %v5847_v18 = vpop.eup %5846  ;;  %5364 = vmatpush3.bf16.msra.mxu1 %v6577_v52  ;;  %v2250_v34 = vpack.c.bf16 %v5845_v49, %v5841_v60  ;;  %2205 = vadd.xlane.f32.xlu1 %v2204_v53  ;;  %v2228_v62 = vsel %vm1249_vm9, %v5845_v49, 0.0 }
 0x632   : > { %5365 = vmatprep.subr.bf16.mxu1 %v6575_v57  ;;  %v6695_v61 = vmul.f32 %v5847_v18, %v6557_v24  ;;  %v2240_v24 = vpack.c.bf16 %v6658_v63, %v6653_v19  ;;  %v5776_v19 = vld [vmem:[%s7353_s9 + $0x20] sm:$0xff]   ;;  %v1360_v63 = vsel %vm1249_vm9, %v6431_v21, 0.0  ;;  %v1345_v21 = vsel %vm1224_vm10, %v6481_v45, 0.0 }
 0x633   : > { %v5849_v37 = vpop.eup %5848  ;;  %5356 = vmatmul.mubr.msk.bf16.gmra.mrb[56].mxu1 %vm1249_vm9, %v2250_v34  ;;  %2226 = vadd.xlane.f32.xlu0 %v2225_v58  ;;  %v1375_v45 = vsel %vm1249_vm9, %v6456_v30, 0.0  ;;  %v4771_v30 = vld [vmem:[%s7355_s11 + $0x4] sm:$0xf] }
 0x634   : > { %v5851_v3 = vpop.eup %5850  ;;  %v6698_v52 = vmul.f32 %v5849_v37, %v6561_v17  ;;  %5367 = vmatprep.mubr.msk.bf16.mxu1 %vm1224_vm10, %v2239_v1  ;;  %5691 = vmatprep.subr.msk.bf16.mxu0 %vm2441_vm11, %v4771_v30  ;;  %v2443_v32 = vsel %vm2441_vm11, %v4771_v30, 0 }
 0x635   : > { %5366 = vmatpush3.bf16.msra.mxu1 %v6575_v57  ;;  %v5853_v12 = vpop.eup %5852  ;;  %2229 = vadd.xlane.f32.xlu1 %v2228_v62  ;;  %v2195_v26 = vsel %vm1224_vm10, %v5851_v3, 0.0  ;;  %v5775_v57 = vld [vmem:[%s7352_s8 + $0x28] sm:$0xff]  }
 0x636   : > { %v1573_v59 = vpack.c.bf16 %v6698_v52, %v6695_v61  ;;  %5395 = vmatprep.subr.bf16.mxu1 %v5774_v8  ;;  %v2198_v17 = vsel %vm1224_vm10, %v5853_v12, 0.0  ;;  %v2241_v51 = vpack.c.bf16 %v5853_v12, %v5851_v3  ;;  %5376 = vmatpush3.bf16.msra.mxu0 %v2443_v32 }
 0x637   : > { %2196 = vadd.xlane.f32.xlu0 %v2195_v26  ;;  %5692 = vmatprep.subr.msk.bf16.mxu0 %vm2441_vm11, %v6773_v47 }
 0x639   : > { %2199 = vadd.xlane.f32.xlu1 %v2198_v17 }
 0x63b   : > { %5368 = vmatmul.mubr.msk.bf16.vlgmr.msra.gmra.mrb[52].mxu1 %vm1224_vm10, %v2240_v24  ;;  %2220 = vadd.xlane.f32.xlu0 %v2219_v20 }
 0x63c   : > { %5371 = vmatprep.mubr.msk.bf16.mxu1 %vm1224_vm10, %v2241_v51  ;;  %5396 = vmatpush3.bf16.msra.mxu1 %v5774_v8 }
 0x63d   : > { %5397 = vmatprep.subr.bf16.mxu1 %v5775_v57  ;;  %2223 = vadd.xlane.f32.xlu1 %v2222_v4 }
 0x63f   : > { %1361 = vadd.xlane.f32.xlu0 %v1360_v63 }
 0x640   : > { %5398 = vmatpush3.bf16.msra.mxu1 %v5775_v57 }
 0x641   : > { %5407 = vmatprep.subr.bf16.mxu1 %v5776_v19  ;;  %1364 = vadd.xlane.f32.xlu1 %v1363_v39 }
 0x643   : > { %5372 = vmatmul.mubr.msk.bf16.gmra.mrb[56].mxu1 %vm1224_vm10, %v2242_v29  ;;  %1343 = vadd.xlane.f32.xlu0 %v1342_v31 }
 0x644   : > { %5399 = vmatprep.mubr.msk.bf16.mxu1 %vm728_vm4, %v6140_v6 }
 0x645   : > { %1346 = vadd.xlane.f32.xlu1 %v1345_v21 }
 0x647   : > { %1367 = vadd.xlane.f32.xlu0 %v1366_v15 }
 0x649   : > { %1370 = vadd.xlane.f32.xlu1 %v1369_v0 }
 0x64b   : > { %5400 = vmatmul.mubr.msk.bf16.vlgmr.msra.gmra.mrb[60].mxu1 %vm728_vm4, %v6147_v9  ;;  %1349 = vadd.xlane.f32.xlu0 %v1348_v7 }
 0x64c   : > { %5408 = vmatpush3.bf16.msra.mxu1 %v5776_v19  ;;  %5403 = vmatprep.mubr.msk.bf16.mxu1 %vm728_vm4, %v6149_v10 }
 0x64d   : > { %5409 = vmatprep.subr.bf16.mxu1 %v5777_v40  ;;  %1352 = vadd.xlane.f32.xlu1 %v1351_v13 }
 0x64f   : > { %1373 = vadd.xlane.f32.xlu0 %v1372_v25  ;;  %v7373_v25 = vld [vmem:[#allocation10_spill] sm:$0xff] }
 0x650   : > { %5410 = vmatpush3.bf16.msra.mxu1 %v5777_v40 }
 0x651   : > { %5431 = vmatprep.subr.bf16.mxu1 %v7372_v46  ;;  %1376 = vadd.xlane.f32.xlu1 %v1375_v45 }
 0x653   : > { %5404 = vmatmul.mubr.msk.bf16.gmra.mrb[64].mxu1 %vm728_vm4, %v6151_v11 }
 0x654   : > { %5411 = vmatprep.mubr.msk.bf16.mxu1 %vm728_vm4, %v6140_v6 }
 0x65b   : > { %5412 = vmatmul.mubr.msk.bf16.vlgmr.msra.gmra.mrb[68].mxu1 %vm728_vm4, %v6147_v9 }
 0x65c   : > { %5432 = vmatpush3.bf16.msra.mxu1 %v5776_v19  ;;  %5415 = vmatprep.mubr.msk.bf16.mxu1 %vm728_vm4, %v6149_v10 }
 0x65d   : > { %5433 = vmatprep.subr.bf16.mxu1 %v7372_v46 }
 0x660   : > { %5434 = vmatpush3.bf16.msra.mxu1 %v5777_v40 }
 0x663   : > { %5416 = vmatmul.mubr.msk.bf16.gmra.mrb[72].mxu1 %vm728_vm4, %v6151_v11 }
 0x664   : > { %5435 = vmatprep.mubr.msk.bf16.mxu1 %vm6022_vm5, %v7372_v46 }
 0x66b   : > { %5436 = vmatmul.mubr.msk.bf16.vlgmr.msra.gmra.mrb[76].mxu1 %vm728_vm4, %v6224_v44 }
 0x6ac   : > { %v2191_v35 = vpop.xlane.xlu0 %2190 }
 0x6ae   : > { %v2194_v55 = vpop.xlane.xlu1 %2193 }
 0x6b0   : > { %v2215_v28 = vpop.xlane.xlu0 %2214 }
 0x6b1   : > { %v2233_v32 = vadd.f32 %v2215_v28, %v2191_v35 }
 0x6b2   : > { %v2218_v16 = vpop.xlane.xlu1 %2217 }
 0x6b4   : > { %v2185_v41 = vpop.xlane.xlu0 %2184 }
 0x6b6   : > { %v2188_v33 = vpop.xlane.xlu1 %2187 }
 0x6b8   : > { %v2209_v43 = vpop.xlane.xlu0 %2208 }
 0x6ba   : > { %v2212_v27 = vpop.xlane.xlu1 %2211 }
 0x6bc   : > { %v2203_v5 = vpop.xlane.xlu0 %2202 }
 0x6be   : > { %v2206_v48 = vpop.xlane.xlu1 %2205 }
 0x6c0   : > { %v2227_v50 = vpop.xlane.xlu0 %2226 }
 0x6c2   : > { %v2230_v60 = vpop.xlane.xlu1 %2229 }
 0x6c4   : > { %v2197_v38 = vpop.xlane.xlu0 %2196 }
 0x6c6   : > { %v2200_v2 = vpop.xlane.xlu1 %2199 }
 0x6c8   : > { %v2221_v49 = vpop.xlane.xlu0 %2220 }
 0x6ca   : > { %v2224_v53 = vpop.xlane.xlu1 %2223 }
 0x6cc   : > { %v1362_v18 = vpop.xlane.xlu0 %1361 }
 0x6cd   : > { %v1380_v34 = vadd.f32 %v1362_v18, %v1338_v54  ;;  %v2231_v54 = vadd.f32 %v2209_v43, %v2185_v41  ;;  %v2238_v18 = vadd.f32 %v2230_v60, %v2206_v48  ;;  %v6806_v60 = vld [vmem:[%s7354_s10 + $0x20] sm:$0xff]  }
 0x6ce   : > { %v1365_v37 = vpop.xlane.xlu1 %1364 }
 0x6cf   : > { %5854 = vrcp.f32 %v1380_v34  ;;  %v1381_v58 = vadd.f32 %v1365_v37, %v1341_v56  ;;  %v2232_v56 = vadd.f32 %v2212_v27, %v2188_v33  ;;  %v2235_v34 = vadd.f32 %v2221_v49, %v2197_v38 }
 0x6d0   : > { %v1344_v1 = vpop.xlane.xlu0 %1343  ;;  %v2236_v37 = vadd.f32 %v2224_v53, %v2200_v2 }
 0x6d1   : > { %5856 = vrcp.f32 %v1381_v58 }
 0x6d2   : > { %v1347_v8 = vpop.xlane.xlu1 %1346 }
 0x6d4   : > { %v1368_v3 = vpop.xlane.xlu0 %1367 }
 0x6d5   : > { %v1382_v62 = vadd.f32 %v1368_v3, %v1344_v1 }
 0x6d6   : > { %v1371_v12 = vpop.xlane.xlu1 %1370 }
 0x6d7   : > { %5858 = vrcp.f32 %v1382_v62  ;;  %v1383_v26 = vadd.f32 %v1371_v12, %v1347_v8 }
 0x6d8   : > { %v1350_v24 = vpop.xlane.xlu0 %1349 }
 0x6d9   : > { %v5855_v17 = vpop.eup %5854  ;;  %5860 = vrcp.f32 %v1383_v26 }
 0x6da   : > { %v1353_v57 = vpop.xlane.xlu1 %1352  ;;  %v6778_v4 = vmul.f32 %v5855_v17, %v6555_v23 }
 0x6db   : > { %v5857_v20 = vpop.eup %5856 }
 0x6dc   : > { %v1374_v51 = vpop.xlane.xlu0 %1373  ;;  %v6781_v19 = vmul.f32 %v5857_v20, %v6559_v22 }
 0x6dd   : > { %v1384_v63 = vadd.f32 %v1374_v51, %v1350_v24 }
 0x6de   : > { %v1574_v39 = vpack.c.bf16 %v6781_v19, %v6778_v4  ;;  %v1377_v29 = vpop.xlane.xlu1 %1376 }
 0x6df   : > { %5862 = vrcp.f32 %v1384_v63  ;;  %v1385_v31 = vadd.f32 %v1377_v29, %v1353_v57 }
 0x6e1   : > { %v5859_v21 = vpop.eup %5858  ;;  %5864 = vrcp.f32 %v1385_v31 }
 0x6e2   : > { %v6786_v0 = vmul.f32 %v5859_v21, %v6565_v14  ;;  %v2234_v14 = vadd.f32 %v2218_v16, %v2194_v55  ;;  %5866 = vrcp.f32 %v2233_v32 }
 0x6e3   : > { %v5861_v15 = vpop.eup %5860 }
 0x6e4   : > { %v6789_v40 = vmul.f32 %v5861_v15, %v6569_v36  ;;  %5868 = vrcp.f32 %v2234_v14  ;;  %v2237_v36 = vadd.f32 %v2227_v50, %v2203_v5  ;;  %v2523_v50 = vsel %vm2441_vm11, %v6773_v47, 0 }
 0x6e5   : > { %5870 = vrcp.f32 %v2231_v54  ;;  %v5779_v54 = vld [vmem:[%s7354_s10 + $0x28] sm:$0xff]  }
 0x6e6   : > { %v1575_v23 = vpack.c.bf16 %v6789_v40, %v6786_v0  ;;  %5872 = vrcp.f32 %v2232_v56 }
 0x6e7   : > { %5874 = vrcp.f32 %v2237_v36 }
 0x6e8   : > { %5876 = vrcp.f32 %v2238_v18 }
 0x6e9   : > { %v5863_v22 = vpop.eup %5862  ;;  %5878 = vrcp.f32 %v2235_v34 }
 0x6ea   : > { %v6794_v13 = vmul.f32 %v5863_v22, %v6563_v42  ;;  %5880 = vrcp.f32 %v2236_v37 }
 0x6eb   : > { %v5865_v7 = vpop.eup %5864 }
 0x6ec   : > { %v6797_v45 = vmul.f32 %v5865_v7, %v7373_v25  ;;  %v5867_v42 = vpop.eup %5866 }
 0x6ee   : > { %v1576_v30 = vpack.c.bf16 %v6797_v45, %v6794_v13  ;;  %v5869_v1 = vpop.eup %5868 }
 0x6ef   : > { %v5871_v35 = vpop.eup %5870 }
 0x6f0   : > { %v5873_v28 = vpop.eup %5872 }
 0x6f1   : > { %v5875_v38 = vpop.eup %5874 }
 0x6f2   : > { %v5877_v49 = vpop.eup %5876 }
 0x6f3   : > { %v5879_v3 = vpop.eup %5878 }
 0x6f4   : > { %v5881_v12 = vpop.eup %5880 }
 0x70e   : > { %v5369_v58 = vpop.f32.mrb[52].mxu1 }
 0x70f   : > { %v2378_v8 = vpop.f32.mrb[53].mxu1  ;;  %v2419_v16 = vmul.f32 %v5867_v42, %v5369_v58 }
 0x710   : > { %v5370_v55 = vpop.f32.mrb[54].mxu1  ;;  %v2417_v43 = vmul.f32 %v5871_v35, %v2378_v8 }
 0x711   : > { %v2420_v41 = vmul.f32 %v5869_v1, %v5370_v55  ;;  %v2381_v33 = vpop.f32.mrb[55].mxu1 }
 0x712   : > { %v2418_v27 = vmul.f32 %v5873_v28, %v2381_v33 }
 0x713   : > { %v2426_v5 = vpack.c.bf16 %v2420_v41, %v2419_v16 }
 0x714   : > { %v2425_v48 = vpack.c.bf16 %v2418_v27, %v2417_v43 }
 0x716   : > { %v5373_v2 = vpop.f32.mrb[56].mxu1  ;;  %5377 = vmatprep.mubr.msk.bf16.mxu0 %vm1065_vm6, %v2425_v48 }
 0x717   : > { %v2394_v53 = vpop.f32.mrb[57].mxu1  ;;  %5378 = vmatmul.mubr.msk.bf16.vlgmr.msra.gmra.mrb[52].mxu0 %vm1065_vm6, %v2426_v5  ;;  %v2423_v26 = vmul.f32 %v5875_v38, %v5373_v2 }
 0x718   : > { %v5374_v62 = vpop.f32.mrb[58].mxu1  ;;  %5386 = vmatpush3.bf16.msra.mxu0 %v2523_v50  ;;  %v2421_v17 = vmul.f32 %v5879_v3, %v2394_v53 }
 0x719   : > { %v2424_v24 = vmul.f32 %v5877_v49, %v5374_v62  ;;  %v2397_v47 = vpop.f32.mrb[59].mxu1  ;;  %5419 = vmatprep.subr.bf16.mxu0 %v6806_v60 }
 0x71a   : > { %v2422_v57 = vmul.f32 %v5881_v12, %v2397_v47 }
 0x71b   : > { %v2428_v20 = vpack.c.bf16 %v2424_v24, %v2423_v26 }
 0x71c   : > { %v2427_v51 = vpack.c.bf16 %v2422_v57, %v2421_v17 }
 0x71e   : > { %5381 = vmatprep.mubr.msk.bf16.mxu0 %vm1065_vm6, %v2427_v51  ;;  %v5401_v63 = vpop.f32.mrb[60].mxu1 }
 0x71f   : > { %5382 = vmatmul.mubr.msk.bf16.gmra.mrb[56].mxu0 %vm1065_vm6, %v2428_v20  ;;  %v2920_v29 = vmul.f32 0.35355338, %v5401_v63  ;;  %v2653_v31 = vpop.f32.mrb[61].mxu1 }
 0x720   : > { %5387 = vmatprep.mubr.msk.bf16.mxu0 %vm1065_vm6, %v1573_v59  ;;  %v2918_v21 = vmul.f32 0.35355338, %v2653_v31  ;;  %v5402_v15 = vpop.f32.mrb[62].mxu1 }
 0x721   : > { %v2921_v22 = vmul.f32 0.35355338, %v5402_v15  ;;  %v2656_v7 = vpop.f32.mrb[63].mxu1  ;;  %v7374_v15 = vld [vmem:[#allocation9_spill] sm:$0xff] }
 0x722   : > { %v2919_v25 = vmul.f32 0.35355338, %v2656_v7 }
 0x723   : > { %v6817_v32 = vpack.c.bf16 %v2921_v22, %v2920_v29 }
 0x724   : > { %v2926_v14 = vpack.c.bf16 %v2919_v25, %v2918_v21 }
 0x726   : > { %v5405_v56 = vpop.f32.mrb[64].mxu1  ;;  %5455 = vmatprep.mubr.msk.bf16.mxu1 %vm1065_vm6, %v2926_v14 }
 0x727   : > { %5388 = vmatmul.mubr.msk.bf16.vlgmr.msra.gmra.mrb[52].mxu0 %vm1065_vm6, %v1574_v39  ;;  %v2924_v61 = vmul.f32 0.35355338, %v5405_v56  ;;  %v2669_v52 = vpop.f32.mrb[65].mxu1 }
 0x728   : > { %5391 = vmatprep.mubr.msk.bf16.mxu0 %vm1065_vm6, %v1575_v23  ;;  %v2922_v59 = vmul.f32 0.35355338, %v2669_v52  ;;  %5420 = vmatpush3.bf16.msra.mxu0 %v6806_v60  ;;  %v5406_v36 = vpop.f32.mrb[66].mxu1 }
 0x729   : > { %v2925_v18 = vmul.f32 0.35355338, %v5406_v36  ;;  %v2672_v34 = vpop.f32.mrb[67].mxu1  ;;  %5421 = vmatprep.subr.bf16.mxu0 %v5779_v54 }
 0x72a   : > { %v2923_v37 = vmul.f32 0.35355338, %v2672_v34 }
 0x72b   : > { %v2929_v42 = vpack.c.bf16 %v2925_v18, %v2924_v61  ;;  %v6900_v18 = vld [vmem:[%s6138_s27] ss:$0 sm:$0xff] }
 0x72c   : > { %v2928_v58 = vpack.c.bf16 %v2923_v37, %v2922_v59  ;;  %5422 = vmatpush3.bf16.msra.mxu0 %v5779_v54 }
 0x72d   : > { %5439 = vmatprep.subr.bf16.mxu0 %v7372_v46 }
 0x72e   : > { %v5413_v4 = vpop.f32.mrb[68].mxu1 }
 0x72f   : > { %5392 = vmatmul.mubr.msk.bf16.gmra.mrb[56].mxu0 %vm1065_vm6, %v1576_v30  ;;  %v2730_v19 = vpop.f32.mrb[69].mxu1 }
 0x730   : > { %v5414_v39 = vpop.f32.mrb[70].mxu1  ;;  %5423 = vmatprep.mubr.msk.bf16.mxu0 %vm728_vm4, %v6140_v6 }
 0x731   : > { %v2931_v0 = vpack.c.bf16 %v5414_v39, %v5413_v4  ;;  %v2733_v40 = vpop.f32.mrb[71].mxu1 }
 0x732   : > { %v2930_v23 = vpack.c.bf16 %v2733_v40, %v2730_v19 }
 0x733   : > { %v2950_v28 = vsel %vm1065_vm6, %v2931_v0, 0 }
 0x734   : > { %v2947_v1 = vsel %vm1065_vm6, %v2930_v23, 0  ;;  %5693 = vmatprep.subr.msk.bf16.mxu1 %vm1065_vm6, %v2930_v23 }
 0x735   : > { %5448 = vmatpush3.bf16.xpose.msra.mxu1 %v2947_v1 }
 0x736   : > { %5694 = vmatprep.subr.msk.bf16.mxu1 %vm1065_vm6, %v2931_v0  ;;  %v5417_v8 = vpop.f32.mrb[72].mxu1 }
 0x737   : > { %5424 = vmatmul.mubr.msk.bf16.vlgmr.msra.gmra.mrb[60].mxu0 %vm728_vm4, %v6147_v9  ;;  %v2746_v13 = vpop.f32.mrb[73].mxu1 }
 0x738   : > { %5440 = vmatpush3.bf16.msra.mxu0 %v6806_v60  ;;  %v5418_v45 = vpop.f32.mrb[74].mxu1  ;;  %5427 = vmatprep.mubr.msk.bf16.mxu0 %vm728_vm4, %v6149_v10 }
 0x739   : > { %v2933_v30 = vpack.c.bf16 %v5418_v45, %v5417_v8  ;;  %v2749_v35 = vpop.f32.mrb[75].mxu1  ;;  %5441 = vmatprep.subr.bf16.mxu0 %v7372_v46 }
 0x73a   : > { %v2932_v55 = vpack.c.bf16 %v2749_v35, %v2746_v13 }
 0x73b   : > { %v2956_v50 = vsel %vm1065_vm6, %v2933_v30, 0 }
 0x73c   : > { %5442 = vmatpush3.bf16.msra.mxu0 %v5779_v54  ;;  %v2953_v5 = vsel %vm1065_vm6, %v2932_v55, 0 }
 0x73d   : > { %5450 = vmatpush3.bf16.xpose.msra.mxu1 %v2950_v28 }
 0x73e   : > { %5695 = vmatprep.subr.msk.bf16.mxu1 %vm1065_vm6, %v2932_v55  ;;  %v2872_v16 = vpop.f32.mrb[76].mxu1 }
 0x73f   : > { %5428 = vmatmul.mubr.msk.bf16.gmra.mrb[64].mxu0 %vm728_vm4, %v6151_v11  ;;  %v3023_v41 = vpack.c.bf16 %v2872_v16, %v2872_v16  ;;  %v5437_v33 = vpop.f32.mrb[77].mxu1 }
 0x740   : > { %v2875_v43 = vpop.f32.mrb[78].mxu1  ;;  %5443 = vmatprep.mubr.msk.bf16.mxu0 %vm6022_vm5, %v7372_v46 }
 0x741   : > { %v5438_v27 = vpop.f32.mrb[79].mxu1  ;;  %5697 = vmatprep.subr.msk.bf16.mxu0 %vm1065_vm6, %v3023_v41  ;;  %v3025_v48 = vsel %vm1065_vm6, %v3023_v41, 0 }
 0x745   : > { %5452 = vmatpush3.bf16.xpose.msra.mxu1 %v2953_v5 }
 0x746   : > { %5696 = vmatprep.subr.msk.bf16.mxu1 %vm1065_vm6, %v2933_v30 }
 0x747   : > { %5444 = vmatmul.mubr.msk.bf16.vlgmr.msra.gmra.mrb[68].mxu0 %vm728_vm4, %v6224_v44 }
 0x748   : > { %5464 = vmatpush3.bf16.xpose.msra.mxu0 %v3025_v48  ;;  %5465 = vmatprep.mubr.msk.bf16.mxu0 %vm1065_vm6, %v2926_v14 }
 0x74d   : > { %5454 = vmatpush3.bf16.xpose.msra.mxu1 %v2956_v50 }
 0x74f   : > { %5466 = vmatmul.mubr.msk.bf16.vlgmr.msra.gmra.mrb[72].mxu0 %vm1065_vm6, %v6817_v32 }
 0x750   : > { %5469 = vmatprep.mubr.msk.bf16.mxu0 %vm1065_vm6, %v2928_v58 }
 0x754   : > { %5456 = vmatmul.mubr.msk.bf16.vlgmr.msra.gmra.mrb[80].mxu1 %vm1065_vm6, %v6817_v32 }
 0x755   : > { %5459 = vmatprep.mubr.msk.bf16.mxu1 %vm1065_vm6, %v2928_v58 }
 0x757   : > { %5470 = vmatmul.mubr.msk.bf16.gmra.mrb[76].mxu0 %vm1065_vm6, %v2929_v42 }
 0x75c   : > { %5460 = vmatmul.mubr.msk.bf16.gmra.mrb[84].mxu1 %vm1065_vm6, %v2929_v42 }
 0x75d   : > { %5513 = vmatprep.mubr.msk.bf16.mxu1 %vm728_vm4, %v6140_v6 }
 0x80a   : > { %v5425_v60 = vpop.f32.mrb[60].mxu0 }
 0x80b   : > { %v2807_v38 = vpop.f32.mrb[61].mxu0 }
 0x80c   : > { %v5426_v2 = vpop.f32.mrb[62].mxu0 }
 0x80d   : > { %v6872_v49 = vpack.c.bf16 %v5426_v2, %v5425_v60  ;;  %v2810_v53 = vpop.f32.mrb[63].mxu0  ;;  %v5780_v60 = vld [vmem:[%s7352_s8 + $0x30] sm:$0xff]  }
 0x80e   : > { %v6874_v3 = vpack.c.bf16 %v2810_v53, %v2807_v38  ;;  %5509 = vmatprep.subr.bf16.mxu1 %v5780_v60 }
 0x80f   : > { %5510 = vmatpush3.bf16.msra.mxu1 %v5780_v60 }
 0x812   : > { %v5429_v62 = vpop.f32.mrb[64].mxu0 }
 0x813   : > { %v2823_v12 = vpop.f32.mrb[65].mxu0 }
 0x814   : > { %v5430_v26 = vpop.f32.mrb[66].mxu0 }
 0x815   : > { %v6876_v24 = vpack.c.bf16 %v5430_v26, %v5429_v62  ;;  %v2826_v47 = vpop.f32.mrb[67].mxu0 }
 0x816   : > { %v6878_v17 = vpack.c.bf16 %v2826_v47, %v2823_v12  ;;  %v5781_v47 = vld [vmem:[%s7352_s8 + $0x38] sm:$0xff]  }
 0x817   : > { %5511 = vmatprep.subr.bf16.mxu1 %v5781_v47 }
 0x818   : > { %5512 = vmatpush3.bf16.msra.mxu1 %v5781_v47 }
 0x81a   : > { %v2912_v57 = vpop.f32.mrb[68].mxu0 }
 0x81b   : > { %v3264_v20 = vpack.c.bf16 %v2912_v57, %v2912_v57  ;;  %v5445_v51 = vpop.f32.mrb[69].mxu0  ;;  %5514 = vmatmul.mubr.msk.bf16.vlgmr.msra.gmra.mrb[88].mxu1 %vm728_vm4, %v6147_v9 }
 0x81c   : > { %v2915_v63 = vpop.f32.mrb[70].mxu0  ;;  %5517 = vmatprep.mubr.msk.bf16.mxu1 %vm728_vm4, %v6149_v10 }
 0x81d   : > { %v3278_v29 = vsel %vm1411_vm7, %v3264_v20, 0  ;;  %v5446_v31 = vpop.f32.mrb[71].mxu0  ;;  %5698 = vmatprep.subr.msk.bf16.mxu0 %vm1411_vm7, %v3264_v20 }
 0x81e   : > { %5474 = vmatpush3.bf16.msra.mxu0 %v3278_v29  ;;  %v5782_v29 = vld [vmem:[%s7353_s9 + $0x30] sm:$0xff]   ;;  %v5783_v31 = vld [vmem:[%s7353_s9 + $0x38] sm:$0xff]  }
 0x81f   : > { %5483 = vmatprep.subr.bf16.mxu0 %v6874_v3  ;;  %5521 = vmatprep.subr.bf16.mxu1 %v5782_v29 }
 0x820   : > { %5522 = vmatpush3.bf16.msra.mxu1 %v5782_v29 }
 0x821   : > { %5523 = vmatprep.subr.bf16.mxu1 %v5783_v31 }
 0x822   : > { %v5467_v21 = vpop.f32.mrb[72].mxu0 }
 0x823   : > { %v6884_v22 = vadd.f32 %v5467_v21, %v7374_v15  ;;  %v3061_v7 = vpop.f32.mrb[73].mxu0  ;;  %5518 = vmatmul.mubr.msk.bf16.gmra.mrb[92].mxu1 %vm728_vm4, %v6151_v11 }
 0x824   : > { %v5468_v25 = vpop.f32.mrb[74].mxu0  ;;  %v6887_v32 = vadd.f32 %v3061_v7, %v7374_v15  ;;  %5525 = vmatprep.mubr.msk.bf16.mxu1 %vm728_vm4, %v6140_v6  ;;  %5524 = vmatpush3.bf16.msra.mxu1 %v5783_v31 }
 0x825   : > { %v6890_v14 = vadd.f32 %v5468_v25, %v7374_v15  ;;  %v3064_v54 = vpop.f32.mrb[75].mxu0  ;;  %v3122_v56 = vsel %vm1249_vm9, %v6884_v22, -inf  ;;  %5545 = vmatprep.subr.bf16.mxu1 %v7372_v46 }
 0x826   : > { %3123 = vmax.xlane.f32.xlu0 %v3122_v56  ;;  %v6895_v61 = vadd.f32 %v3064_v54, %v7374_v15  ;;  %v3116_v42 = vsel %vm1249_vm9, %v6887_v32, -inf }
 0x827   : > { %v5457_v52 = vpop.f32.mrb[80].mxu1  ;;  %v3125_v59 = vsel %vm1249_vm9, %v6890_v14, -inf }
 0x828   : > { %v2992_v36 = vpop.f32.mrb[81].mxu1  ;;  %3126 = vmax.xlane.f32.xlu1 %v3125_v59  ;;  %v6903_v34 = vadd.f32 %v6900_v18, %v5457_v52  ;;  %v3119_v0 = vsel %vm1249_vm9, %v6895_v61, -inf }
 0x829   : > { %v5458_v37 = vpop.f32.mrb[82].mxu1  ;;  %v6913_v23 = vadd.f32 %v6900_v18, %v2992_v36 }
 0x82a   : > { %v2995_v58 = vpop.f32.mrb[83].mxu1  ;;  %v5471_v4 = vpop.f32.mrb[76].mxu0  ;;  %3117 = vmax.xlane.f32.xlu0 %v3116_v42  ;;  %v6908_v19 = vadd.f32 %v6900_v18, %v5458_v37  ;;  %v3098_v8 = vsel %vm1224_vm10, %v6903_v34, -inf }
 0x82b   : > { %v3077_v39 = vpop.f32.mrb[77].mxu0  ;;  %v6918_v13 = vadd.f32 %v6900_v18, %v2995_v58  ;;  %v3092_v16 = vsel %vm1224_vm10, %v6913_v23, -inf  ;;  %v6956_v12 = vadd.f32 %v5471_v4, %v7374_v15  ;;  %5526 = vmatmul.mubr.msk.bf16.vlgmr.msra.gmra.mrb[96].mxu1 %vm728_vm4, %v6147_v9 }
 0x82c   : > { %v5472_v40 = vpop.f32.mrb[78].mxu0  ;;  %3120 = vmax.xlane.f32.xlu1 %v3119_v0  ;;  %v3101_v30 = vsel %vm1224_vm10, %v6908_v19, -inf  ;;  %v6923_v55 = vadd.f32 %v3077_v39, %v7374_v15  ;;  %5529 = vmatprep.mubr.msk.bf16.mxu1 %vm728_vm4, %v6149_v10 }
 0x82d   : > { %v3080_v1 = vpop.f32.mrb[79].mxu0  ;;  %v3095_v43 = vsel %vm1224_vm10, %v6918_v13, -inf  ;;  %v6964_v57 = vadd.f32 %v5472_v40, %v7374_v15  ;;  %v3134_v51 = vsel %vm1249_vm9, %v6956_v12, -inf  ;;  %5546 = vmatpush3.bf16.msra.mxu1 %v5782_v29 }
 0x82e   : > { %3099 = vmax.xlane.f32.xlu0 %v3098_v8  ;;  %v6928_v33 = vadd.f32 %v3080_v1, %v7374_v15  ;;  %v3128_v5 = vsel %vm1249_vm9, %v6923_v55, -inf  ;;  %5547 = vmatprep.subr.bf16.mxu1 %v7372_v46 }
 0x82f   : > { %v5461_v45 = vpop.f32.mrb[84].mxu1  ;;  %v3137_v63 = vsel %vm1249_vm9, %v6964_v57, -inf }
 0x830   : > { %v3008_v35 = vpop.f32.mrb[85].mxu1  ;;  %3102 = vmax.xlane.f32.xlu1 %v3101_v30  ;;  %v6933_v27 = vadd.f32 %v6900_v18, %v5461_v45  ;;  %v3131_v50 = vsel %vm1249_vm9, %v6928_v33, -inf }
 0x831   : > { %v5462_v28 = vpop.f32.mrb[86].mxu1  ;;  %v6946_v38 = vadd.f32 %v6900_v18, %v3008_v35  ;;  %5548 = vmatpush3.bf16.msra.mxu1 %v5783_v31 }
 0x832   : > { %v3011_v41 = vpop.f32.mrb[87].mxu1  ;;  %3093 = vmax.xlane.f32.xlu0 %v3092_v16  ;;  %v6938_v48 = vadd.f32 %v6900_v18, %v5462_v28  ;;  %v3110_v2 = vsel %vm1224_vm10, %v6933_v27, -inf  ;;  %5553 = vmatprep.subr.bf16.mxu1 %v7372_v46 }
 0x833   : > { %v6951_v53 = vadd.f32 %v6900_v18, %v3011_v41  ;;  %v3104_v26 = vsel %vm1224_vm10, %v6946_v38, -inf  ;;  %5530 = vmatmul.mubr.msk.bf16.gmra.mrb[100].mxu1 %vm728_vm4, %v6151_v11 }
 0x834   : > { %3096 = vmax.xlane.f32.xlu1 %v3095_v43  ;;  %v3113_v62 = vsel %vm1224_vm10, %v6938_v48, -inf  ;;  %5549 = vmatprep.mubr.msk.bf16.mxu1 %vm6022_vm5, %v7372_v46 }
 0x835   : > { %v3107_v20 = vsel %vm1224_vm10, %v6951_v53, -inf }
 0x836   : > { %3129 = vmax.xlane.f32.xlu0 %v3128_v5 }
 0x838   : > { %3132 = vmax.xlane.f32.xlu1 %v3131_v50 }
 0x83a   : > { %3111 = vmax.xlane.f32.xlu0 %v3110_v2 }
 0x83b   : > { %5550 = vmatmul.mubr.msk.bf16.vlgmr.msra.gmra.mrb[104].mxu1 %vm728_vm4, %v6224_v44 }
 0x83c   : > { %3114 = vmax.xlane.f32.xlu1 %v3113_v62  ;;  %5557 = vmatprep.mubr.msk.bf16.mxu1 %vm6022_vm5, %v7372_v46 }
 0x83e   : > { %3105 = vmax.xlane.f32.xlu0 %v3104_v26 }
 0x840   : > { %3108 = vmax.xlane.f32.xlu1 %v3107_v20 }
 0x842   : > { %3135 = vmax.xlane.f32.xlu0 %v3134_v51 }
 0x844   : > { %3138 = vmax.xlane.f32.xlu1 %v3137_v63 }
 0x8b3   : > { %v3124_v21 = vpop.xlane.xlu0 %3123 }
 0x8b5   : > { %v3127_v7 = vpop.xlane.xlu1 %3126 }
 0x8b7   : > { %v3118_v25 = vpop.xlane.xlu0 %3117 }
 0x8b9   : > { %v3121_v54 = vpop.xlane.xlu1 %3120 }
 0x8bb   : > { %v3100_v56 = vpop.xlane.xlu0 %3099 }
 0x8bc   : > { %v3142_v52 = vmax.f32 %v3100_v56, %v3124_v21 }
 0x8bd   : > { %v3103_v59 = vpop.xlane.xlu1 %3102 }
 0x8be   : > { %v3150_v36 = vsub.f32 %v6903_v34, %v3142_v52  ;;  %v3174_v37 = vsub.f32 %v6884_v22, %v3142_v52  ;;  %v3143_v42 = vmax.f32 %v3103_v59, %v3127_v7 }
 0x8bf   : > { %v3094_v58 = vpop.xlane.xlu0 %3093 }
 0x8c0   : > { %v3160_v4 = vmul.f32 1.442695, %v3150_v36  ;;  %v3184_v39 = vmul.f32 1.442695, %v3174_v37  ;;  %v3151_v0 = vsub.f32 %v6908_v19, %v3143_v42  ;;  %v3175_v40 = vsub.f32 %v6890_v14, %v3143_v42 }
 0x8c1   : > { %v3140_v1 = vmax.f32 %v3094_v58, %v3118_v25  ;;  %v3097_v8 = vpop.xlane.xlu1 %3096 }
 0x8c2   : > { %5882 = vpow2.f32 %v3160_v4  ;;  %v3162_v45 = vmul.f32 1.442695, %v3151_v0  ;;  %v3186_v30 = vmul.f32 1.442695, %v3175_v40  ;;  %v3141_v35 = vmax.f32 %v3097_v8, %v3121_v54 }
 0x8c3   : > { %5884 = vpow2.f32 %v3184_v39  ;;  %v3148_v28 = vsub.f32 %v6913_v23, %v3140_v1  ;;  %v3172_v34 = vsub.f32 %v6887_v32, %v3140_v1  ;;  %v3130_v22 = vpop.xlane.xlu0 %3129 }
 0x8c4   : > { %5886 = vpow2.f32 %v3162_v45  ;;  %v3149_v16 = vsub.f32 %v6918_v13, %v3141_v35  ;;  %v3173_v41 = vsub.f32 %v6895_v61, %v3141_v35 }
 0x8c5   : > { %v3156_v19 = vmul.f32 1.442695, %v3148_v28  ;;  %v3180_v43 = vmul.f32 1.442695, %v3172_v34  ;;  %v3133_v14 = vpop.xlane.xlu1 %3132  ;;  %5888 = vpow2.f32 %v3186_v30 }
 0x8c6   : > { %v3158_v5 = vmul.f32 1.442695, %v3149_v16  ;;  %v3182_v50 = vmul.f32 1.442695, %v3173_v41 }
 0x8c7   : > { %5890 = vpow2.f32 %v3156_v19  ;;  %v3112_v60 = vpop.xlane.xlu0 %3111 }
 0x8c8   : > { %5892 = vpow2.f32 %v3180_v43 }
 0x8c9   : > { %5894 = vpow2.f32 %v3158_v5  ;;  %v3115_v2 = vpop.xlane.xlu1 %3114 }
 0x8ca   : > { %5896 = vpow2.f32 %v3182_v50 }
 0x8cb   : > { %v3106_v23 = vpop.xlane.xlu0 %3105 }
 0x8cc   : > { %v7009_v32 = vpop.eup %5882  ;;  %v3144_v62 = vmax.f32 %v3106_v23, %v3130_v22 }
 0x8cd   : > { %v5885_v26 = vpop.eup %5884  ;;  %v3109_v13 = vpop.xlane.xlu1 %3108  ;;  %v3202_v61 = vsel %vm1224_vm10, %v7009_v32, 0.0 }
 0x8ce   : > { %v7013_v47 = vpop.eup %5886  ;;  %v3152_v20 = vsub.f32 %v6946_v38, %v3144_v62  ;;  %v3176_v51 = vsub.f32 %v6923_v55, %v3144_v62  ;;  %v3145_v63 = vmax.f32 %v3109_v13, %v3133_v14  ;;  %3203 = vadd.xlane.f32.xlu0 %v3202_v61  ;;  %v3226_v59 = vsel %vm1249_vm9, %v5885_v26, 0.0 }
 0x8cf   : > { %v3136_v29 = vpop.xlane.xlu0 %3135  ;;  %v3205_v31 = vsel %vm1224_vm10, %v7013_v47, 0.0  ;;  %v5889_v21 = vpop.eup %5888 }
 0x8d0   : > { %v3188_v7 = vmul.f32 1.442695, %v3176_v51  ;;  %3206 = vadd.xlane.f32.xlu1 %v3205_v31  ;;  %v3177_v54 = vsub.f32 %v6928_v33, %v3145_v63  ;;  %v3146_v56 = vmax.f32 %v3112_v60, %v3136_v29  ;;  %v3164_v36 = vmul.f32 1.442695, %v3152_v20  ;;  %v7063_v29 = vld [vmem:[%s7354_s10 + $0x30] sm:$0xff]   ;;  %v7074_v31 = vld [vmem:[%s7354_s10 + $0x38] sm:$0xff]  }
 0x8d1   : > { %v7019_v25 = vpop.eup %5890  ;;  %v3139_v52 = vpop.xlane.xlu1 %3138  ;;  %v3153_v55 = vsub.f32 %v6951_v53, %v3145_v63  ;;  %v3229_v0 = vsel %vm1249_vm9, %v5889_v21, 0.0  ;;  %v3261_v35 = vpack.c.bf16 %v5889_v21, %v5885_v26  ;;  %5554 = vmatpush3.bf16.msra.mxu1 %v7063_v29 }
 0x8d2   : > { %v5893_v38 = vpop.eup %5892  ;;  %v3147_v37 = vmax.f32 %v3115_v2, %v3139_v52  ;;  %3227 = vadd.xlane.f32.xlu0 %v3226_v59  ;;  %v3190_v58 = vmul.f32 1.442695, %v3177_v54  ;;  %v3154_v4 = vsub.f32 %v6933_v27, %v3146_v56  ;;  %v3178_v39 = vsub.f32 %v6956_v12, %v3146_v56  ;;  %5555 = vmatprep.subr.bf16.mxu1 %v7372_v46 }
 0x8d3   : > { %v5895_v42 = vpop.eup %5894  ;;  %5898 = vpow2.f32 %v3188_v7  ;;  %v3196_v53 = vsel %vm1224_vm10, %v7019_v25, 0.0  ;;  %v3166_v28 = vmul.f32 1.442695, %v3153_v55 }
 0x8d4   : > { %v5897_v40 = vpop.eup %5896  ;;  %v3155_v33 = vsub.f32 %v6938_v48, %v3147_v37  ;;  %v3179_v1 = vsub.f32 %v6964_v57, %v3147_v37  ;;  %3230 = vadd.xlane.f32.xlu1 %v3229_v0  ;;  %5900 = vpow2.f32 %v3190_v58  ;;  %v3168_v8 = vmul.f32 1.442695, %v3154_v4 }
 0x8d5   : > { %v3192_v45 = vmul.f32 1.442695, %v3178_v39  ;;  %v3260_v30 = vpack.c.bf16 %v5897_v40, %v5893_v38  ;;  %5902 = vpow2.f32 %v3164_v36  ;;  %v3199_v48 = vsel %vm1224_vm10, %v5895_v42, 0.0  ;;  %5556 = vmatpush3.bf16.msra.mxu1 %v7074_v31 }
 0x8d6   : > { %v3170_v27 = vmul.f32 1.442695, %v3155_v33  ;;  %v3194_v12 = vmul.f32 1.442695, %v3179_v1  ;;  %3197 = vadd.xlane.f32.xlu0 %v3196_v53  ;;  %5904 = vpow2.f32 %v3168_v8  ;;  %v3220_v57 = vsel %vm1249_vm9, %v5893_v38, 0.0 }
 0x8d7   : > { %5475 = vmatprep.mubr.msk.bf16.mxu0 %vm1249_vm9, %v3260_v30  ;;  %5906 = vpow2.f32 %v3192_v45  ;;  %v3223_v34 = vsel %vm1249_vm9, %v5897_v40, 0.0  ;;  %v3252_v23 = vpack.c.bf16 %v5895_v42, %v7019_v25 }
 0x8d8   : > { %5476 = vmatmul.mubr.msk.bf16.vlgmr.msra.gmra.mrb[80].mxu0 %vm1249_vm9, %v3261_v35  ;;  %3200 = vadd.xlane.f32.xlu1 %v3199_v48  ;;  %5908 = vpow2.f32 %v3170_v27 }
 0x8d9   : > { %5484 = vmatpush3.bf16.msra.mxu0 %v6874_v3  ;;  %5910 = vpow2.f32 %v3194_v12  ;;  %5558 = vmatmul.mubr.msk.bf16.vlgmr.msra.gmra.mrb[108].mxu1 %vm728_vm4, %v6224_v44 }
 0x8da   : > { %5485 = vmatprep.subr.bf16.mxu0 %v6872_v49  ;;  %3221 = vadd.xlane.f32.xlu0 %v3220_v57  ;;  %5912 = vpow2.f32 %v3166_v28 }
 0x8dc   : > { %3224 = vadd.xlane.f32.xlu1 %v3223_v34 }
 0x8dd   : > { %5486 = vmatpush3.bf16.msra.mxu0 %v6872_v49  ;;  %v5899_v22 = vpop.eup %5898 }
 0x8de   : > { %5487 = vmatprep.subr.bf16.mxu0 %v6878_v17  ;;  %v5901_v16 = vpop.eup %5900  ;;  %v3232_v26 = vsel %vm1249_vm9, %v5899_v22, 0.0 }
 0x8df   : > { %v5903_v41 = vpop.eup %5902  ;;  %v3262_v19 = vpack.c.bf16 %v5901_v16, %v5899_v22  ;;  %v3235_v13 = vsel %vm1249_vm9, %v5901_v16, 0.0 }
 0x8e0   : > { %v5905_v43 = vpop.eup %5904 }
 0x8e1   : > { %5488 = vmatpush3.bf16.msra.mxu0 %v6878_v17  ;;  %v5907_v3 = vpop.eup %5906  ;;  %5479 = vmatprep.mubr.msk.bf16.mxu0 %vm1249_vm9, %v3262_v19  ;;  %v3214_v14 = vsel %vm1224_vm10, %v5905_v43, 0.0  ;;  %v3208_v17 = vsel %vm1224_vm10, %v5903_v41, 0.0 }
 0x8e2   : > { %5489 = vmatprep.subr.bf16.mxu0 %v6876_v24  ;;  %v5909_v5 = vpop.eup %5908  ;;  %3215 = vadd.xlane.f32.xlu0 %v3214_v14  ;;  %v3238_v20 = vsel %vm1249_vm9, %v5907_v3, 0.0 }
 0x8e3   : > { %v5911_v50 = vpop.eup %5910  ;;  %v3217_v49 = vsel %vm1224_vm10, %v5909_v5, 0.0  ;;  %v3255_v63 = vpack.c.bf16 %v5909_v5, %v5905_v43 }
 0x8e4   : > { %v5913_v60 = vpop.eup %5912  ;;  %3218 = vadd.xlane.f32.xlu1 %v3217_v49  ;;  %v3263_v2 = vpack.c.bf16 %v5911_v50, %v5907_v3  ;;  %v3241_v51 = vsel %vm1249_vm9, %v5911_v50, 0.0 }
 0x8e5   : > { %5490 = vmatpush3.bf16.msra.mxu0 %v6876_v24  ;;  %v3211_v62 = vsel %vm1224_vm10, %v5913_v60, 0.0  ;;  %v3253_v24 = vpack.c.bf16 %v7013_v47, %v7009_v32  ;;  %v3254_v61 = vpack.c.bf16 %v5913_v60, %v5903_v41  ;;  %v4828_v32 = vld [vmem:[%s7355_s11 + $0x8] sm:$0xf] }
 0x8e6   : > { %5480 = vmatmul.mubr.msk.bf16.gmra.mrb[84].mxu0 %vm1249_vm9, %v3263_v2  ;;  %3209 = vadd.xlane.f32.xlu0 %v3208_v17  ;;  %v3455_v47 = vsel %vm2441_vm11, %v4828_v32, 0 }
 0x8e7   : > { %5491 = vmatprep.mubr.msk.bf16.mxu0 %vm1224_vm10, %v3252_v23  ;;  %5699 = vmatprep.subr.msk.bf16.mxu0 %vm2441_vm11, %v4828_v32 }
 0x8e8   : > { %3212 = vadd.xlane.f32.xlu1 %v3211_v62 }
 0x8ea   : > { %3233 = vadd.xlane.f32.xlu0 %v3232_v26 }
 0x8ec   : > { %3236 = vadd.xlane.f32.xlu1 %v3235_v13 }
 0x8ee   : > { %5492 = vmatmul.mubr.msk.bf16.vlgmr.msra.gmra.mrb[80].mxu0 %vm1224_vm10, %v3253_v24  ;;  %3239 = vadd.xlane.f32.xlu0 %v3238_v20  ;;  %v5515_v21 = vpop.f32.mrb[88].mxu1 }
 0x8ef   : > { %5495 = vmatprep.mubr.msk.bf16.mxu0 %vm1224_vm10, %v3254_v61  ;;  %5500 = vmatpush3.bf16.msra.mxu0 %v3455_v47  ;;  %v3860_v7 = vmul.f32 0.35355338, %v5515_v21  ;;  %v3593_v25 = vpop.f32.mrb[89].mxu1 }
 0x8f0   : > { %3242 = vadd.xlane.f32.xlu1 %v3241_v51  ;;  %5533 = vmatprep.subr.bf16.mxu0 %v7063_v29  ;;  %v3858_v54 = vmul.f32 0.35355338, %v3593_v25  ;;  %v5516_v56 = vpop.f32.mrb[90].mxu1 }
 0x8f1   : > { %v3861_v52 = vmul.f32 0.35355338, %v5516_v56  ;;  %v3596_v59 = vpop.f32.mrb[91].mxu1 }
 0x8f2   : > { %v3859_v38 = vmul.f32 0.35355338, %v3596_v59 }
 0x8f3   : > { %v7081_v36 = vpack.c.bf16 %v3861_v52, %v3860_v7 }
 0x8f4   : > { %v7083_v55 = vpack.c.bf16 %v3859_v38, %v3858_v54 }
 0x8f6   : > { %5496 = vmatmul.mubr.msk.bf16.gmra.mrb[84].mxu0 %vm1224_vm10, %v3255_v63  ;;  %v5519_v46 = vpop.f32.mrb[92].mxu1  ;;  %5579 = vmatprep.mubr.msk.bf16.mxu1 %vm1065_vm6, %v7083_v55 }
 0x8f7   : > { %v3864_v37 = vmul.f32 0.35355338, %v5519_v46  ;;  %v3609_v42 = vpop.f32.mrb[93].mxu1 }
 0x8f8   : > { %v3862_v58 = vmul.f32 0.35355338, %v3609_v42  ;;  %v5520_v44 = vpop.f32.mrb[94].mxu1 }
 0x8f9   : > { %v3865_v4 = vmul.f32 0.35355338, %v5520_v44  ;;  %v3612_v39 = vpop.f32.mrb[95].mxu1 }
 0x8fa   : > { %v3863_v0 = vmul.f32 0.35355338, %v3612_v39 }
 0x8fb   : > { %v7087_v40 = vpack.c.bf16 %v3865_v4, %v3864_v37 }
 0x8fc   : > { %v7089_v33 = vpack.c.bf16 %v3863_v0, %v3862_v58 }
 0x8fe   : > { %v5527_v1 = vpop.f32.mrb[96].mxu1 }
 0x8ff   : > { %v3670_v53 = vpop.f32.mrb[97].mxu1 }
 0x900   : > { %v5528_v8 = vpop.f32.mrb[98].mxu1 }
 0x901   : > { %v7091_v45 = vpack.c.bf16 %v5528_v8, %v5527_v1  ;;  %v3673_v30 = vpop.f32.mrb[99].mxu1 }
 0x902   : > { %v7093_v35 = vpack.c.bf16 %v3673_v30, %v3670_v53 }
 0x906   : > { %v5531_v27 = vpop.f32.mrb[100].mxu1 }
 0x907   : > { %v3686_v12 = vpop.f32.mrb[101].mxu1 }
 0x908   : > { %v5532_v28 = vpop.f32.mrb[102].mxu1 }
 0x909   : > { %v7095_v48 = vpack.c.bf16 %v5532_v28, %v5531_v27  ;;  %v3689_v57 = vpop.f32.mrb[103].mxu1 }
 0x90a   : > { %v7097_v34 = vpack.c.bf16 %v3689_v57, %v3686_v12 }
 0x90e   : > { %v3812_v22 = vpop.f32.mrb[104].mxu1 }
 0x90f   : > { %v3963_v16 = vpack.c.bf16 %v3812_v22, %v3812_v22  ;;  %v5551_v41 = vpop.f32.mrb[105].mxu1 }
 0x910   : > { %v3815_v19 = vpop.f32.mrb[106].mxu1 }
 0x911   : > { %v3965_v43 = vsel %vm1065_vm6, %v3963_v16, 0  ;;  %5704 = vmatprep.subr.msk.bf16.mxu1 %vm1065_vm6, %v3963_v16  ;;  %v5552_v3 = vpop.f32.mrb[107].mxu1 }
 0x912   : > { %5578 = vmatpush3.bf16.xpose.msra.mxu1 %v3965_v43 }
 0x919   : > { %5580 = vmatmul.mubr.msk.bf16.vlgmr.msra.gmra.mrb[112].mxu1 %vm1065_vm6, %v7081_v36 }
 0x91a   : > { %5583 = vmatprep.mubr.msk.bf16.mxu1 %vm1065_vm6, %v7089_v33 }
 0x921   : > { %5584 = vmatmul.mubr.msk.bf16.gmra.mrb[116].mxu1 %vm1065_vm6, %v7087_v40 }
 0x95b   : > { %v3204_v14 = vpop.xlane.xlu0 %3203 }
 0x95d   : > { %v3207_v5 = vpop.xlane.xlu1 %3206 }
 0x95f   : > { %v3228_v50 = vpop.xlane.xlu0 %3227 }
 0x960   : > { %v3246_v61 = vadd.f32 %v3228_v50, %v3204_v14 }
 0x961   : > { %v3231_v49 = vpop.xlane.xlu1 %3230 }
 0x962   : > { %v3247_v51 = vadd.f32 %v3231_v49, %v3207_v5  ;;  %5914 = vrcp.f32 %v3246_v61 }
 0x963   : > { %v3198_v60 = vpop.xlane.xlu0 %3197 }
 0x964   : > { %5916 = vrcp.f32 %v3247_v51 }
 0x965   : > { %v3201_v2 = vpop.xlane.xlu1 %3200 }
 0x967   : > { %v3222_v23 = vpop.xlane.xlu0 %3221 }
 0x968   : > { %v3244_v32 = vadd.f32 %v3222_v23, %v3198_v60 }
 0x969   : > { %v3225_v17 = vpop.xlane.xlu1 %3224 }
 0x96a   : > { %v3245_v47 = vadd.f32 %v3225_v17, %v3201_v2  ;;  %5918 = vrcp.f32 %v3244_v32 }
 0x96c   : > { %5920 = vrcp.f32 %v3245_v47  ;;  %v5915_v59 = vpop.eup %5914 }
 0x96e   : > { %v5917_v46 = vpop.eup %5916 }
 0x96f   : > { %v3216_v62 = vpop.xlane.xlu0 %3215 }
 0x971   : > { %v3219_v26 = vpop.xlane.xlu1 %3218 }
 0x973   : > { %v3210_v13 = vpop.xlane.xlu0 %3209 }
 0x974   : > { %v5919_v42 = vpop.eup %5918 }
 0x975   : > { %v3213_v24 = vpop.xlane.xlu1 %3212 }
 0x976   : > { %v5921_v44 = vpop.eup %5920 }
 0x977   : > { %v3234_v20 = vpop.xlane.xlu0 %3233 }
 0x978   : > { %v3248_v25 = vadd.f32 %v3234_v20, %v3210_v13 }
 0x979   : > { %v3237_v63 = vpop.xlane.xlu1 %3236 }
 0x97a   : > { %v3249_v52 = vadd.f32 %v3237_v63, %v3213_v24  ;;  %5922 = vrcp.f32 %v3248_v25 }
 0x97b   : > { %v3240_v21 = vpop.xlane.xlu0 %3239 }
 0x97c   : > { %v3250_v54 = vadd.f32 %v3240_v21, %v3216_v62 }
 0x97d   : > { %v3243_v7 = vpop.xlane.xlu1 %3242 }
 0x97e   : > { %v3251_v56 = vadd.f32 %v3243_v7, %v3219_v26  ;;  %5924 = vrcp.f32 %v3250_v54 }
 0x980   : > { %5926 = vrcp.f32 %v3251_v56 }
 0x981   : > { %5928 = vrcp.f32 %v3249_v52 }
 0x984   : > { %v5923_v27 = vpop.eup %5922 }
 0x988   : > { %v5925_v28 = vpop.eup %5924 }
 0x98a   : > { %v5927_v22 = vpop.eup %5926 }
 0x98b   : > { %v5929_v41 = vpop.eup %5928 }
 0x9c1   : > { %v5493_v38 = vpop.f32.mrb[80].mxu0 }
 0x9c2   : > { %v3391_v37 = vpop.f32.mrb[81].mxu0  ;;  %v3432_v4 = vmul.f32 %v5915_v59, %v5493_v38 }
 0x9c3   : > { %v5494_v58 = vpop.f32.mrb[82].mxu0  ;;  %v3430_v1 = vmul.f32 %v5919_v42, %v3391_v37 }
 0x9c4   : > { %v3433_v39 = vmul.f32 %v5917_v46, %v5494_v58  ;;  %v3394_v0 = vpop.f32.mrb[83].mxu0 }
 0x9c5   : > { %v3431_v53 = vmul.f32 %v5921_v44, %v3394_v0 }
 0x9c6   : > { %v3439_v8 = vpack.c.bf16 %v3433_v39, %v3432_v4 }
 0x9c7   : > { %v3438_v30 = vpack.c.bf16 %v3431_v53, %v3430_v1 }
 0x9c9   : > { %v5497_v12 = vpop.f32.mrb[84].mxu0  ;;  %5501 = vmatprep.mubr.msk.bf16.mxu0 %vm1065_vm6, %v3438_v30 }
 0x9ca   : > { %v3407_v57 = vpop.f32.mrb[85].mxu0  ;;  %5502 = vmatmul.mubr.msk.bf16.vlgmr.msra.gmra.mrb[52].mxu0 %vm1065_vm6, %v3439_v8  ;;  %v3436_v19 = vmul.f32 %v5925_v28, %v5497_v12 }
 0x9cb   : > { %v5498_v16 = vpop.f32.mrb[86].mxu0  ;;  %5534 = vmatpush3.bf16.msra.mxu0 %v7063_v29  ;;  %v3434_v14 = vmul.f32 %v5923_v27, %v3407_v57  ;;  %v3887_v29 = vsel %vm1065_vm6, %v7093_v35, 0 }
 0x9cc   : > { %v3437_v43 = vmul.f32 %v5927_v22, %v5498_v16  ;;  %v3410_v3 = vpop.f32.mrb[87].mxu0  ;;  %5535 = vmatprep.subr.bf16.mxu0 %v7074_v31 }
 0x9cd   : > { %v3435_v5 = vmul.f32 %v5929_v41, %v3410_v3 }
 0x9ce   : > { %v3441_v50 = vpack.c.bf16 %v3437_v43, %v3436_v19 }
 0x9cf   : > { %v3440_v49 = vpack.c.bf16 %v3435_v5, %v3434_v14  ;;  %5536 = vmatpush3.bf16.msra.mxu0 %v7074_v31  ;;  %v3852_v31 = vpop.f32.mrb[108].mxu1 }
 0x9d0   : > { %5700 = vmatprep.subr.msk.bf16.mxu0 %vm1065_vm6, %v7093_v35  ;;  %v4204_v60 = vpack.c.bf16 %v3852_v31, %v3852_v31  ;;  %v5559_v2 = vpop.f32.mrb[109].mxu1 }
 0x9d1   : > { %5505 = vmatprep.mubr.msk.bf16.mxu0 %vm1065_vm6, %v3440_v49  ;;  %v3855_v23 = vpop.f32.mrb[110].mxu1 }
 0x9d2   : > { %5506 = vmatmul.mubr.msk.bf16.gmra.mrb[56].mxu0 %vm1065_vm6, %v3441_v50  ;;  %v4218_v17 = vsel %vm1411_vm7, %v4204_v60, 0  ;;  %5705 = vmatprep.subr.msk.bf16.mxu1 %vm1411_vm7, %v4204_v60 }
 0x9d3   : > { %5537 = vmatprep.mubr.msk.bf16.mxu0 %vm728_vm4, %v6140_v6  ;;  %v5560_v6 = vpop.f32.mrb[111].mxu1  ;;  %5588 = vmatpush3.bf16.msra.mxu1 %v4218_v17 }
 0x9da   : > { %5538 = vmatmul.mubr.msk.bf16.vlgmr.msra.gmra.mrb[88].mxu0 %vm728_vm4, %v6147_v9  ;;  %v3890_v9 = vsel %vm1065_vm6, %v7091_v45, 0 }
 0x9db   : > { %5562 = vmatpush3.bf16.xpose.msra.mxu0 %v3887_v29  ;;  %5541 = vmatprep.mubr.msk.bf16.mxu0 %vm728_vm4, %v6149_v10  ;;  %v3893_v10 = vsel %vm1065_vm6, %v7097_v34, 0 }
 0x9dc   : > { %5701 = vmatprep.subr.msk.bf16.mxu0 %vm1065_vm6, %v7091_v45  ;;  %v3896_v45 = vsel %vm1065_vm6, %v7095_v48, 0 }
 0x9e2   : > { %5542 = vmatmul.mubr.msk.bf16.gmra.mrb[92].mxu0 %vm728_vm4, %v6151_v11 }
 0x9e3   : > { %5564 = vmatpush3.bf16.xpose.msra.mxu0 %v3890_v9  ;;  %5569 = vmatprep.mubr.msk.bf16.mxu0 %vm1065_vm6, %v7083_v55 }
 0x9e4   : > { %5702 = vmatprep.subr.msk.bf16.mxu0 %vm1065_vm6, %v7097_v34 }
 0x9eb   : > { %5566 = vmatpush3.bf16.xpose.msra.mxu0 %v3893_v10 }
 0x9ec   : > { %5703 = vmatprep.subr.msk.bf16.mxu0 %vm1065_vm6, %v7095_v48  ;;  %v5581_v11 = vpop.f32.mrb[112].mxu1 }
 0x9ed   : > { %v7149_v55 = vadd.f32 %v5581_v11, %v7374_v15  ;;  %v4001_v35 = vpop.f32.mrb[113].mxu1 }
 0x9ee   : > { %v7152_v34 = vadd.f32 %v4001_v35, %v7374_v15  ;;  %v5582_v62 = vpop.f32.mrb[114].mxu1 }
 0x9ef   : > { %v7155_v48 = vadd.f32 %v5582_v62, %v7374_v15  ;;  %v4004_v26 = vpop.f32.mrb[115].mxu1 }
 0x9f0   : > { %v4056_v13 = vsel %vm1249_vm9, %v7152_v34, -inf }
 0x9f3   : > { %5568 = vmatpush3.bf16.xpose.msra.mxu0 %v3896_v45 }
 0x9f4   : > { %v5585_v61 = vpop.f32.mrb[116].mxu1 }
 0x9f5   : > { %v4017_v20 = vpop.f32.mrb[117].mxu1  ;;  %v7218_v60 = vadd.f32 %v5585_v61, %v7374_v15 }
 0x9f6   : > { %v7169_v51 = vadd.f32 %v4017_v20, %v7374_v15  ;;  %v5586_v63 = vpop.f32.mrb[118].mxu1 }
 0x9f7   : > { %v4020_v32 = vpop.f32.mrb[119].mxu1  ;;  %v7223_v23 = vadd.f32 %v5586_v63, %v7374_v15 }
 0x9f8   : > { %v7172_v47 = vadd.f32 %v4020_v32, %v7374_v15  ;;  %v4068_v21 = vsel %vm1249_vm9, %v7169_v51, -inf }
 0x9f9   : > { %v4077_v6 = vsel %vm1249_vm9, %v7223_v23, -inf }
 0x9fa   : > { %5570 = vmatmul.mubr.msk.bf16.vlgmr.msra.gmra.mrb[96].mxu0 %vm1065_vm6, %v7081_v36  ;;  %v4062_v36 = vsel %vm1249_vm9, %v7149_v55, -inf  ;;  %v4071_v7 = vsel %vm1249_vm9, %v7172_v47, -inf }
 0x9fb   : > { %5573 = vmatprep.mubr.msk.bf16.mxu0 %vm1065_vm6, %v7089_v33  ;;  %v7160_v33 = vadd.f32 %v4004_v26, %v7374_v15  ;;  %4063 = vmax.xlane.f32.xlu0 %v4062_v36 }
 0x9fd   : > { %v4059_v24 = vsel %vm1249_vm9, %v7160_v33, -inf }
 0x9ff   : > { %4057 = vmax.xlane.f32.xlu0 %v4056_v13 }
 0xa02   : > { %5574 = vmatmul.mubr.msk.bf16.gmra.mrb[100].mxu0 %vm1065_vm6, %v7087_v40  ;;  %v4065_v40 = vsel %vm1249_vm9, %v7155_v48, -inf }
 0xa03   : > { %4066 = vmax.xlane.f32.xlu1 %v4065_v40  ;;  %4069 = vmax.xlane.f32.xlu0 %v4068_v21 }
 0xa07   : > { %4060 = vmax.xlane.f32.xlu1 %v4059_v24 }
 0xa0b   : > { %4072 = vmax.xlane.f32.xlu1 %v4071_v7 }
 0xa88   : > { %v4064_v9 = vpop.xlane.xlu0 %4063 }
 0xa8c   : > { %v4058_v45 = vpop.xlane.xlu0 %4057 }
 0xa90   : > { %v4067_v10 = vpop.xlane.xlu1 %4066  ;;  %v4070_v35 = vpop.xlane.xlu0 %4069 }
 0xa94   : > { %v4061_v11 = vpop.xlane.xlu1 %4060 }
 0xa98   : > { %v4073_v62 = vpop.xlane.xlu1 %4072 }
 0xaad   : > { %v5539_v25 = vpop.f32.mrb[88].mxu0 }
 0xaae   : > { %v3747_v54 = vpop.f32.mrb[89].mxu0 }
 0xaaf   : > { %v5540_v56 = vpop.f32.mrb[90].mxu0 }
 0xab0   : > { %v7178_v52 = vpack.c.bf16 %v5540_v56, %v5539_v25  ;;  %v3750_v59 = vpop.f32.mrb[91].mxu0 }
 0xab1   : > { %v7180_v38 = vpack.c.bf16 %v3750_v59, %v3747_v54 }
 0xab3   : > { %5597 = vmatprep.subr.bf16.mxu1 %v7180_v38 }
 0xab5   : > { %v5543_v46 = vpop.f32.mrb[92].mxu0 }
 0xab6   : > { %v3763_v37 = vpop.f32.mrb[93].mxu0 }
 0xab7   : > { %v5544_v42 = vpop.f32.mrb[94].mxu0 }
 0xab8   : > { %v7183_v58 = vpack.c.bf16 %v5544_v42, %v5543_v46  ;;  %v3766_v44 = vpop.f32.mrb[95].mxu0 }
 0xab9   : > { %v7185_v4 = vpack.c.bf16 %v3766_v44, %v3763_v37 }
 0xacd   : > { %v5571_v39 = vpop.f32.mrb[96].mxu0 }
 0xace   : > { %v3941_v0 = vadd.f32 %v6900_v18, %v5571_v39  ;;  %v3932_v1 = vpop.f32.mrb[97].mxu0 }
 0xacf   : > { %v5572_v53 = vpop.f32.mrb[98].mxu0  ;;  %v7189_v8 = vadd.f32 %v6900_v18, %v3932_v1 }
 0xad0   : > { %v3944_v30 = vadd.f32 %v6900_v18, %v5572_v53  ;;  %v3935_v27 = vpop.f32.mrb[99].mxu0  ;;  %v4038_v12 = vsel %vm1224_vm10, %v3941_v0, -inf }
 0xad1   : > { %4039 = vmax.xlane.f32.xlu0 %v4038_v12  ;;  %v7194_v28 = vadd.f32 %v6900_v18, %v3935_v27  ;;  %v4032_v22 = vsel %vm1224_vm10, %v7189_v8, -inf }
 0xad2   : > { %v4041_v57 = vsel %vm1224_vm10, %v3944_v30, -inf }
 0xad3   : > { %4042 = vmax.xlane.f32.xlu1 %v4041_v57  ;;  %v4035_v43 = vsel %vm1224_vm10, %v7194_v28, -inf }
 0xad5   : > { %v5575_v16 = vpop.f32.mrb[100].mxu0  ;;  %4033 = vmax.xlane.f32.xlu0 %v4032_v22 }
 0xad6   : > { %v7200_v41 = vadd.f32 %v6900_v18, %v5575_v16  ;;  %v3948_v19 = vpop.f32.mrb[101].mxu0 }
 0xad7   : > { %v5576_v3 = vpop.f32.mrb[102].mxu0  ;;  %4036 = vmax.xlane.f32.xlu1 %v4035_v43  ;;  %v7205_v14 = vadd.f32 %v6900_v18, %v3948_v19 }
 0xad8   : > { %v7208_v5 = vadd.f32 %v6900_v18, %v5576_v3  ;;  %v3951_v50 = vpop.f32.mrb[103].mxu0  ;;  %v4050_v49 = vsel %vm1224_vm10, %v7200_v41, -inf }
 0xad9   : > { %4051 = vmax.xlane.f32.xlu0 %v4050_v49  ;;  %v7213_v29 = vadd.f32 %v6900_v18, %v3951_v50  ;;  %v4044_v2 = vsel %vm1224_vm10, %v7205_v14, -inf  ;;  %v4074_v18 = vsel %vm1249_vm9, %v7218_v60, -inf }
 0xada   : > { %v4053_v31 = vsel %vm1224_vm10, %v7208_v5, -inf }
 0xadb   : > { %4054 = vmax.xlane.f32.xlu1 %v4053_v31  ;;  %v4047_v17 = vsel %vm1224_vm10, %v7213_v29, -inf }
 0xadd   : > { %4045 = vmax.xlane.f32.xlu0 %v4044_v2 }
 0xadf   : > { %4048 = vmax.xlane.f32.xlu1 %v4047_v17 }
 0xae1   : > { %4075 = vmax.xlane.f32.xlu0 %v4074_v18 }
 0xae3   : > { %4078 = vmax.xlane.f32.xlu1 %v4077_v6 }
 0xb5e   : > { %v4040_v15 = vpop.xlane.xlu0 %4039 }
 0xb5f   : > { %v4082_v26 = vmax.f32 %v4040_v15, %v4064_v9 }
 0xb60   : > { %v4043_v36 = vpop.xlane.xlu1 %4042 }
 0xb61   : > { %v4090_v40 = vsub.f32 %v3941_v0, %v4082_v26  ;;  %v4114_v13 = vsub.f32 %v7149_v55, %v4082_v26  ;;  %v4083_v24 = vmax.f32 %v4043_v36, %v4067_v10 }
 0xb62   : > { %v4034_v61 = vpop.xlane.xlu0 %4033 }
 0xb63   : > { %v4100_v20 = vmul.f32 1.442695, %v4090_v40  ;;  %v4091_v63 = vsub.f32 %v3944_v30, %v4083_v24  ;;  %v4115_v32 = vsub.f32 %v7155_v48, %v4083_v24  ;;  %v4124_v21 = vmul.f32 1.442695, %v4114_v13 }
 0xb64   : > { %v4080_v7 = vmax.f32 %v4034_v61, %v4058_v45  ;;  %v4037_v25 = vpop.xlane.xlu1 %4036 }
 0xb65   : > { %5930 = vpow2.f32 %v4100_v20  ;;  %v4102_v54 = vmul.f32 1.442695, %v4091_v63  ;;  %v4081_v56 = vmax.f32 %v4037_v25, %v4061_v11  ;;  %v4126_v59 = vmul.f32 1.442695, %v4115_v32 }
 0xb66   : > { %v4088_v46 = vsub.f32 %v7189_v8, %v4080_v7  ;;  %v4112_v37 = vsub.f32 %v7152_v34, %v4080_v7  ;;  %v4052_v42 = vpop.xlane.xlu0 %4051 }
 0xb67   : > { %5932 = vpow2.f32 %v4102_v54  ;;  %v4089_v55 = vsub.f32 %v7194_v28, %v4081_v56  ;;  %v4113_v44 = vsub.f32 %v7160_v33, %v4081_v56 }
 0xb68   : > { %5934 = vpow2.f32 %v4124_v21  ;;  %v4096_v39 = vmul.f32 1.442695, %v4088_v46  ;;  %v4120_v48 = vmul.f32 1.442695, %v4112_v37  ;;  %v4055_v0 = vpop.xlane.xlu1 %4054 }
 0xb69   : > { %v4122_v1 = vmul.f32 1.442695, %v4113_v44  ;;  %5936 = vpow2.f32 %v4126_v59  ;;  %v4098_v30 = vmul.f32 1.442695, %v4089_v55 }
 0xb6a   : > { %v4046_v53 = vpop.xlane.xlu0 %4045  ;;  %5938 = vpow2.f32 %v4096_v39 }
 0xb6b   : > { %v4084_v27 = vmax.f32 %v4046_v53, %v4070_v35  ;;  %5940 = vpow2.f32 %v4120_v48 }
 0xb6c   : > { %v4049_v8 = vpop.xlane.xlu1 %4048  ;;  %5942 = vpow2.f32 %v4122_v1 }
 0xb6d   : > { %v4092_v34 = vsub.f32 %v7205_v14, %v4084_v27  ;;  %v4116_v12 = vsub.f32 %v7169_v51, %v4084_v27  ;;  %v4085_v28 = vmax.f32 %v4049_v8, %v4073_v62  ;;  %5944 = vpow2.f32 %v4098_v30  ;;  %v4881_v30 = vld [vmem:[%s7355_s11 + $0xc] sm:$0xf] }
 0xb6e   : > { %v4076_v57 = vpop.xlane.xlu0 %4075  ;;  %5706 = vmatprep.subr.msk.bf16.mxu0 %vm2441_vm11, %v4881_v30  ;;  %v4395_v27 = vsel %vm2441_vm11, %v4881_v30, 0  ;;  %v4486_v8 = vld [vmem:[%s6156_s15 + $0x8] sm:$0xff] }
 0xb6f   : > { %v7239_v33 = vpop.eup %5930  ;;  %v4128_v22 = vmul.f32 1.442695, %v4116_v12  ;;  %v4117_v16 = vsub.f32 %v7172_v47, %v4085_v28  ;;  %v4086_v19 = vmax.f32 %v4052_v42, %v4076_v57  ;;  %v4104_v49 = vmul.f32 1.442695, %v4092_v34  ;;  %5614 = vmatpush3.bf16.msra.mxu0 %v4395_v27  ;;  %v4485_v12 = vld [vmem:[%s6156_s15] sm:$0xff]  ;;  %v4488_v57 = vld [vmem:[%s6156_s15 + $0x18] sm:$0xff] }
 0xb70   : > { %v4079_v43 = vpop.xlane.xlu1 %4078  ;;  %v4142_v3 = vsel %vm1224_vm10, %v7239_v33, 0.0  ;;  %v4093_v18 = vsub.f32 %v7213_v29, %v4085_v28  ;;  %v6024_v34 = vmov 0   ;;  %v4487_v28 = vld [vmem:[%s6156_s15 + $0x10] sm:$0xff] }
 0xb71   : > { %v7244_v50 = vpop.eup %5932  ;;  %v4130_v31 = vmul.f32 1.442695, %v4117_v16  ;;  %v4087_v14 = vmax.f32 %v4055_v0, %v4079_v43  ;;  %4143 = vadd.xlane.f32.xlu0 %v4142_v3  ;;  %v4094_v2 = vsub.f32 %v7200_v41, %v4086_v19  ;;  %v4118_v17 = vsub.f32 %v7218_v60, %v4086_v19  ;;  %5761 = vset.pattern.permute.xlu1 %v6024_v34  ;;  %v4491_v16 = vld [vmem:[%s6156_s15 + $0x30] sm:$0xff]  ;;  %v4492_v19 = vld [vmem:[%s6156_s15 + $0x38] sm:$0xff] }
 0xb72   : > { %v5935_v51 = vpop.eup %5934  ;;  %5946 = vpow2.f32 %v4128_v22  ;;  %v4145_v11 = vsel %vm1224_vm10, %v7244_v50, 0.0  ;;  %v4106_v29 = vmul.f32 1.442695, %v4093_v18  ;;  %v4193_v39 = vpack.c.bf16 %v7244_v50, %v7239_v33  ;;  %5760 = vset.pattern.permute.xlu0 %v6024_v34  ;;  %v4489_v33 = vld [vmem:[%s6156_s15 + $0x20] sm:$0xff]  ;;  %v4490_v22 = vld [vmem:[%s6156_s15 + $0x28] sm:$0xff] }
 0xb73   : > { %v4095_v47 = vsub.f32 %v7208_v5, %v4087_v14  ;;  %v4119_v6 = vsub.f32 %v7223_v23, %v4087_v14  ;;  %v5937_v9 = vpop.eup %5936  ;;  %5948 = vpow2.f32 %v4130_v31  ;;  %v4108_v10 = vmul.f32 1.442695, %v4094_v2  ;;  %4146 = vadd.xlane.f32.xlu1 %v4145_v11  ;;  %v4922_v34 = vld [vmem:[%s7356_s12] ss:$0 sm:$0xff] }
 0xb74   : > { %v4132_v45 = vmul.f32 1.442695, %v4118_v17  ;;  %v5939_v35 = vpop.eup %5938  ;;  %5950 = vpow2.f32 %v4104_v49  ;;  %v4166_v60 = vsel %vm1249_vm9, %v5935_v51, 0.0  ;;  %v4169_v23 = vsel %vm1249_vm9, %v5937_v9, 0.0 }
 0xb75   : > { %v4110_v62 = vmul.f32 1.442695, %v4095_v47  ;;  %v4134_v41 = vmul.f32 1.442695, %v4119_v6  ;;  %v5941_v15 = vpop.eup %5940  ;;  %5952 = vpow2.f32 %v4108_v10  ;;  %4167 = vadd.xlane.f32.xlu0 %v4166_v60  ;;  %v4201_v40 = vpack.c.bf16 %v5937_v9, %v5935_v51 }
 0xb76   : > { %v5943_v5 = vpop.eup %5942  ;;  %5954 = vpow2.f32 %v4132_v45  ;;  %v4136_v13 = vsel %vm1224_vm10, %v5939_v35, 0.0  ;;  %v4160_v20 = vsel %vm1249_vm9, %v5941_v15, 0.0 }
 0xb77   : > { %5956 = vpow2.f32 %v4110_v62  ;;  %v4200_v26 = vpack.c.bf16 %v5943_v5, %v5941_v15  ;;  %v5945_v36 = vpop.eup %5944  ;;  %4170 = vadd.xlane.f32.xlu1 %v4169_v23  ;;  %v4163_v25 = vsel %vm1249_vm9, %v5943_v5, 0.0 }
 0xb78   : > { %5958 = vpow2.f32 %v4134_v41  ;;  %v4139_v24 = vsel %vm1224_vm10, %v5945_v36, 0.0 }
 0xb79   : > { %5589 = vmatprep.mubr.msk.bf16.mxu1 %vm1249_vm9, %v4200_v26  ;;  %4137 = vadd.xlane.f32.xlu0 %v4136_v13  ;;  %5960 = vpow2.f32 %v4106_v29 }
 0xb7a   : > { %5590 = vmatmul.mubr.msk.bf16.vlgmr.msra.gmra.mrb[120].mxu1 %vm1249_vm9, %v4201_v40 }
 0xb7b   : > { %5598 = vmatpush3.bf16.msra.mxu1 %v7180_v38  ;;  %4140 = vadd.xlane.f32.xlu1 %v4139_v24 }
 0xb7c   : > { %v5947_v61 = vpop.eup %5946  ;;  %5599 = vmatprep.subr.bf16.mxu1 %v7178_v52 }
 0xb7d   : > { %v5949_v63 = vpop.eup %5948  ;;  %4161 = vadd.xlane.f32.xlu0 %v4160_v20 }
 0xb7e   : > { %v5951_v32 = vpop.eup %5950  ;;  %v4202_v21 = vpack.c.bf16 %v5949_v63, %v5947_v61  ;;  %v4175_v48 = vsel %vm1249_vm9, %v5949_v63, 0.0 }
 0xb7f   : > { %v5953_v7 = vpop.eup %5952  ;;  %5600 = vmatpush3.bf16.msra.mxu1 %v7178_v52  ;;  %4164 = vadd.xlane.f32.xlu1 %v4163_v25  ;;  %v4192_v52 = vpack.c.bf16 %v5945_v36, %v5939_v35  ;;  %v4148_v55 = vsel %vm1224_vm10, %v5951_v32, 0.0 }
 0xb80   : > { %v5955_v54 = vpop.eup %5954  ;;  %5601 = vmatprep.subr.bf16.mxu1 %v7185_v4  ;;  %v4154_v38 = vsel %vm1224_vm10, %v5953_v7, 0.0  ;;  %5593 = vmatprep.mubr.msk.bf16.mxu1 %vm1249_vm9, %v4202_v21 }
 0xb81   : > { %v5957_v56 = vpop.eup %5956  ;;  %4155 = vadd.xlane.f32.xlu0 %v4154_v38  ;;  %v4178_v1 = vsel %vm1249_vm9, %v5955_v54, 0.0 }
 0xb82   : > { %v5959_v59 = vpop.eup %5958  ;;  %v4157_v46 = vsel %vm1224_vm10, %v5957_v56, 0.0  ;;  %v4195_v53 = vpack.c.bf16 %v5957_v56, %v5953_v7 }
 0xb83   : > { %5602 = vmatpush3.bf16.msra.mxu1 %v7185_v4  ;;  %v4203_v37 = vpack.c.bf16 %v5959_v59, %v5955_v54  ;;  %v5961_v42 = vpop.eup %5960  ;;  %4158 = vadd.xlane.f32.xlu1 %v4157_v46  ;;  %v4172_v4 = vsel %vm1249_vm9, %v5947_v61, 0.0 }
 0xb84   : > { %5603 = vmatprep.subr.bf16.mxu1 %v7183_v58  ;;  %v4151_v44 = vsel %vm1224_vm10, %v5961_v42, 0.0  ;;  %v4194_v0 = vpack.c.bf16 %v5961_v42, %v5951_v32 }
 0xb85   : > { %5594 = vmatmul.mubr.msk.bf16.gmra.mrb[124].mxu1 %vm1249_vm9, %v4203_v37  ;;  %4149 = vadd.xlane.f32.xlu0 %v4148_v55 }
 0xb86   : > { %5605 = vmatprep.mubr.msk.bf16.mxu1 %vm1224_vm10, %v4192_v52 }
 0xb87   : > { %5604 = vmatpush3.bf16.msra.mxu1 %v7183_v58  ;;  %4152 = vadd.xlane.f32.xlu1 %v4151_v44  ;;  %v4181_v58 = vsel %vm1249_vm9, %v5959_v59, 0.0 }
 0xb89   : > { %4173 = vadd.xlane.f32.xlu0 %v4172_v4 }
 0xb8b   : > { %4176 = vadd.xlane.f32.xlu1 %v4175_v48 }
 0xb8d   : > { %5606 = vmatmul.mubr.msk.bf16.vlgmr.msra.gmra.mrb[120].mxu1 %vm1224_vm10, %v4193_v39  ;;  %4179 = vadd.xlane.f32.xlu0 %v4178_v1 }
 0xb8e   : > { %5609 = vmatprep.mubr.msk.bf16.mxu1 %vm1224_vm10, %v4194_v0 }
 0xb8f   : > { %4182 = vadd.xlane.f32.xlu1 %v4181_v58 }
 0xb95   : > { %5610 = vmatmul.mubr.msk.bf16.gmra.mrb[124].mxu1 %vm1224_vm10, %v4195_v53 }
 0xba0   : > { %4508 = vperm.xlu1 %5761, %v4486_v8  }
 0xba3   : > { %4503 = vperm.xlu0 %5760, %v4485_v12  }
 0xba4   : > { %4513 = vperm.xlu1 %5761, %v4487_v28  }
 0xba8   : > { %4518 = vperm.xlu1 %5761, %v4488_v57  }
 0xbac   : > { %4523 = vperm.xlu1 %5761, %v4489_v33  }
 0xbb0   : > { %4528 = vperm.xlu1 %5761, %v4490_v22  }
 0xbb4   : > { %4533 = vperm.xlu1 %5761, %v4491_v16   ;;  %v4495_v16 = vld [vmem:[#allocation3 + $0x10] sm:$0xff] }
 0xbb8   : > { %4538 = vperm.xlu1 %5761, %v4492_v19  }
 0xbfe   : > { %v4144_v43 = vpop.xlane.xlu0 %4143 }
 0xc00   : > { %v4147_v3 = vpop.xlane.xlu1 %4146 }
 0xc02   : > { %v4168_v50 = vpop.xlane.xlu0 %4167 }
 0xc03   : > { %v4186_v9 = vadd.f32 %v4168_v50, %v4144_v43 }
 0xc04   : > { %v4171_v49 = vpop.xlane.xlu1 %4170 }
 0xc05   : > { %v4187_v45 = vadd.f32 %v4171_v49, %v4147_v3  ;;  %5962 = vrcp.f32 %v4186_v9 }
 0xc06   : > { %v4138_v31 = vpop.xlane.xlu0 %4137 }
 0xc07   : > { %5964 = vrcp.f32 %v4187_v45 }
 0xc08   : > { %v4141_v14 = vpop.xlane.xlu1 %4140 }
 0xc0a   : > { %v4162_v51 = vpop.xlane.xlu0 %4161 }
 0xc0b   : > { %v4184_v35 = vadd.f32 %v4162_v51, %v4138_v31  ;;  %v4493_v31 = vld [vmem:[#allocation3] sm:$0xff] }
 0xc0c   : > { %v4165_v2 = vpop.xlane.xlu1 %4164 }
 0xc0d   : > { %v4185_v62 = vadd.f32 %v4165_v2, %v4141_v14  ;;  %5966 = vrcp.f32 %v4184_v35  ;;  %v4496_v14 = vld [vmem:[#allocation3 + $0x18] sm:$0xff] }
 0xc0e   : > { %v4156_v17 = vpop.xlane.xlu0 %4155 }
 0xc0f   : > { %5968 = vrcp.f32 %v4185_v62  ;;  %v5963_v26 = vpop.eup %5962 }
 0xc10   : > { %v4159_v18 = vpop.xlane.xlu1 %4158 }
 0xc11   : > { %v5965_v40 = vpop.eup %5964 }
 0xc12   : > { %v4150_v47 = vpop.xlane.xlu0 %4149 }
 0xc14   : > { %v4153_v6 = vpop.xlane.xlu1 %4152 }
 0xc16   : > { %v4174_v10 = vpop.xlane.xlu0 %4173 }
 0xc17   : > { %v4188_v15 = vadd.f32 %v4174_v10, %v4150_v47  ;;  %v5967_v24 = vpop.eup %5966  ;;  %v4494_v47 = vld [vmem:[#allocation3 + $0x8] sm:$0xff] }
 0xc18   : > { %v4177_v11 = vpop.xlane.xlu1 %4176 }
 0xc19   : > { %v4189_v23 = vadd.f32 %v4177_v11, %v4153_v6  ;;  %5970 = vrcp.f32 %v4188_v15  ;;  %v5969_v20 = vpop.eup %5968 }
 0xc1a   : > { %v4180_v41 = vpop.xlane.xlu0 %4179 }
 0xc1b   : > { %v4190_v5 = vadd.f32 %v4180_v41, %v4156_v17 }
 0xc1c   : > { %v4183_v60 = vpop.xlane.xlu1 %4182 }
 0xc1d   : > { %v4191_v29 = vadd.f32 %v4183_v60, %v4159_v18  ;;  %5972 = vrcp.f32 %v4190_v5  ;;  %v4499_v60 = vld [vmem:[#allocation3 + $0x30] sm:$0xff] }
 0xc1f   : > { %5974 = vrcp.f32 %v4191_v29 }
 0xc20   : > { %5976 = vrcp.f32 %v4189_v23  ;;  %v4509_v53 = vpop.permute.xlu1 %4508  ;;  %v4497_v23 = vld [vmem:[#allocation3 + $0x20] sm:$0xff] }
 0xc22   : > { %v4504_v22 = vpop.permute.xlu0 %4503 }
 0xc23   : > { %v5971_v56 = vpop.eup %5970 }
 0xc24   : > { %v4514_v30 = vpop.permute.xlu1 %4513 }
 0xc27   : > { %v5973_v46 = vpop.eup %5972 }
 0xc28   : > { %v4519_v27 = vpop.permute.xlu1 %4518 }
 0xc29   : > { %v5975_v42 = vpop.eup %5974 }
 0xc2a   : > { %v5977_v55 = vpop.eup %5976 }
 0xc2c   : > { %v4524_v8 = vpop.permute.xlu1 %4523 }
 0xc30   : > { %v4529_v12 = vpop.permute.xlu1 %4528 }
 0xc34   : > { %v4534_v6 = vpop.permute.xlu1 %4533 }
 0xc60   : > { %v5607_v36 = vpop.f32.mrb[120].mxu1 }
 0xc61   : > { %v4331_v13 = vpop.f32.mrb[121].mxu1  ;;  %v4372_v63 = vmul.f32 %v5963_v26, %v5607_v36 }
 0xc62   : > { %v5608_v61 = vpop.f32.mrb[122].mxu1  ;;  %v4370_v7 = vmul.f32 %v5967_v24, %v4331_v13  ;;  %v4500_v24 = vld [vmem:[#allocation3 + $0x38] sm:$0xff] }
 0xc63   : > { %v4373_v32 = vmul.f32 %v5965_v40, %v5608_v61  ;;  %v4334_v21 = vpop.f32.mrb[123].mxu1  ;;  %v4539_v40 = vpop.permute.xlu1 %4538 }
 0xc64   : > { %v4371_v25 = vmul.f32 %v5969_v20, %v4334_v21 }
 0xc65   : > { %v4379_v54 = vpack.c.bf16 %v4373_v32, %v4372_v63  ;;  %v4498_v32 = vld [vmem:[#allocation3 + $0x28] sm:$0xff] }
 0xc66   : > { %v4378_v38 = vpack.c.bf16 %v4371_v25, %v4370_v7 }
 0xc68   : > { %v5611_v59 = vpop.f32.mrb[124].mxu1  ;;  %5615 = vmatprep.mubr.msk.bf16.mxu0 %vm1065_vm6, %v4378_v38 }
 0xc69   : > { %v4347_v37 = vpop.f32.mrb[125].mxu1  ;;  %5616 = vmatmul.mubr.msk.bf16.vlgmr.msra.gmra.mrb[52].mxu0 %vm1065_vm6, %v4379_v54  ;;  %v4376_v44 = vmul.f32 %v5973_v46, %v5611_v59 }
 0xc6a   : > { %v5612_v52 = vpop.f32.mrb[126].mxu1  ;;  %v4374_v48 = vmul.f32 %v5971_v56, %v4347_v37 }
 0xc6b   : > { %v4377_v4 = vmul.f32 %v5975_v42, %v5612_v52  ;;  %v4350_v39 = vpop.f32.mrb[127].mxu1 }
 0xc6c   : > { %v4375_v0 = vmul.f32 %v5977_v55, %v4350_v39 }
 0xc6d   : > { %v4381_v1 = vpack.c.bf16 %v4377_v4, %v4376_v44 }
 0xc6e   : > { %v4380_v58 = vpack.c.bf16 %v4375_v0, %v4374_v48 }
 0xc70   : > { %5619 = vmatprep.mubr.msk.bf16.mxu0 %vm1065_vm6, %v4380_v58 }
 0xc71   : > { %5620 = vmatmul.mubr.msk.bf16.gmra.mrb[56].mxu0 %vm1065_vm6, %v4381_v1 }
 0xd3c   : > { %v5617_v28 = vpop.f32.mrb[52].mxu0 }
 0xd3d   : > { %v4479_v57 = vadd.f32 %v5617_v28, %v4922_v34  ;;  %v4431_v33 = vpop.f32.mrb[53].mxu0 }
 0xd3e   : > { %v4477_v19 = vadd.f32 %v4922_v34, %v4431_v33  ;;  %v5618_v43 = vpop.f32.mrb[54].mxu0 }
 0xd3f   : > { %v4543_v3 = vmul.f32 %v4514_v30, %v4479_v57  ;;  %v4480_v50 = vadd.f32 %v5618_v43, %v4922_v34  ;;  %v4434_v49 = vpop.f32.mrb[55].mxu0 }
 0xd40   : > { %v4478_v51 = vadd.f32 %v4922_v34, %v4434_v49  ;;  %v4541_v2 = vmul.f32 %v4504_v22, %v4477_v19 }
 0xd41   : > { %v4551_v17 = vadd.f32 %v4543_v3, %v4495_v16  ;;  %v4544_v18 = vmul.f32 %v4519_v27, %v4480_v50 }
 0xd42   : > { %v4542_v9 = vmul.f32 %v4509_v53, %v4478_v51  ;;  %v4549_v10 = vadd.f32 %v4541_v2, %v4493_v31 }
 0xd43   : > { %4559 = vst.msk [vmem:[#allocation3 + $0x10] sm:$0xff] %vm728_vm4, %v4551_v17  ;;  %v4552_v45 = vadd.f32 %v4544_v18, %v4496_v14 }
 0xd44   : > { %v4550_v11 = vadd.f32 %v4542_v9, %v4494_v47  ;;  %4557 = vst.msk [vmem:[#allocation3] sm:$0xff] %vm728_vm4, %v4549_v10  ;;  %v5621_v35 = vpop.f32.mrb[56].mxu0 }
 0xd45   : > { %4560 = vst.msk [vmem:[#allocation3 + $0x18] sm:$0xff] %vm728_vm4, %v4552_v45  ;;  %v4483_v62 = vadd.f32 %v5621_v35, %v4922_v34  ;;  %v4447_v41 = vpop.f32.mrb[57].mxu0 }
 0xd46   : > { %4558 = vst.msk [vmem:[#allocation3 + $0x8] sm:$0xff] %vm728_vm4, %v4550_v11  ;;  %v4481_v15 = vadd.f32 %v4922_v34, %v4447_v41  ;;  %v5622_v5 = vpop.f32.mrb[58].mxu0 }
 0xd47   : > { %v4547_v29 = vmul.f32 %v4534_v6, %v4483_v62  ;;  %v4484_v26 = vadd.f32 %v5622_v5, %v4922_v34  ;;  %v4450_v36 = vpop.f32.mrb[59].mxu0 }
 0xd48   : > { %v4545_v13 = vmul.f32 %v4524_v8, %v4481_v15  ;;  %v4482_v61 = vadd.f32 %v4922_v34, %v4450_v36  ;;  %4568 = sbr.rel (%p4923_p8) target bundleno = 3415 (0xd57), region = 80 }
 0xd49   : > { %v4555_v20 = vadd.f32 %v4547_v29, %v4499_v60  ;;  %v4548_v63 = vmul.f32 %v4539_v40, %v4484_v26 }
 0xd4a   : > { %v4553_v21 = vadd.f32 %v4545_v13, %v4497_v23  ;;  %v4546_v7 = vmul.f32 %v4529_v12, %v4482_v61  ;;  %v4571_v59 = vld [vmem:[#allocation3 + $0x10] sm:$0xff] (!%p4923_p8) }
 0xd4b   : > { %4563 = vst.msk [vmem:[#allocation3 + $0x30] sm:$0xff] %vm728_vm4, %v4555_v20  ;;  %v4556_v25 = vadd.f32 %v4548_v63, %v4500_v24  ;;  %v4569_v38 = vld [vmem:[#allocation3] sm:$0xff] (!%p4923_p8)  ;;  %4579 = vst.msk [vmem:[%s6145_s17 + $0x10] sm:$0xff] (!%p4923_p8), %vm728_vm4, %v4571_v59 }
 0xd4c   : > { %4561 = vst.msk [vmem:[#allocation3 + $0x20] sm:$0xff] %vm728_vm4, %v4553_v21  ;;  %v4554_v54 = vadd.f32 %v4546_v7, %v4498_v32  ;;  %4577 = vst.msk [vmem:[%s6145_s17] sm:$0xff] (!%p4923_p8), %vm728_vm4, %v4569_v38  ;;  %v4572_v46 = vld [vmem:[#allocation3 + $0x18] sm:$0xff] (!%p4923_p8) }
 0xd4d   : > { %4564 = vst.msk [vmem:[#allocation3 + $0x38] sm:$0xff] %vm728_vm4, %v4556_v25  ;;  %v4570_v56 = vld [vmem:[#allocation3 + $0x8] sm:$0xff] (!%p4923_p8)  ;;  %4580 = vst.msk [vmem:[%s6145_s17 + $0x18] sm:$0xff] (!%p4923_p8), %vm728_vm4, %v4572_v46 }
 0xd4e   : > { %4562 = vst.msk [vmem:[#allocation3 + $0x28] sm:$0xff] %vm728_vm4, %v4554_v54  ;;  %4578 = vst.msk [vmem:[%s6145_s17 + $0x8] sm:$0xff] (!%p4923_p8), %vm728_vm4, %v4570_v56 }
 0xd52   : > { %v4575_v52 = vld [vmem:[#allocation3 + $0x30] sm:$0xff] }
 0xd53   : > { %v4573_v37 = vld [vmem:[#allocation3 + $0x20] sm:$0xff]  ;;  %4583 = vst.msk [vmem:[%s6145_s17 + $0x30] sm:$0xff] %vm728_vm4, %v4575_v52 }
 0xd54   : > { %4581 = vst.msk [vmem:[%s6145_s17 + $0x20] sm:$0xff] %vm728_vm4, %v4573_v37  ;;  %v4576_v55 = vld [vmem:[#allocation3 + $0x38] sm:$0xff] }
 0xd55   : > { %v4574_v42 = vld [vmem:[#allocation3 + $0x28] sm:$0xff]  ;;  %4584 = vst.msk [vmem:[%s6145_s17 + $0x38] sm:$0xff] %vm728_vm4, %v4576_v55 }
 0xd56   : > { %4582 = vst.msk [vmem:[%s6145_s17 + $0x28] sm:$0xff] %vm728_vm4, %v4574_v42 }
 0xd57 PF: > { %s7375_s25 = sld [smem:[#allocation6_spill]]  ;;  %s7377_s26 = sld [smem:[#allocation5_spill]] }
 0xd58   : > { %s7378_s27 = sld [smem:[#allocation7_spill]]  ;;  %s7379_s28 = sld [smem:[#allocation8_spill]] }
 0xd5d   : > { %s23_s29 = sadd.s32 1, %s7375_s25   ;;  %s7376_s25 = sld [smem:[#allocation4_spill]] }
 0xd5e   : > { %p20_p9 = scmp.ge.s32.totalorder %s23_s29, 10  }
 0xd60   :  { %22 = sbr.rel (!%p20_p9) target bundleno = 3 (0x3), region = 131 }

</bundles_post_ra>
